<compile_context>
chip_gen: v5e
topology: v5e:2x2
jax: 0.10.0
libtpu: 0.0.40
codegen_flags: <defaults>
</compile_context>

<pallas_src>
import jax
import jax.numpy as jnp
from jax import lax
from jax.experimental import pallas as pl
from jax.experimental.pallas import tpu as pltpu

BN_EPS = 1e-5


# ----------------------------- Pallas kernels ------------------------------

def _conv_pool_kernel(p_ref, w_ref, b_ref, o_ref):
    """Fused conv (as 4 pool-offset matmuls) + folded-BN + 2x2 max-pool + ReLU.

    p_ref: (4, Kd, P) bf16  transposed im2col patches, one slab per 2x2-pool
                            offset; columns (lanes) are (image, h', w').
    w_ref: (Cout, Kd) bf16  conv weight with the BN scale folded per channel.
    b_ref: (Cout, 1)  f32   folded BN bias (applied post-pool).
    o_ref: (Cout, P)  bf16  pooled activation, lane-dense, single wide store.
    """
    w = w_ref[...]
    # Running max over the 4 pool-window members: no strided gathers, no
    # pre-pool scratch, bounded live values (one patch slab + two f32 tiles).
    acc = jnp.dot(w, p_ref[0], preferred_element_type=jnp.float32)
    for i in range(1, 4):
        acc = jnp.maximum(acc, jnp.dot(w, p_ref[i],
                                       preferred_element_type=jnp.float32))
    # Bias + ReLU post-pool (max commutes with +bias and with ReLU; the BN
    # scale is already in the weight, so negative scales stay correct).
    o_ref[...] = jnp.maximum(acc + b_ref[...], 0.0).astype(o_ref.dtype)


def _fc_fused_kernel(x_ref, w1_ref, b1_ref, w2_ref, b2_ref, o_ref):
    # x: (tb, 1568) bf16; w1: (1568, 600) bf16; w2: (600, 10) bf16; biases f32.
    h = jnp.dot(x_ref[...], w1_ref[...],
                preferred_element_type=jnp.float32) + b1_ref[...]
    # TODO(synk): Dropout(p=0.5) is inference-mode identity (no RNG masking).
    o_ref[...] = (jnp.dot(h.astype(jnp.bfloat16), w2_ref[...],
                          preferred_element_type=jnp.float32) + b2_ref[...])


# ------------------------------ Pallas wrappers -----------------------------

def conv_bn_relu_pool(patches, wmat, bias, *, Cout):
    # patches: (G, 4, Kd, P) bf16, G batch groups, P = tb*Ho*Wo spatial lanes.
    G, _, Kd, P = patches.shape
    return pl.pallas_call(
        _conv_pool_kernel,
        out_shape=jax.ShapeDtypeStruct((G, Cout, P), jnp.bfloat16),
        grid=(G,),
        in_specs=[
            pl.BlockSpec((None, 4, Kd, P), lambda g: (g, 0, 0, 0)),
            pl.BlockSpec((Cout, Kd), lambda g: (0, 0)),
            pl.BlockSpec((Cout, 1), lambda g: (0, 0)),
        ],
        out_specs=pl.BlockSpec((None, Cout, P), lambda g: (g, 0, 0)),
        compiler_params=pltpu.CompilerParams(
            dimension_semantics=("parallel",)),
    )(patches, wmat, bias)


def fc_tail(x, w1, b1, w2, b2):
    B, Fin = x.shape
    Fh, Fo = w1.shape[1], w2.shape[1]
    tbf = _fc_batch_tile(B)
    Gf = B // tbf
    return pl.pallas_call(
        _fc_fused_kernel,
        out_shape=jax.ShapeDtypeStruct((B, Fo), jnp.float32),
        grid=(Gf,),
        in_specs=[
            pl.BlockSpec((tbf, Fin), lambda i: (i, 0)),
            pl.BlockSpec((Fin, Fh), lambda i: (0, 0)),
            pl.BlockSpec((1, Fh), lambda i: (0, 0)),
            pl.BlockSpec((Fh, Fo), lambda i: (0, 0)),
            pl.BlockSpec((1, Fo), lambda i: (0, 0)),
        ],
        out_specs=pl.BlockSpec((tbf, Fo), lambda i: (i, 0)),
        compiler_params=pltpu.CompilerParams(
            dimension_semantics=("parallel",)),
    )(x, w1, b1, w2, b2)


# ------------------------------- Glue (JAX) ---------------------------------

def _pool_split_patches(x_nhwc, k, pad, tb):
    """Transposed im2col, split by 2x2-max-pool window offset.

    Returns (G, 4, Cin*k*k, tb*Ho*Wo) bf16; the 4-axis enumerates the pool
    offsets (hp, wp); columns are ordered (image-in-group, h', w'); features
    are ordered (c, ki, kj) to match conv_w.reshape(Cout, Cin*k*k).
    """
    B, H, W, C = x_nhwc.shape
    assert H % 2 == 0 and W % 2 == 0, "pool assumes even spatial dims"
    Ho, Wo = H // 2, W // 2
    Kd = C * k * k
    G = B // tb
    xp = jnp.pad(x_nhwc, ((0, 0), (pad, pad), (pad, pad), (0, 0)))
    cols = [xp[:, ki:ki + H, kj:kj + W, :] for ki in range(k) for kj in range(k)]
    pat = jnp.stack(cols, axis=-1)                    # (B, H, W, C, k*k)
    pat = pat.reshape(B, H, W, Kd)                    # features (c, ki, kj)
    pat = pat.reshape(G, tb, Ho, 2, Wo, 2, Kd)        # h=2h'+hp, w=2w'+wp
    pat = pat.transpose(0, 3, 5, 6, 1, 2, 4)          # (G,hp,wp,Kd,tb,Ho,Wo)
    return pat.reshape(G, 4, Kd, tb * Ho * Wo).astype(jnp.bfloat16)


def _is_multi_tensorcore():
    # Best effort generation check (v4 / v5p / v7x expose >1 TensorCore).
    try:
        kind = jax.devices()[0].device_kind.lower()
    except Exception:
        return False
    return any(tag in kind for tag in ("v4", "v5p", "v7", "7x"))


def _pick_conv_tile_b(B, cap=4):
    """Images per conv grid step.

    Larger tb widens the lane dimension of every conv block (denser DMA /
    stores, fewer grid steps) which is what single-TC v5e/v6e want; on
    multi-TC parts keep >= 2 grid steps so the "parallel" axis feeds both
    TensorCores.  cap bounds the per-step VMEM / register footprint.
    """
    limit = min(cap, B)
    if _is_multi_tensorcore() and B >= 2:
        limit = min(limit, max(1, B // 2))
    best = 1
    for t in range(1, limit + 1):
        if B % t == 0:
            best = t
    return best


def _fc_batch_tile(B):
    if B <= 128:
        return B
    for t in (128, 64, 32, 16, 8):
        if B % t == 0:
            return t
    return B


def prepare_params(p):
    """One-time host-side re-layout: fold BN scale into conv weights, fold
    conv-bias/BN into a post-pool bias, transpose fc weights, cast to bf16."""
    def fold(conv_w, conv_b, gamma, beta, mean, var):
        s = gamma / jnp.sqrt(var + BN_EPS)                       # (Cout,)
        w = (conv_w.reshape(conv_w.shape[0], -1) * s[:, None])   # scale pre-pool
        b = (conv_b - mean) * s + beta                           # bias post-pool
        return w.astype(jnp.bfloat16), b.astype(jnp.float32)[:, None]

    w1, b1 = fold(p['conv1_w'], p['conv1_b'], p['bn1_gamma'], p['bn1_beta'],
                  p['bn1_mean'], p['bn1_var'])
    w2, b2 = fold(p['conv2_w'], p['conv2_b'], p['bn2_gamma'], p['bn2_beta'],
                  p['bn2_mean'], p['bn2_var'])
    return {
        'w1': w1, 'b1': b1, 'w2': w2, 'b2': b2,
        # conv2 output feature order is (c, h, w) == torch's flatten order, so
        # fc1 only needs a plain transpose (no permutation).
        'fc1w': p['fc1_w'].T.astype(jnp.bfloat16),
        'fc1b': p['fc1_b'][None, :].astype(jnp.float32),
        'fc2w': p['fc2_w'].T.astype(jnp.bfloat16),
        'fc2b': p['fc2_b'][None, :].astype(jnp.float32),
    }


def cnn_forward(x_nchw, prep):
    B = x_nchw.shape[0]
    tb = _pick_conv_tile_b(B)
    G = B // tb

    x = jnp.transpose(x_nchw, (0, 2, 3, 1))                      # NCHW -> NHWC

    p1 = _pool_split_patches(x, k=3, pad=1, tb=tb)               # (G,4,9,tb*196)
    a1 = conv_bn_relu_pool(p1, prep['w1'], prep['b1'], Cout=8)   # (G,8,tb*196)

    x2 = (a1.reshape(G, 8, tb, 14, 14).transpose(0, 2, 3, 4, 1)
            .reshape(B, 14, 14, 8))                              # NHWC, bf16
    # TODO(synk): conv2's im2col still materializes (G,4,200,tb*49) in HBM via
    #             XLA; at large batch this should be formed in-kernel from a1.
    p2 = _pool_split_patches(x2, k=5, pad=2, tb=tb)              # (G,4,200,tb*49)
    a2 = conv_bn_relu_pool(p2, prep['w2'], prep['b2'], Cout=32)  # (G,32,tb*49)

    feat = (a2.reshape(G, 32, tb, 49).transpose(0, 2, 1, 3)
              .reshape(B, 32 * 7 * 7))                           # torch (C,H,W)
    return fc_tail(feat, prep['fc1w'], prep['fc1b'],
                   prep['fc2w'], prep['fc2b'])                   # (B, 10) f32


# -------------------------- Deterministic params ----------------------------

def init_params(key):
    ks = jax.random.split(key, 16)

    def u(k, shape, fan_in):
        bound = 1.0 / jnp.sqrt(jnp.float32(fan_in))
        return jax.random.uniform(k, shape, jnp.float32, -bound, bound)

    return {
        'conv1_w': u(ks[0], (8, 1, 3, 3), 1 * 3 * 3),
        'conv1_b': u(ks[1], (8,), 1 * 3 * 3),
        'bn1_gamma': 1.0 + 0.1 * jax.random.normal(ks[2], (8,), jnp.float32),
        'bn1_beta': 0.1 * jax.random.normal(ks[3], (8,), jnp.float32),
        'bn1_mean': 0.1 * jax.random.normal(ks[4], (8,), jnp.float32),
        'bn1_var': jax.random.uniform(ks[5], (8,), jnp.float32, 0.5, 1.5),
        'conv2_w': u(ks[6], (32, 8, 5, 5), 8 * 5 * 5),
        'conv2_b': u(ks[7], (32,), 8 * 5 * 5),
        'bn2_gamma': 1.0 + 0.1 * jax.random.normal(ks[8], (32,), jnp.float32),
        'bn2_beta': 0.1 * jax.random.normal(ks[9], (32,), jnp.float32),
        'bn2_mean': 0.1 * jax.random.normal(ks[10], (32,), jnp.float32),
        'bn2_var': jax.random.uniform(ks[11], (32,), jnp.float32, 0.5, 1.5),
        'fc1_w': u(ks[12], (600, 32 * 7 * 7), 32 * 7 * 7),
        'fc1_b': u(ks[13], (600,), 32 * 7 * 7),
        'fc2_w': u(ks[14], (10, 600), 600),
        'fc2_b': u(ks[15], (10,), 600),
    }


# ---------------------------- Pure-JAX reference ----------------------------

def reference_forward(x_nchw, p):
    def bn(y, gamma, beta, mean, var):
        s = gamma / jnp.sqrt(var + BN_EPS)
        return y * s[None, :, None, None] + (beta - mean * s)[None, :, None, None]

    y = lax.conv_general_dilated(x_nchw, p['conv1_w'], (1, 1), ((1, 1), (1, 1)),
                                 dimension_numbers=('NCHW', 'OIHW', 'NCHW'),
                                 precision=lax.Precision.HIGHEST)
    y = y + p['conv1_b'][None, :, None, None]
    y = jnp.maximum(bn(y, p['bn1_gamma'], p['bn1_beta'],
                       p['bn1_mean'], p['bn1_var']), 0.0)
    y = lax.reduce_window(y, -jnp.inf, lax.max, (1, 1, 2, 2), (1, 1, 2, 2), 'VALID')

    y = lax.conv_general_dilated(y, p['conv2_w'], (1, 1), ((2, 2), (2, 2)),
                                 dimension_numbers=('NCHW', 'OIHW', 'NCHW'),
                                 precision=lax.Precision.HIGHEST)
    y = y + p['conv2_b'][None, :, None, None]
    y = jnp.maximum(bn(y, p['bn2_gamma'], p['bn2_beta'],
                       p['bn2_mean'], p['bn2_var']), 0.0)
    y = lax.reduce_window(y, -jnp.inf, lax.max, (1, 1, 2, 2), (1, 1, 2, 2), 'VALID')

    y = y.reshape(y.shape[0], -1)
    y = y @ p['fc1_w'].T + p['fc1_b']
    y = y @ p['fc2_w'].T + p['fc2_b']
    return y


# ----------------------------------- Main ------------------------------------

if __name__ == "__main__":
    key = jax.random.PRNGKey(0)
    pkey, xkey = jax.random.split(key)
    params = init_params(pkey)
    prep = prepare_params(params)        # one-time re-layout / BN fold / bf16

    # MNIST-shaped input (batch=2, 1x28x28) so the 32*7*7 flatten matches.
    x = jax.random.normal(xkey, (2, 1, 28, 28), jnp.float32)

    fwd = jax.jit(cnn_forward)
    out = jax.block_until_ready(fwd(x, prep))

    ref = reference_forward(x, params)
    assert out.shape == (2, 10), out.shape
    if not bool(jnp.allclose(out, ref, rtol=2e-2, atol=2e-2)):
        raise AssertionError("Pallas CNN output mismatch vs JAX reference")

    print("KERNEL_OK")
</pallas_src>

<mosaic_0001>
module attributes {stable_mosaic.version = 11 : i64} {
  func.func @_conv_pool_kernel(%arg0: i32, %arg1: memref<1x4x9x392xbf16, #tpu.memory_space<vmem>>, %arg2: memref<8x9xbf16, #tpu.memory_space<vmem>>, %arg3: memref<8x1xf32, #tpu.memory_space<vmem>>, %arg4: memref<1x8x392xbf16, #tpu.memory_space<vmem>>) attributes {dimension_semantics = [#tpu.dimension_semantics<parallel>], iteration_bounds = array<i64: 1>, scalar_prefetch = 0 : i64, scratch_operands = 0 : i64, tpu.core_type = #tpu.core_type<tc>, window_params = [{transform_indices = @transform_0, window_bounds = array<i64: 1, 4, 9, 392>}, {pipeline_mode = #tpu.pipeline_mode<synchronous>, transform_indices = @transform_1, window_bounds = array<i64: 8, 9>}, {pipeline_mode = #tpu.pipeline_mode<synchronous>, transform_indices = @transform_2, window_bounds = array<i64: 8, 1>}, {transform_indices = @transform_3, window_bounds = array<i64: 1, 8, 392>}]} {
    %c0 = arith.constant 0 : index
    %c0_0 = arith.constant 0 : index
    %0 = vector.load %arg2[%c0, %c0_0] : memref<8x9xbf16, #tpu.memory_space<vmem>>, vector<8x9xbf16>
    %c0_1 = arith.constant 0 : index
    %c0_2 = arith.constant 0 : index
    %c0_3 = arith.constant 0 : index
    %c0_4 = arith.constant 0 : index
    %1 = vector.load %arg1[%c0_1, %c0_2, %c0_3, %c0_4] : memref<1x4x9x392xbf16, #tpu.memory_space<vmem>>, vector<1x1x9x392xbf16>
    %2 = vector.shape_cast %1 : vector<1x1x9x392xbf16> to vector<9x392xbf16>
    %cst = arith.constant dense<0.000000e+00> : vector<8x392xf32>
    %3 = tpu.matmul %0, %2, %cst {dimension_numbers = #tpu.dot_dimension_numbers<[1], [0], [0], [1], [0, 0, 1, 1], [], []>} : vector<8x9xbf16>, vector<9x392xbf16>, vector<8x392xf32> -> vector<8x392xf32>
    %c0_5 = arith.constant 0 : index
    %c1 = arith.constant 1 : index
    %c0_6 = arith.constant 0 : index
    %c0_7 = arith.constant 0 : index
    %4 = vector.load %arg1[%c0_5, %c1, %c0_6, %c0_7] : memref<1x4x9x392xbf16, #tpu.memory_space<vmem>>, vector<1x1x9x392xbf16>
    %5 = vector.shape_cast %4 : vector<1x1x9x392xbf16> to vector<9x392xbf16>
    %cst_8 = arith.constant dense<0.000000e+00> : vector<8x392xf32>
    %6 = tpu.matmul %0, %5, %cst_8 {dimension_numbers = #tpu.dot_dimension_numbers<[1], [0], [0], [1], [0, 0, 1, 1], [], []>} : vector<8x9xbf16>, vector<9x392xbf16>, vector<8x392xf32> -> vector<8x392xf32>
    %7 = arith.maximumf %3, %6 : vector<8x392xf32>
    %c0_9 = arith.constant 0 : index
    %c2 = arith.constant 2 : index
    %c0_10 = arith.constant 0 : index
    %c0_11 = arith.constant 0 : index
    %8 = vector.load %arg1[%c0_9, %c2, %c0_10, %c0_11] : memref<1x4x9x392xbf16, #tpu.memory_space<vmem>>, vector<1x1x9x392xbf16>
    %9 = vector.shape_cast %8 : vector<1x1x9x392xbf16> to vector<9x392xbf16>
    %cst_12 = arith.constant dense<0.000000e+00> : vector<8x392xf32>
    %10 = tpu.matmul %0, %9, %cst_12 {dimension_numbers = #tpu.dot_dimension_numbers<[1], [0], [0], [1], [0, 0, 1, 1], [], []>} : vector<8x9xbf16>, vector<9x392xbf16>, vector<8x392xf32> -> vector<8x392xf32>
    %11 = arith.maximumf %7, %10 : vector<8x392xf32>
    %c0_13 = arith.constant 0 : index
    %c3 = arith.constant 3 : index
    %c0_14 = arith.constant 0 : index
    %c0_15 = arith.constant 0 : index
    %12 = vector.load %arg1[%c0_13, %c3, %c0_14, %c0_15] : memref<1x4x9x392xbf16, #tpu.memory_space<vmem>>, vector<1x1x9x392xbf16>
    %13 = vector.shape_cast %12 : vector<1x1x9x392xbf16> to vector<9x392xbf16>
    %cst_16 = arith.constant dense<0.000000e+00> : vector<8x392xf32>
    %14 = tpu.matmul %0, %13, %cst_16 {dimension_numbers = #tpu.dot_dimension_numbers<[1], [0], [0], [1], [0, 0, 1, 1], [], []>} : vector<8x9xbf16>, vector<9x392xbf16>, vector<8x392xf32> -> vector<8x392xf32>
    %15 = arith.maximumf %11, %14 : vector<8x392xf32>
    %c0_17 = arith.constant 0 : index
    %c0_18 = arith.constant 0 : index
    %16 = vector.load %arg3[%c0_17, %c0_18] : memref<8x1xf32, #tpu.memory_space<vmem>>, vector<8x1xf32>
    %17 = vector.broadcast %16 : vector<8x1xf32> to vector<8x392xf32>
    %18 = arith.addf %15, %17 : vector<8x392xf32>
    %cst_19 = arith.constant 0.000000e+00 : f32
    %19 = vector.broadcast %cst_19 : f32 to vector<8x392xf32>
    %20 = arith.maximumf %18, %19 : vector<8x392xf32>
    %21 = arith.truncf %20 : vector<8x392xf32> to vector<8x392xbf16>
    %c0_20 = arith.constant 0 : index
    %c0_21 = arith.constant 0 : index
    %c0_22 = arith.constant 0 : index
    %22 = vector.load %arg4[%c0_20, %c0_21, %c0_22] : memref<1x8x392xbf16, #tpu.memory_space<vmem>>, vector<1x8x392xbf16>
    %23 = vector.shape_cast %22 : vector<1x8x392xbf16> to vector<8x392xbf16>
    %24 = vector.shape_cast %21 : vector<8x392xbf16> to vector<1x8x392xbf16>
    tpu.vector_store %arg4[%c0_20, %c0_21, %c0_22], %24 {strides = array<i32>} : memref<1x8x392xbf16, #tpu.memory_space<vmem>>, vector<1x8x392xbf16>,
    return
  }
  func.func @transform_0(%arg0: i32) -> (i32, i32, i32, i32) {
    %c0_i32 = arith.constant 0 : i32
    %c0_i32_0 = arith.constant 0 : i32
    %c0_i32_1 = arith.constant 0 : i32
    %c0_i32_2 = arith.constant 0 : i32
    return %arg0, %c0_i32, %c0_i32_0, %c0_i32_1 : i32, i32, i32, i32
  }
  func.func @transform_1(%arg0: i32) -> (i32, i32) {
    %c0_i32 = arith.constant 0 : i32
    %c0_i32_0 = arith.constant 0 : i32
    %c0_i32_1 = arith.constant 0 : i32
    return %c0_i32, %c0_i32_0 : i32, i32
  }
  func.func @transform_2(%arg0: i32) -> (i32, i32) {
    %c0_i32 = arith.constant 0 : i32
    %c0_i32_0 = arith.constant 0 : i32
    %c0_i32_1 = arith.constant 0 : i32
    return %c0_i32, %c0_i32_0 : i32, i32
  }
  func.func @transform_3(%arg0: i32) -> (i32, i32, i32) {
    %c0_i32 = arith.constant 0 : i32
    %c0_i32_0 = arith.constant 0 : i32
    %c0_i32_1 = arith.constant 0 : i32
    return %arg0, %c0_i32, %c0_i32_0 : i32, i32, i32
  }
}

module attributes {stable_mosaic.version = 11 : i64} {
  func.func @_conv_pool_kernel(%arg0: i32, %arg1: memref<1x4x200x98xbf16, #tpu.memory_space<vmem>>, %arg2: memref<32x200xbf16, #tpu.memory_space<vmem>>, %arg3: memref<32x1xf32, #tpu.memory_space<vmem>>, %arg4: memref<1x32x98xbf16, #tpu.memory_space<vmem>>) attributes {dimension_semantics = [#tpu.dimension_semantics<parallel>], iteration_bounds = array<i64: 1>, scalar_prefetch = 0 : i64, scratch_operands = 0 : i64, tpu.core_type = #tpu.core_type<tc>, window_params = [{transform_indices = @transform_0, window_bounds = array<i64: 1, 4, 200, 98>}, {pipeline_mode = #tpu.pipeline_mode<synchronous>, transform_indices = @transform_1, window_bounds = array<i64: 32, 200>}, {pipeline_mode = #tpu.pipeline_mode<synchronous>, transform_indices = @transform_2, window_bounds = array<i64: 32, 1>}, {transform_indices = @transform_3, window_bounds = array<i64: 1, 32, 98>}]} {
    %c0 = arith.constant 0 : index
    %c0_0 = arith.constant 0 : index
    %0 = vector.load %arg2[%c0, %c0_0] : memref<32x200xbf16, #tpu.memory_space<vmem>>, vector<32x200xbf16>
    %c0_1 = arith.constant 0 : index
    %c0_2 = arith.constant 0 : index
    %c0_3 = arith.constant 0 : index
    %c0_4 = arith.constant 0 : index
    %1 = vector.load %arg1[%c0_1, %c0_2, %c0_3, %c0_4] : memref<1x4x200x98xbf16, #tpu.memory_space<vmem>>, vector<1x1x200x98xbf16>
    %2 = vector.shape_cast %1 : vector<1x1x200x98xbf16> to vector<200x98xbf16>
    %cst = arith.constant dense<0.000000e+00> : vector<32x98xf32>
    %3 = tpu.matmul %0, %2, %cst {dimension_numbers = #tpu.dot_dimension_numbers<[1], [0], [0], [1], [0, 0, 1, 1], [], []>} : vector<32x200xbf16>, vector<200x98xbf16>, vector<32x98xf32> -> vector<32x98xf32>
    %c0_5 = arith.constant 0 : index
    %c1 = arith.constant 1 : index
    %c0_6 = arith.constant 0 : index
    %c0_7 = arith.constant 0 : index
    %4 = vector.load %arg1[%c0_5, %c1, %c0_6, %c0_7] : memref<1x4x200x98xbf16, #tpu.memory_space<vmem>>, vector<1x1x200x98xbf16>
    %5 = vector.shape_cast %4 : vector<1x1x200x98xbf16> to vector<200x98xbf16>
    %cst_8 = arith.constant dense<0.000000e+00> : vector<32x98xf32>
    %6 = tpu.matmul %0, %5, %cst_8 {dimension_numbers = #tpu.dot_dimension_numbers<[1], [0], [0], [1], [0, 0, 1, 1], [], []>} : vector<32x200xbf16>, vector<200x98xbf16>, vector<32x98xf32> -> vector<32x98xf32>
    %7 = arith.maximumf %3, %6 : vector<32x98xf32>
    %c0_9 = arith.constant 0 : index
    %c2 = arith.constant 2 : index
    %c0_10 = arith.constant 0 : index
    %c0_11 = arith.constant 0 : index
    %8 = vector.load %arg1[%c0_9, %c2, %c0_10, %c0_11] : memref<1x4x200x98xbf16, #tpu.memory_space<vmem>>, vector<1x1x200x98xbf16>
    %9 = vector.shape_cast %8 : vector<1x1x200x98xbf16> to vector<200x98xbf16>
    %cst_12 = arith.constant dense<0.000000e+00> : vector<32x98xf32>
    %10 = tpu.matmul %0, %9, %cst_12 {dimension_numbers = #tpu.dot_dimension_numbers<[1], [0], [0], [1], [0, 0, 1, 1], [], []>} : vector<32x200xbf16>, vector<200x98xbf16>, vector<32x98xf32> -> vector<32x98xf32>
    %11 = arith.maximumf %7, %10 : vector<32x98xf32>
    %c0_13 = arith.constant 0 : index
    %c3 = arith.constant 3 : index
    %c0_14 = arith.constant 0 : index
    %c0_15 = arith.constant 0 : index
    %12 = vector.load %arg1[%c0_13, %c3, %c0_14, %c0_15] : memref<1x4x200x98xbf16, #tpu.memory_space<vmem>>, vector<1x1x200x98xbf16>
    %13 = vector.shape_cast %12 : vector<1x1x200x98xbf16> to vector<200x98xbf16>
    %cst_16 = arith.constant dense<0.000000e+00> : vector<32x98xf32>
    %14 = tpu.matmul %0, %13, %cst_16 {dimension_numbers = #tpu.dot_dimension_numbers<[1], [0], [0], [1], [0, 0, 1, 1], [], []>} : vector<32x200xbf16>, vector<200x98xbf16>, vector<32x98xf32> -> vector<32x98xf32>
    %15 = arith.maximumf %11, %14 : vector<32x98xf32>
    %c0_17 = arith.constant 0 : index
    %c0_18 = arith.constant 0 : index
    %16 = vector.load %arg3[%c0_17, %c0_18] : memref<32x1xf32, #tpu.memory_space<vmem>>, vector<32x1xf32>
    %17 = vector.broadcast %16 : vector<32x1xf32> to vector<32x98xf32>
    %18 = arith.addf %15, %17 : vector<32x98xf32>
    %cst_19 = arith.constant 0.000000e+00 : f32
    %19 = vector.broadcast %cst_19 : f32 to vector<32x98xf32>
    %20 = arith.maximumf %18, %19 : vector<32x98xf32>
    %21 = arith.truncf %20 : vector<32x98xf32> to vector<32x98xbf16>
    %c0_20 = arith.constant 0 : index
    %c0_21 = arith.constant 0 : index
    %c0_22 = arith.constant 0 : index
    %22 = vector.load %arg4[%c0_20, %c0_21, %c0_22] : memref<1x32x98xbf16, #tpu.memory_space<vmem>>, vector<1x32x98xbf16>
    %23 = vector.shape_cast %22 : vector<1x32x98xbf16> to vector<32x98xbf16>
    %24 = vector.shape_cast %21 : vector<32x98xbf16> to vector<1x32x98xbf16>
    tpu.vector_store %arg4[%c0_20, %c0_21, %c0_22], %24 {strides = array<i32>} : memref<1x32x98xbf16, #tpu.memory_space<vmem>>, vector<1x32x98xbf16>,
    return
  }
  func.func @transform_0(%arg0: i32) -> (i32, i32, i32, i32) {
    %c0_i32 = arith.constant 0 : i32
    %c0_i32_0 = arith.constant 0 : i32
    %c0_i32_1 = arith.constant 0 : i32
    %c0_i32_2 = arith.constant 0 : i32
    return %arg0, %c0_i32, %c0_i32_0, %c0_i32_1 : i32, i32, i32, i32
  }
  func.func @transform_1(%arg0: i32) -> (i32, i32) {
    %c0_i32 = arith.constant 0 : i32
    %c0_i32_0 = arith.constant 0 : i32
    %c0_i32_1 = arith.constant 0 : i32
    return %c0_i32, %c0_i32_0 : i32, i32
  }
  func.func @transform_2(%arg0: i32) -> (i32, i32) {
    %c0_i32 = arith.constant 0 : i32
    %c0_i32_0 = arith.constant 0 : i32
    %c0_i32_1 = arith.constant 0 : i32
    return %c0_i32, %c0_i32_0 : i32, i32
  }
  func.func @transform_3(%arg0: i32) -> (i32, i32, i32) {
    %c0_i32 = arith.constant 0 : i32
    %c0_i32_0 = arith.constant 0 : i32
    %c0_i32_1 = arith.constant 0 : i32
    return %arg0, %c0_i32, %c0_i32_0 : i32, i32, i32
  }
}

module attributes {stable_mosaic.version = 11 : i64} {
  func.func @_fc_fused_kernel(%arg0: i32, %arg1: memref<2x1568xbf16, #tpu.memory_space<vmem>>, %arg2: memref<1568x600xbf16, #tpu.memory_space<vmem>>, %arg3: memref<1x600xf32, #tpu.memory_space<vmem>>, %arg4: memref<600x10xbf16, #tpu.memory_space<vmem>>, %arg5: memref<1x10xf32, #tpu.memory_space<vmem>>, %arg6: memref<2x10xf32, #tpu.memory_space<vmem>>) attributes {dimension_semantics = [#tpu.dimension_semantics<parallel>], iteration_bounds = array<i64: 1>, scalar_prefetch = 0 : i64, scratch_operands = 0 : i64, tpu.core_type = #tpu.core_type<tc>, window_params = [{transform_indices = @transform_0, window_bounds = array<i64: 2, 1568>}, {pipeline_mode = #tpu.pipeline_mode<synchronous>, transform_indices = @transform_1, window_bounds = array<i64: 1568, 600>}, {pipeline_mode = #tpu.pipeline_mode<synchronous>, transform_indices = @transform_2, window_bounds = array<i64: 1, 600>}, {pipeline_mode = #tpu.pipeline_mode<synchronous>, transform_indices = @transform_3, window_bounds = array<i64: 600, 10>}, {pipeline_mode = #tpu.pipeline_mode<synchronous>, transform_indices = @transform_4, window_bounds = array<i64: 1, 10>}, {transform_indices = @transform_5, window_bounds = array<i64: 2, 10>}]} {
    %c0 = arith.constant 0 : index
    %c0_0 = arith.constant 0 : index
    %0 = vector.load %arg1[%c0, %c0_0] : memref<2x1568xbf16, #tpu.memory_space<vmem>>, vector<2x1568xbf16>
    %c0_1 = arith.constant 0 : index
    %c0_2 = arith.constant 0 : index
    %1 = vector.load %arg2[%c0_1, %c0_2] : memref<1568x600xbf16, #tpu.memory_space<vmem>>, vector<1568x600xbf16>
    %cst = arith.constant dense<0.000000e+00> : vector<2x600xf32>
    %2 = tpu.matmul %0, %1, %cst {dimension_numbers = #tpu.dot_dimension_numbers<[1], [0], [0], [1], [0, 0, 1, 1], [], []>} : vector<2x1568xbf16>, vector<1568x600xbf16>, vector<2x600xf32> -> vector<2x600xf32>
    %c0_3 = arith.constant 0 : index
    %c0_4 = arith.constant 0 : index
    %3 = vector.load %arg3[%c0_3, %c0_4] : memref<1x600xf32, #tpu.memory_space<vmem>>, vector<1x600xf32>
    %4 = vector.broadcast %3 : vector<1x600xf32> to vector<2x600xf32>
    %5 = arith.addf %2, %4 : vector<2x600xf32>
    %6 = arith.truncf %5 : vector<2x600xf32> to vector<2x600xbf16>
    %c0_5 = arith.constant 0 : index
    %c0_6 = arith.constant 0 : index
    %7 = vector.load %arg4[%c0_5, %c0_6] : memref<600x10xbf16, #tpu.memory_space<vmem>>, vector<600x10xbf16>
    %cst_7 = arith.constant dense<0.000000e+00> : vector<2x10xf32>
    %8 = tpu.matmul %6, %7, %cst_7 {dimension_numbers = #tpu.dot_dimension_numbers<[1], [0], [0], [1], [0, 0, 1, 1], [], []>} : vector<2x600xbf16>, vector<600x10xbf16>, vector<2x10xf32> -> vector<2x10xf32>
    %c0_8 = arith.constant 0 : index
    %c0_9 = arith.constant 0 : index
    %9 = vector.load %arg5[%c0_8, %c0_9] : memref<1x10xf32, #tpu.memory_space<vmem>>, vector<1x10xf32>
    %10 = vector.broadcast %9 : vector<1x10xf32> to vector<2x10xf32>
    %11 = arith.addf %8, %10 : vector<2x10xf32>
    %c0_10 = arith.constant 0 : index
    %c0_11 = arith.constant 0 : index
    %12 = vector.load %arg6[%c0_10, %c0_11] : memref<2x10xf32, #tpu.memory_space<vmem>>, vector<2x10xf32>
    tpu.vector_store %arg6[%c0_10, %c0_11], %11 {strides = array<i32>} : memref<2x10xf32, #tpu.memory_space<vmem>>, vector<2x10xf32>,
    return
  }
  func.func @transform_0(%arg0: i32) -> (i32, i32) {
    %c0_i32 = arith.constant 0 : i32
    %c0_i32_0 = arith.constant 0 : i32
    return %arg0, %c0_i32 : i32, i32
  }
  func.func @transform_1(%arg0: i32) -> (i32, i32) {
    %c0_i32 = arith.constant 0 : i32
    %c0_i32_0 = arith.constant 0 : i32
    %c0_i32_1 = arith.constant 0 : i32
    return %c0_i32, %c0_i32_0 : i32, i32
  }
  func.func @transform_2(%arg0: i32) -> (i32, i32) {
    %c0_i32 = arith.constant 0 : i32
    %c0_i32_0 = arith.constant 0 : i32
    %c0_i32_1 = arith.constant 0 : i32
    return %c0_i32, %c0_i32_0 : i32, i32
  }
  func.func @transform_3(%arg0: i32) -> (i32, i32) {
    %c0_i32 = arith.constant 0 : i32
    %c0_i32_0 = arith.constant 0 : i32
    %c0_i32_1 = arith.constant 0 : i32
    return %c0_i32, %c0_i32_0 : i32, i32
  }
  func.func @transform_4(%arg0: i32) -> (i32, i32) {
    %c0_i32 = arith.constant 0 : i32
    %c0_i32_0 = arith.constant 0 : i32
    %c0_i32_1 = arith.constant 0 : i32
    return %c0_i32, %c0_i32_0 : i32, i32
  }
  func.func @transform_5(%arg0: i32) -> (i32, i32) {
    %c0_i32 = arith.constant 0 : i32
    %c0_i32_0 = arith.constant 0 : i32
    return %arg0, %c0_i32 : i32, i32
  }
}

</mosaic_0001>

<bundles_post_ra>
// kernel: cnn_forward.3
= control target key start
LH: loop header
LB: loop body
LE: loop exit
PB: predicated region body
PF: predicated region fallthrough
CT: control target
= control target key end

     0   :  { %vm40_vm0 = vcmask 1043456   ;;  %vm41_vm1 = vcmask 1044480   ;;  %v510_v2 = vmov 65535   ;;  %vm36_vm2 = vcmask 72704   ;;  %s694_s0 = inlined_call_operand.vmem [shape: bf16[1,4,9,392], index: 0, kind: input, shape index: {}]   ;;  %s695_s1 = inlined_call_operand.vmem [shape: bf16[8,9], index: 1, kind: input, shape index: {}]   ;;  %s696_s2 = inlined_call_operand.vmem [shape: f32[8,1], index: 2, kind: input, shape index: {}]   ;;  %s697_s3 = inlined_call_operand.vmem [shape: bf16[1,8,392], index: 3, kind: output, shape index: {}]  }
   0x1   :  { %v401_v0 = vld [vmem:[%s694_s0] sm:$0xf]  ;;  %v493_v1 = vld [vmem:[%s694_s0 + $0xc] sm:$0x10]  ;;  %v42_v3 = vsel %vm40_vm0, 4294967295, %v510_v2  ;;  %vm392_vm3 = vcmask 64516  }
   0x2   :  { %v402_v4 = vor.u32 %v493_v1, %v401_v0  ;;  %v539_v5 = vsel %vm41_vm1, %v42_v3, 0  ;;  %v491_v6 = vld [vmem:[%s694_s0 + $0x4] sm:$0xf]  ;;  %v403_v7 = vld [vmem:[%s694_s0 + $0x10] sm:$0x10]  ;;  %vm393_vm4 = vmor %vm392_vm3, %vm40_vm0 }
   0x3   :  { %v406_v8 = vor.u32 %v491_v6, %v403_v7  ;;  %v409_v9 = vld [vmem:[%s694_s0 + $0x8] sm:$0xf]  ;;  %v494_v10 = vld [vmem:[%s694_s0 + $0x14] sm:$0x10]  ;;  %v492_v11 = vld [vmem:[%s694_s0 + $0xc] sm:$0xf] }
   0x4   :  { %v45_v12 = vand.u32 %v402_v4, %v539_v5  ;;  %v410_v13 = vor.u32 %v494_v10, %v409_v9  ;;  %v411_v14 = vld [vmem:[%s694_s0 + $0x18] sm:$0x10]  ;;  %v563_v15 = vld [vmem:[%s695_s1] sm:$0xf]  ;;  %v433_v16 = vld [vmem:[%s694_s0 + $0x28] sm:$0xf] }
   0x5   :  { %v48_v17 = vand.u32 %v406_v8, %v539_v5  ;;  %v414_v18 = vor.u32 %v492_v11, %v411_v14  ;;  %v498_v19 = vld [vmem:[%s694_s0 + $0x34] sm:$0x10]  ;;  %v496_v20 = vld [vmem:[%s694_s0 + $0x2c] sm:$0xf]  ;;  %v435_v21 = vld [vmem:[%s694_s0 + $0x38] sm:$0x10] }
   0x6   :  { %63 = vmatpush.bf16.msra.mxu0 %v45_v12  ;;  %v51_v22 = vand.u32 %v410_v13, %v539_v5  ;;  %v434_v23 = vor.u32 %v498_v19, %v433_v16  ;;  %v438_v24 = vor.u32 %v496_v20, %v435_v21  ;;  %v425_v25 = vld [vmem:[%s694_s0 + $0x20] sm:$0xf]  ;;  %v497_v26 = vld [vmem:[%s694_s0 + $0x2c] sm:$0x10]  ;;  %v495_v27 = vld [vmem:[%s694_s0 + $0x24] sm:$0xf] }
   0x7   :  { %76 = vmatpush.bf16.msra.mxu1 %v48_v17  ;;  %v54_v28 = vand.u32 %v414_v18, %v539_v5  ;;  %v426_v29 = vor.u32 %v497_v26, %v425_v25  ;;  %v427_v30 = vld [vmem:[%s694_s0 + $0x30] sm:$0x10]  ;;  %v457_v31 = vld [vmem:[%s694_s0 + $0x48] sm:$0xf]  ;;  %v502_v32 = vld [vmem:[%s694_s0 + $0x54] sm:$0x10] }
   0x8   :  { %89 = vmatpush.bf16.msra.mxu2 %v51_v22  ;;  %v136_v33 = vand.u32 %v434_v23, %v539_v5  ;;  %v139_v34 = vand.u32 %v438_v24, %v539_v5  ;;  %v430_v35 = vor.u32 %v495_v27, %v427_v30  ;;  %v458_v36 = vor.u32 %v502_v32, %v457_v31  ;;  %v500_v37 = vld [vmem:[%s694_s0 + $0x4c] sm:$0xf]  ;;  %v459_v38 = vld [vmem:[%s694_s0 + $0x58] sm:$0x10]  ;;  %v449_v39 = vld [vmem:[%s694_s0 + $0x40] sm:$0xf] }
   0x9   :  { %102 = vmatpush.bf16.msra.mxu3 %v54_v28  ;;  %415 = vmatmul.msk.bf16.vlgmr.msra.gmra.mxu0 %vm36_vm2, %v563_v15  ;;  %v130_v40 = vand.u32 %v426_v29, %v539_v5  ;;  %v462_v41 = vor.u32 %v500_v37, %v459_v38  ;;  %v501_v42 = vld [vmem:[%s694_s0 + $0x4c] sm:$0x10]  ;;  %v499_v43 = vld [vmem:[%s694_s0 + $0x44] sm:$0xf]  ;;  %v451_v44 = vld [vmem:[%s694_s0 + $0x50] sm:$0x10] }
   0xa   :  { %416 = vmatmul.msk.bf16.vlgmr.msra.gmra.mxu1 %vm36_vm2, %v563_v15  ;;  %v133_v45 = vand.u32 %v430_v35, %v539_v5  ;;  %v225_v46 = vand.u32 %v458_v36, %v539_v5  ;;  %v450_v47 = vor.u32 %v501_v42, %v449_v39  ;;  %v454_v49 = vor.u32 %v499_v43, %v451_v44  ;;  %v473_v52 = vld [vmem:[%s694_s0 + $0x60] sm:$0xf]  ;;  %v505_v53 = vld [vmem:[%s694_s0 + $0x6c] sm:$0x10]  ;;  %v503_v54 = vld [vmem:[%s694_s0 + $0x64] sm:$0xf] }
   0xb   :  { %417 = vmatmul.msk.bf16.vlgmr.msra.gmra.mxu2 %vm36_vm2, %v563_v15  ;;  %v228_v48 = vand.u32 %v462_v41, %v539_v5  ;;  %148 = vmatpush.bf16.msrb.mxu0 %v130_v40  ;;  %v475_v55 = vld [vmem:[%s694_s0 + $0x70] sm:$0x10]  ;;  %v481_v56 = vld [vmem:[%s694_s0 + $0x68] sm:$0xf]  ;;  %v506_v57 = vld [vmem:[%s694_s0 + $0x74] sm:$0x10]  ;;  %v474_v60 = vor.u32 %v505_v53, %v473_v52 }
   0xc   :  { %174 = vmatpush.bf16.msrb.mxu2 %v136_v33  ;;  %418 = vmatmul.msk.bf16.vlgmr.msra.gmra.mxu3 %vm36_vm2, %v563_v15  ;;  %v219_v50 = vand.u32 %v450_v47, %v539_v5  ;;  %v222_v51 = vand.u32 %v454_v49, %v539_v5  ;;  %v504_v58 = vld [vmem:[%s694_s0 + $0x6c] sm:$0xf]  ;;  %v483_v59 = vld [vmem:[%s694_s0 + $0x78] sm:$0x10]  ;;  %v478_v61 = vor.u32 %v503_v54, %v475_v55  ;;  %v375_v4 = vld [vmem:[%s696_s2] sm:$0xff]  ;;  %v511_v6 = vmov 0  }
   0xd   :  { %187 = vmatpush.bf16.msrb.mxu3 %v139_v34  ;;  %161 = vmatpush.bf16.msrb.mxu1 %v133_v45  ;;  %v482_v62 = vor.u32 %v506_v57, %v481_v56  ;;  %v486_v63 = vor.u32 %v504_v58, %v483_v59  ;;  %v308_v0 = vand.u32 %v474_v60, %v539_v5 }
   0xe   :  { %v311_v1 = vand.u32 %v478_v61, %v539_v5  ;;  %509 = vset.pattern.permute.xlu0 %v511_v6 }
   0xf   :  { %237 = vmatpush.bf16.msra.mxu0 %v219_v50  ;;  %v314_v2 = vand.u32 %v482_v62, %v539_v5  ;;  %v317_v3 = vand.u32 %v486_v63, %v539_v5  ;;  %378 = vperm.xlu0 %509, %v375_v4  }
  0x10   :  { %263 = vmatpush.bf16.msra.mxu2 %v225_v46 }
  0x11   :  { %276 = vmatpush.bf16.msra.mxu3 %v228_v48  ;;  %250 = vmatpush.bf16.msra.mxu1 %v222_v51 }
  0x19   :  { %439 = vmatmul.msk.bf16.vlgmr.msrb.gmra.mxu0 %vm36_vm2, %v563_v15 }
  0x1a   :  { %440 = vmatmul.msk.bf16.vlgmr.msrb.gmra.mxu1 %vm36_vm2, %v563_v15  ;;  %326 = vmatpush.bf16.msrb.mxu0 %v308_v0 }
  0x1b   :  { %441 = vmatmul.msk.bf16.vlgmr.msrb.gmra.mxu2 %vm36_vm2, %v563_v15  ;;  %339 = vmatpush.bf16.msrb.mxu1 %v311_v1 }
  0x1c   :  { %442 = vmatmul.msk.bf16.vlgmr.msrb.gmra.mxu3 %vm36_vm2, %v563_v15  ;;  %352 = vmatpush.bf16.msrb.mxu2 %v314_v2 }
  0x1d   :  { %365 = vmatpush.bf16.msrb.mxu3 %v317_v3 }
  0x29   :  { %463 = vmatmul.msk.bf16.vlgmr.msra.gmra.mxu0 %vm36_vm2, %v563_v15 }
  0x2a   :  { %464 = vmatmul.msk.bf16.vlgmr.msra.gmra.mxu1 %vm36_vm2, %v563_v15 }
  0x2b   :  { %465 = vmatmul.msk.bf16.vlgmr.msra.gmra.mxu2 %vm36_vm2, %v563_v15 }
  0x2c   :  { %466 = vmatmul.msk.bf16.vlgmr.msra.gmra.mxu3 %vm36_vm2, %v563_v15 }
  0x39   :  { %487 = vmatmul.msk.bf16.vlgmr.msrb.gmra.mxu0 %vm36_vm2, %v563_v15 }
  0x3a   :  { %488 = vmatmul.msk.bf16.vlgmr.msrb.gmra.mxu1 %vm36_vm2, %v563_v15 }
  0x3b   :  { %489 = vmatmul.msk.bf16.vlgmr.msrb.gmra.mxu2 %vm36_vm2, %v563_v15 }
  0x3c   :  { %490 = vmatmul.msk.bf16.vlgmr.msrb.gmra.mxu3 %vm36_vm2, %v563_v15 }
  0x81   :  { %v379_v31 = vpop.permute.xlu0 %378 }
  0x86   :  { %v65_v5 = vpop.f32.mrf.mxu0 }
  0x87   :  { %v78_v7 = vpop.f32.mrf.mxu1 }
  0x8e   :  { %v91_v8 = vpop.f32.mrf.mxu2  ;;  %v67_v9 = vpop.f32.mrf.mxu0 }
  0x8f   :  { %v104_v10 = vpop.f32.mrf.mxu3  ;;  %v80_v11 = vpop.f32.mrf.mxu1 }
  0x96   :  { %v93_v12 = vpop.f32.mrf.mxu2  ;;  %v150_v13 = vpop.f32.mrf.mxu0 }
  0x97   :  { %v106_v14 = vpop.f32.mrf.mxu3  ;;  %v163_v16 = vpop.f32.mrf.mxu1  ;;  %v193_v28 = vmax.f32 %v65_v5, %v150_v13 }
  0x98   :  { %v194_v29 = vmax.f32 %v78_v7, %v163_v16 }
  0x9e   :  { %v176_v17 = vpop.f32.mrf.mxu2  ;;  %v152_v18 = vpop.f32.mrf.mxu0 }
  0x9f   :  { %v189_v19 = vpop.f32.mrf.mxu3  ;;  %v165_v20 = vpop.f32.mrf.mxu1  ;;  %v195_v41 = vmax.f32 %v91_v8, %v176_v17 }
  0xa0   :  { %v196_v43 = vmax.f32 %v104_v10, %v189_v19 }
  0xa6   :  { %v178_v21 = vpop.f32.mrf.mxu2  ;;  %v239_v22 = vpop.f32.mrf.mxu0 }
  0xa7   :  { %v191_v23 = vpop.f32.mrf.mxu3  ;;  %v252_v24 = vpop.f32.mrf.mxu1  ;;  %v282_v30 = vmax.f32 %v193_v28, %v239_v22 }
  0xa8   :  { %v283_v32 = vmax.f32 %v194_v29, %v252_v24 }
  0xae   :  { %v265_v25 = vpop.f32.mrf.mxu2  ;;  %v241_v15 = vpop.f32.mrf.mxu0 }
  0xaf   :  { %v278_v26 = vpop.f32.mrf.mxu3  ;;  %v254_v27 = vpop.f32.mrf.mxu1  ;;  %v284_v45 = vmax.f32 %v195_v41, %v265_v25 }
  0xb0   :  { %v285_v46 = vmax.f32 %v196_v43, %v278_v26 }
  0xb6   :  { %v267_v33 = vpop.f32.mrf.mxu2  ;;  %v328_v34 = vpop.f32.mrf.mxu0 }
  0xb7   :  { %v280_v35 = vpop.f32.mrf.mxu3  ;;  %v371_v36 = vmax.f32 %v282_v30, %v328_v34  ;;  %v341_v37 = vpop.f32.mrf.mxu1 }
  0xb8   :  { %v372_v38 = vmax.f32 %v283_v32, %v341_v37 }
  0xb9   :  { %v381_v39 = vadd.f32 %v379_v31, %v371_v36 }
  0xba   :  { %v382_v40 = vadd.f32 %v379_v31, %v372_v38 }
  0xbb   :  { %v385_v42 = vmax.f32 %v381_v39, 0.0 }
  0xbc   :  { %v386_v44 = vmax.f32 %v382_v40, 0.0 }
  0xbe   :  { %v389_v47 = vpack.c.bf16 %v386_v44, %v385_v42  ;;  %v354_v48 = vpop.f32.mrf.mxu2  ;;  %v330_v49 = vpop.f32.mrf.mxu0 }
  0xbf   :  { %v373_v50 = vmax.f32 %v284_v45, %v354_v48  ;;  %v367_v51 = vpop.f32.mrf.mxu3  ;;  %v343_v52 = vpop.f32.mrf.mxu1 }
  0xc0   :  { %391 = vst [vmem:[%s697_s3] sm:$0xff] %v389_v47  ;;  %v374_v53 = vmax.f32 %v285_v46, %v367_v51 }
  0xc1   :  { %v383_v54 = vadd.f32 %v379_v31, %v373_v50 }
  0xc2   :  { %v384_v55 = vadd.f32 %v379_v31, %v374_v53 }
  0xc3   :  { %v387_v56 = vmax.f32 %v383_v54, 0.0 }
  0xc4   :  { %v388_v57 = vmax.f32 %v384_v55, 0.0 }
  0xc6   :  { %v390_v58 = vpack.c.bf16 %v388_v57, %v387_v56  ;;  %v356_v59 = vpop.f32.mrf.mxu2 }
  0xc7   :  { %v369_v60 = vpop.f32.mrf.mxu3 }
  0xc8   :  { %394 = vst.msk [vmem:[%s697_s3 + $0x8] sm:$0xff] %vm393_vm4, %v390_v58 }

// kernel: cnn_forward.4
= control target key start
LH: loop header
LB: loop body
LE: loop exit
PB: predicated region body
PF: predicated region fallthrough
CT: control target
= control target key end

     0   :  { %vm144_vm0 = vcmask 1043456   ;;  %vm137_vm1 = vcmask 588800   ;;  %vm660_vm2 = vcmask 797696   ;;  %s1268_s0 = inlined_call_operand.vmem [shape: bf16[1,4,200,98], index: 0, kind: input, shape index: {}]   ;;  %s1269_s1 = inlined_call_operand.vmem [shape: bf16[32,200], index: 1, kind: input, shape index: {}]   ;;  %s1270_s2 = inlined_call_operand.vmem [shape: f32[32,1], index: 2, kind: input, shape index: {}]   ;;  %s1271_s3 = inlined_call_operand.vmem [shape: bf16[1,32,98], index: 3, kind: output, shape index: {}]  }
   0x1   :  { %v971_v0 = vld [vmem:[%s1268_s0 + $0x38] sm:$0xff]  ;;  %v759_v2 = vld [vmem:[%s1268_s0 + $0xc4] sm:$0xf]  ;;  %v970_v4 = vld [vmem:[%s1268_s0 + $0x30] sm:$0xff] }
   0x2   :  { %v983_v1 = vld [vmem:[%s1268_s0 + $0x9c] sm:$0xff]  ;;  %v261_v3 = vunpack.c.l.b16 %v759_v2  ;;  %148 = vmatpush.bf16.msra.mxu0 %v971_v0  ;;  %v982_v7 = vld [vmem:[%s1268_s0 + $0x94] sm:$0xff]  ;;  %v969_v12 = vld [vmem:[%s1268_s0 + $0x28] sm:$0xff] }
   0x3   :  { %290 = vmatpush.bf16.msra.mxu2 %v983_v1  ;;  %v43_v5 = vld [vmem:[%s1268_s0 + $0x60] sm:$0xf]  ;;  %v981_v14 = vld [vmem:[%s1268_s0 + $0x8c] sm:$0xff]  ;;  %v975_v15 = vld [vmem:[%s1268_s0 + $0x58] sm:$0xff] }
   0x4   :  { %v274_v6 = vpack.c.b16 %v261_v3, %v261_v3  ;;  %v111_v8 = vunpack.c.l.b16 %v43_v5  ;;  %v987_v11 = vld [vmem:[%s1268_s0 + $0xbc] sm:$0xff]  ;;  %v834_v16 = vld [vmem:[%s1268_s0 + $0x128] sm:$0xf]  ;;  %v986_v17 = vld [vmem:[%s1268_s0 + $0xb4] sm:$0xff] }
   0x5   :  { %v968_v18 = vld [vmem:[%s1268_s0 + $0x20] sm:$0xff]  ;;  %v974_v20 = vld [vmem:[%s1268_s0 + $0x50] sm:$0xff]  ;;  %v407_v21 = vunpack.c.l.b16 %v834_v16  ;;  %v967_v23 = vld [vmem:[%s1268_s0 + $0x18] sm:$0xff] }
   0x6   :  { %v288_v9 = vsel %vm144_vm0, %v274_v6, 0  ;;  %v124_v10 = vpack.c.b16 %v111_v8, %v111_v8  ;;  %149 = vmatpush.bf16.msra.mxu0 %v970_v4  ;;  %v980_v19 = vld [vmem:[%s1268_s0 + $0x84] sm:$0xff]  ;;  %v985_v22 = vld [vmem:[%s1268_s0 + $0xac] sm:$0xff]  ;;  %v979_v24 = vld [vmem:[%s1268_s0 + $0x7c] sm:$0xff] }
   0x7   :  { %312 = vmatpush.bf16.msra.mxu3 %v288_v9  ;;  %291 = vmatpush.bf16.msra.mxu2 %v982_v7  ;;  %v973_v25 = vld [vmem:[%s1268_s0 + $0x48] sm:$0xff]  ;;  %v420_v26 = vpack.c.b16 %v407_v21, %v407_v21  ;;  %v966_v28 = vld [vmem:[%s1268_s0 + $0x10] sm:$0xff]  ;;  %v960_v29 = vld [vmem:[%s1269_s1 + $0x4] sm:$0xf] }
   0x8   :  { %v146_v13 = vsel %vm144_vm0, %v124_v10, 0  ;;  %v984_v27 = vld [vmem:[%s1268_s0 + $0xa4] sm:$0xff]  ;;  %v673_v30 = vld [vmem:[%s1269_s1 + $0x8] sm:$0xf0]  ;;  %v978_v32 = vld [vmem:[%s1268_s0 + $0x74] sm:$0xff] }
   0x9   :  { %170 = vmatpush.bf16.msra.mxu1 %v146_v13  ;;  %v909_v31 = vld [vmem:[%s1268_s0 + $0x18c] sm:$0xf]  ;;  %v972_v33 = vld [vmem:[%s1268_s0 + $0x40] sm:$0xff]  ;;  %v434_v34 = vsel %vm144_vm0, %v420_v26, 0  ;;  %v1117_v35 = vor.u32 %v960_v29, %v673_v30  ;;  %v994_v42 = vld [vmem:[%s1268_s0 + $0xf8] sm:$0xff]  ;;  %v1015_v13 = vmov 0  }
   0xa   :  { %150 = vmatpush.bf16.msra.mxu0 %v969_v12  ;;  %v995_v36 = vld [vmem:[%s1268_s0 + $0x100] sm:$0xff]  ;;  %v553_v37 = vunpack.c.l.b16 %v909_v31  ;;  %v965_v38 = vld [vmem:[%s1268_s0 + $0x8] sm:$0xff]  ;;  %v998_v48 = vld [vmem:[%s1268_s0 + $0x118] sm:$0xff]  ;;  %1013 = vset.pattern.permute.xlu0 %v1015_v13 }
   0xb   :  { %313 = vmatpush.bf16.msra.mxu3 %v987_v11  ;;  %292 = vmatpush.bf16.msra.mxu2 %v981_v14  ;;  %v977_v39 = vld [vmem:[%s1268_s0 + $0x6c] sm:$0xff]  ;;  %v999_v40 = vld [vmem:[%s1268_s0 + $0x120] sm:$0xff]  ;;  %v961_v45 = vld [vmem:[%s1269_s1 + $0x4] sm:$0xf0] }
   0xc   :  { %v566_v41 = vpack.c.b16 %v553_v37, %v553_v37  ;;  %v964_v43 = vld [vmem:[%s1268_s0] sm:$0xff]  ;;  %v993_v51 = vld [vmem:[%s1268_s0 + $0xf0] sm:$0xff]  ;;  %v992_v55 = vld [vmem:[%s1268_s0 + $0xe8] sm:$0xff]  ;;  %1014 = vset.pattern.permute.xlu1 %v1015_v13 }
   0xd   :  { %171 = vmatpush.bf16.msra.mxu1 %v975_v15  ;;  %v671_v44 = vld [vmem:[%s1269_s1] sm:$0xf]  ;;  %v976_v46 = vld [vmem:[%s1268_s0 + $0x64] sm:$0xff]  ;;  %v997_v54 = vld [vmem:[%s1268_s0 + $0x110] sm:$0xff] }
   0xe   :  { %151 = vmatpush.bf16.msra.mxu0 %v968_v18  ;;  %v1007_v47 = vld [vmem:[%s1268_s0 + $0x164] sm:$0xff]  ;;  %v1156_v49 = vor.u32 %v961_v45, %v671_v44  ;;  %v580_v50 = vsel %vm144_vm0, %v566_v41, 0  ;;  %v1006_v52 = vld [vmem:[%s1268_s0 + $0x15c] sm:$0xff]  ;;  %v962_v56 = vld [vmem:[%s1269_s1 + $0x14] sm:$0xf] }
   0xf   :  { %314 = vmatpush.bf16.msra.mxu3 %v986_v17  ;;  %293 = vmatpush.bf16.msra.mxu2 %v980_v19  ;;  %v1011_v53 = vld [vmem:[%s1268_s0 + $0x184] sm:$0xff]  ;;  %v681_v57 = vld [vmem:[%s1269_s1 + $0x18] sm:$0xf0]  ;;  %v1005_v58 = vld [vmem:[%s1268_s0 + $0x154] sm:$0xff] }
  0x10   :  { %v1010_v59 = vld [vmem:[%s1268_s0 + $0x17c] sm:$0xff]  ;;  %v996_v60 = vld [vmem:[%s1268_s0 + $0x108] sm:$0xff]  ;;  %v684_v61 = vor.u32 %v962_v56, %v681_v57  ;;  %v1009_v0 = vld [vmem:[%s1268_s0 + $0x174] sm:$0xff] }
  0x11   :  { %172 = vmatpush.bf16.msra.mxu1 %v974_v20  ;;  %v991_v62 = vld [vmem:[%s1268_s0 + $0xe0] sm:$0xff]  ;;  %v1004_v63 = vld [vmem:[%s1268_s0 + $0x14c] sm:$0xff]  ;;  %v990_v1 = vld [vmem:[%s1268_s0 + $0xd8] sm:$0xff] }
  0x12   :  { %152 = vmatpush.bf16.msra.mxu0 %v967_v23  ;;  %v679_v2 = vld [vmem:[%s1269_s1 + $0x10] sm:$0xf]  ;;  %v963_v3 = vld [vmem:[%s1269_s1 + $0x14] sm:$0xf0]  ;;  %v1003_v4 = vld [vmem:[%s1268_s0 + $0x144] sm:$0xff] }
  0x13   :  { %315 = vmatpush.bf16.msra.mxu3 %v985_v22  ;;  %294 = vmatpush.bf16.msra.mxu2 %v979_v24  ;;  %v1008_v5 = vld [vmem:[%s1268_s0 + $0x16c] sm:$0xff]  ;;  %v680_v6 = vor.u32 %v963_v3, %v679_v2  ;;  %v1002_v8 = vld [vmem:[%s1268_s0 + $0x13c] sm:$0xff]  ;;  %v1001_v12 = vld [vmem:[%s1268_s0 + $0x134] sm:$0xff] }
  0x14   :  { %v989_v7 = vld [vmem:[%s1268_s0 + $0xd0] sm:$0xff]  ;;  %v988_v9 = vld [vmem:[%s1268_s0 + $0xc8] sm:$0xff]  ;;  %v624_v10 = vld [vmem:[%s1270_s2] sm:$0xff] }
  0x15   :  { %173 = vmatpush.bf16.msra.mxu1 %v973_v25  ;;  %v626_v11 = vld [vmem:[%s1270_s2 + $0x10] sm:$0xff]  ;;  %630 = vperm.xlu0 %1013, %v624_v10   ;;  %v625_v15 = vld [vmem:[%s1270_s2 + $0x8] sm:$0xff]  ;;  %v627_v16 = vld [vmem:[%s1270_s2 + $0x18] sm:$0xff] }
  0x16   :  { %153 = vmatpush.bf16.msra.mxu0 %v966_v28  ;;  %640 = vperm.xlu1 %1014, %v626_v11   ;;  %v1000_v14 = vld [vmem:[%s1268_s0 + $0x12c] sm:$0xff] }
  0x17   :  { %316 = vmatpush.bf16.msra.mxu3 %v984_v27  ;;  %295 = vmatpush.bf16.msra.mxu2 %v978_v32 }
  0x19   :  { %174 = vmatpush.bf16.msra.mxu1 %v972_v33 }
  0x1a   :  { %808 = vmatmul.msk.bf16.vlgmr.msra.gmra.mxu3 %vm137_vm1, %v1117_v35  ;;  %154 = vmatpush.bf16.msra.mxu0 %v965_v38 }
  0x1b   :  { %458 = vmatpush.bf16.msrb.mxu3 %v434_v34  ;;  %296 = vmatpush.bf16.msra.mxu2 %v977_v39 }
  0x1c   :  { %733 = vmatmul.msk.bf16.vlgmr.msra.gmra.mxu1 %vm137_vm1, %v1117_v35 }
  0x1d   :  { %436 = vmatpush.bf16.msrb.mxu1 %v995_v36  ;;  %635 = vperm.xlu0 %1013, %v625_v15  }
  0x1e   :  { %155 = vmatpush.bf16.msra.mxu0 %v964_v43  ;;  %645 = vperm.xlu1 %1014, %v627_v16  }
  0x1f   :  { %459 = vmatpush.bf16.msrb.mxu3 %v999_v40  ;;  %297 = vmatpush.bf16.msra.mxu2 %v976_v46 }
  0x21   :  { %437 = vmatpush.bf16.msrb.mxu1 %v994_v42  ;;  %156 = vmatmul.bf16.vlgmr.msra.gmra.mxu0 %v1156_v49 }
  0x22   :  { %582 = vmatpush.bf16.msrb.mxu0 %v1007_v47  ;;  %298 = vmatmul.bf16.vlgmr.msra.gmra.mxu2 %v1156_v49 }
  0x23   :  { %604 = vmatpush.bf16.msrb.mxu2 %v580_v50  ;;  %460 = vmatpush.bf16.msrb.mxu3 %v998_v48 }
  0x25   :  { %438 = vmatpush.bf16.msrb.mxu1 %v993_v51 }
  0x26   :  { %583 = vmatpush.bf16.msrb.mxu0 %v1006_v52 }
  0x27   :  { %605 = vmatpush.bf16.msrb.mxu2 %v1011_v53  ;;  %461 = vmatpush.bf16.msrb.mxu3 %v997_v54 }
  0x29   :  { %439 = vmatpush.bf16.msrb.mxu1 %v992_v55 }
  0x2a   :  { %584 = vmatpush.bf16.msrb.mxu0 %v1005_v58  ;;  %809 = vmatmul.msk.bf16.gmra.mxu3 %vm137_vm1, %v684_v61 }
  0x2b   :  { %606 = vmatpush.bf16.msrb.mxu2 %v1010_v59  ;;  %462 = vmatpush.bf16.msrb.mxu3 %v996_v60 }
  0x2c   :  { %734 = vmatmul.msk.bf16.gmra.mxu1 %vm137_vm1, %v684_v61 }
  0x2d   :  { %440 = vmatpush.bf16.msrb.mxu1 %v991_v62 }
  0x2e   :  { %585 = vmatpush.bf16.msrb.mxu0 %v1004_v63 }
  0x2f   :  { %607 = vmatpush.bf16.msrb.mxu2 %v1009_v0 }
  0x31   :  { %441 = vmatpush.bf16.msrb.mxu1 %v990_v1  ;;  %161 = vmatmul.bf16.gmra.mxu0 %v680_v6 }
  0x32   :  { %586 = vmatpush.bf16.msrb.mxu0 %v1003_v4  ;;  %303 = vmatmul.bf16.gmra.mxu2 %v680_v6 }
  0x33   :  { %608 = vmatpush.bf16.msrb.mxu2 %v1008_v5 }
  0x35   :  { %442 = vmatpush.bf16.msrb.mxu1 %v989_v7 }
  0x36   :  { %587 = vmatpush.bf16.msrb.mxu0 %v1002_v8 }
  0x39   :  { %443 = vmatpush.bf16.msrb.mxu1 %v988_v9 }
  0x3a   :  { %588 = vmatpush.bf16.msrb.mxu0 %v1001_v12  ;;  %883 = vmatmul.msk.bf16.vlgmr.msrb.gmra.mxu3 %vm137_vm1, %v1117_v35 }
  0x3c   :  { %444 = vmatmul.bf16.vlgmr.msrb.gmra.mxu1 %v1156_v49 }
  0x3e   :  { %589 = vmatpush.bf16.msrb.mxu0 %v1000_v14 }
  0x41   :  { %590 = vmatmul.bf16.vlgmr.msrb.gmra.mxu0 %v1156_v49 }
  0x42   :  { %958 = vmatmul.msk.bf16.vlgmr.msrb.gmra.mxu2 %vm137_vm1, %v1117_v35 }
  0x4a   :  { %884 = vmatmul.msk.bf16.gmra.mxu3 %vm137_vm1, %v684_v61 }
  0x4c   :  { %449 = vmatmul.bf16.gmra.mxu1 %v680_v6 }
  0x51   :  { %595 = vmatmul.bf16.gmra.mxu0 %v680_v6 }
  0x52   :  { %959 = vmatmul.msk.bf16.gmra.mxu2 %vm137_vm1, %v684_v61 }
  0x87   :  { %v631_v41 = vpop.permute.xlu0 %630 }
  0x88   :  { %v641_v9 = vpop.permute.xlu1 %640 }
  0x8f   :  { %v636_v60 = vpop.permute.xlu0 %635 }
  0x99   :  { %v176_v17 = vpop.f32.mrf.mxu1 }
  0x9d   :  { %v318_v18 = vpop.f32.mrf.mxu3 }
  0x9e   :  { %v157_v19 = vpop.f32.mrf.mxu0 }
  0x9f   :  { %v177_v37 = vadd.f32 %v176_v17, %v157_v19 }
  0xa1   :  { %v178_v20 = vpop.f32.mrf.mxu1 }
  0xa5   :  { %v320_v21 = vpop.f32.mrf.mxu3  ;;  %v299_v22 = vpop.f32.mrf.mxu2 }
  0xa6   :  { %v159_v23 = vpop.f32.mrf.mxu0  ;;  %v319_v36 = vadd.f32 %v318_v18, %v299_v22 }
  0xa7   :  { %v179_v49 = vadd.f32 %v178_v20, %v159_v23 }
  0xa8   :  { %v328_v39 = vmax.f32 %v177_v37, %v319_v36 }
  0xa9   :  { %v181_v24 = vpop.f32.mrf.mxu1 }
  0xad   :  { %v323_v25 = vpop.f32.mrf.mxu3  ;;  %v301_v26 = vpop.f32.mrf.mxu2 }
  0xae   :  { %v162_v27 = vpop.f32.mrf.mxu0  ;;  %v321_v46 = vadd.f32 %v320_v21, %v301_v26 }
  0xaf   :  { %v182_v63 = vadd.f32 %v181_v24, %v162_v27 }
  0xb0   :  { %v329_v52 = vmax.f32 %v179_v49, %v321_v46 }
  0xb1   :  { %v183_v28 = vpop.f32.mrf.mxu1 }
  0xb5   :  { %v325_v29 = vpop.f32.mrf.mxu3  ;;  %v304_v30 = vpop.f32.mrf.mxu2 }
  0xb6   :  { %v164_v31 = vpop.f32.mrf.mxu0  ;;  %v324_v61 = vadd.f32 %v323_v25, %v304_v30  ;;  %v646_v25 = vpop.permute.xlu1 %645 }
  0xb7   :  { %v184_v14 = vadd.f32 %v183_v28, %v164_v31 }
  0xb8   :  { %v330_v3 = vmax.f32 %v182_v63, %v324_v61 }
  0xb9   :  { %v445_v32 = vpop.f32.mrf.mxu1 }
  0xbd   :  { %v464_v33 = vpop.f32.mrf.mxu3  ;;  %v306_v34 = vpop.f32.mrf.mxu2 }
  0xbe   :  { %v591_v35 = vpop.f32.mrf.mxu0  ;;  %v465_v38 = vadd.f32 %v464_v33, %v445_v32  ;;  %v326_v11 = vadd.f32 %v325_v29, %v306_v34 }
  0xc0   :  { %v474_v44 = vmax.f32 %v328_v39, %v465_v38  ;;  %v331_v17 = vmax.f32 %v184_v14, %v326_v11 }
  0xc1   :  { %v447_v42 = vpop.f32.mrf.mxu1 }
  0xc5   :  { %v466_v40 = vpop.f32.mrf.mxu3  ;;  %v610_v43 = vpop.f32.mrf.mxu2 }
  0xc6   :  { %v611_v45 = vadd.f32 %v610_v43, %v591_v35  ;;  %v593_v48 = vpop.f32.mrf.mxu0  ;;  %v467_v50 = vadd.f32 %v466_v40, %v447_v42 }
  0xc8   :  { %v620_v47 = vmax.f32 %v474_v44, %v611_v45  ;;  %v475_v56 = vmax.f32 %v329_v52, %v467_v50 }
  0xc9   :  { %v450_v59 = vpop.f32.mrf.mxu1 }
  0xca   :  { %v648_v51 = vadd.f32 %v631_v41, %v620_v47 }
  0xcc   :  { %v652_v53 = vmax.f32 %v648_v51, 0.0 }
  0xcd   :  { %v469_v54 = vpop.f32.mrf.mxu3  ;;  %v612_v55 = vpop.f32.mrf.mxu2 }
  0xce   :  { %v656_v57 = vpack.c.bf16 %v652_v53, %v652_v53  ;;  %v613_v58 = vadd.f32 %v612_v55, %v593_v48  ;;  %v470_v0 = vadd.f32 %v469_v54, %v450_v59  ;;  %v596_v2 = vpop.f32.mrf.mxu0 }
  0xd0   :  { %661 = vst.msk [vmem:[%s1271_s3] sm:$0xf] %vm660_vm2, %v656_v57  ;;  %v621_v62 = vmax.f32 %v475_v56, %v613_v58  ;;  %v476_v6 = vmax.f32 %v330_v3, %v470_v0 }
  0xd1   :  { %v452_v13 = vpop.f32.mrf.mxu1 }
  0xd2   :  { %v649_v1 = vadd.f32 %v636_v60, %v621_v62 }
  0xd4   :  { %v653_v4 = vmax.f32 %v649_v1, 0.0 }
  0xd5   :  { %v615_v5 = vpop.f32.mrf.mxu2  ;;  %v471_v10 = vpop.f32.mrf.mxu3 }
  0xd6   :  { %v657_v7 = vpack.c.bf16 %v653_v4, %v653_v4  ;;  %v616_v8 = vadd.f32 %v615_v5, %v596_v2  ;;  %v472_v15 = vadd.f32 %v471_v10, %v452_v13  ;;  %v598_v19 = vpop.f32.mrf.mxu0 }
  0xd8   :  { %662 = vst.msk [vmem:[%s1271_s3 + $0x4] sm:$0xf] %vm660_vm2, %v657_v7  ;;  %v622_v12 = vmax.f32 %v476_v6, %v616_v8  ;;  %v477_v21 = vmax.f32 %v331_v17, %v472_v15 }
  0xda   :  { %v650_v16 = vadd.f32 %v641_v9, %v622_v12 }
  0xdc   :  { %v654_v18 = vmax.f32 %v650_v16, 0.0 }
  0xdd   :  { %v617_v20 = vpop.f32.mrf.mxu2 }
  0xde   :  { %v658_v22 = vpack.c.bf16 %v654_v18, %v654_v18  ;;  %v618_v23 = vadd.f32 %v617_v20, %v598_v19 }
  0xe0   :  { %663 = vst.msk [vmem:[%s1271_s3 + $0x8] sm:$0xf] %vm660_vm2, %v658_v22  ;;  %v623_v24 = vmax.f32 %v477_v21, %v618_v23 }
  0xe2   :  { %v651_v26 = vadd.f32 %v646_v25, %v623_v24 }
  0xe4   :  { %v655_v27 = vmax.f32 %v651_v26, 0.0 }
  0xe6   :  { %v659_v29 = vpack.c.bf16 %v655_v27, %v655_v27 }
  0xe8   :  { %664 = vst.msk [vmem:[%s1271_s3 + $0xc] sm:$0xf] %vm660_vm2, %v659_v29 }

// kernel: cnn_forward.5
= control target key start
LH: loop header
LB: loop body
LE: loop exit
PB: predicated region body
PF: predicated region fallthrough
CT: control target
= control target key end

     0   :  { %s10404_s0 = inlined_call_operand.vmem [shape: bf16[2,1568], index: 0, kind: input, shape index: {}]   ;;  %s10405_s1 = inlined_call_operand.vmem [shape: bf16[1568,600], index: 1, kind: input, shape index: {}]   ;;  %s10406_s2 = inlined_call_operand.vmem [shape: f32[1,600], index: 2, kind: input, shape index: {}]   ;;  %s10407_s3 = inlined_call_operand.vmem [shape: bf16[600,10], index: 3, kind: input, shape index: {}]   ;;  %s10408_s4 = inlined_call_operand.vmem [shape: f32[1,10], index: 4, kind: input, shape index: {}]   ;;  %s10409_s5 = inlined_call_operand.hbm [shape: f32[2,10], index: 5, kind: output, shape index: {}]  }
   0x1   :  { %v4591_v0 = vld [vmem:[%s10405_s1 + $0x118] sm:$0xf]  ;;  %v6600_v1 = vld [vmem:[%s10405_s1 + $0x128] sm:$0xf0]  ;;  %v4571_v11 = vld [vmem:[%s10405_s1 + $0xf0] sm:$0xf] }
   0x2   :  { %v4751_v2 = vld [vmem:[%s10405_s1 + $0x258] sm:$0xf]  ;;  %v4592_v3 = vor.u32 %v6600_v1, %v4591_v0  ;;  %v6640_v4 = vld [vmem:[%s10405_s1 + $0x268] sm:$0xf0]  ;;  %v6595_v13 = vld [vmem:[%s10405_s1 + $0x100] sm:$0xf0] }
   0x3   :  { %v4911_v5 = vld [vmem:[%s10405_s1 + $0x398] sm:$0xf]  ;;  %v6680_v6 = vld [vmem:[%s10405_s1 + $0x3a8] sm:$0xf0]  ;;  %v4752_v7 = vor.u32 %v6640_v4, %v4751_v2  ;;  %v4731_v14 = vld [vmem:[%s10405_s1 + $0x230] sm:$0xf]  ;;  %v4572_v16 = vor.u32 %v6595_v13, %v4571_v11 }
   0x4   :  { %v4912_v8 = vor.u32 %v6680_v6, %v4911_v5  ;;  %v5071_v9 = vld [vmem:[%s10405_s1 + $0x4d8] sm:$0xf]  ;;  %v6720_v10 = vld [vmem:[%s10405_s1 + $0x4e8] sm:$0xf0]  ;;  %3204 = vmatpush.bf16.msra.mxu0 %v4592_v3  ;;  %v6635_v15 = vld [vmem:[%s10405_s1 + $0x240] sm:$0xf0] }
   0x5   :  { %v5072_v12 = vor.u32 %v6720_v10, %v5071_v9  ;;  %3217 = vmatpush.bf16.msra.mxu1 %v4752_v7  ;;  %v4732_v17 = vor.u32 %v6635_v15, %v4731_v14  ;;  %v4891_v18 = vld [vmem:[%s10405_s1 + $0x370] sm:$0xf]  ;;  %v6675_v19 = vld [vmem:[%s10405_s1 + $0x380] sm:$0xf0]  ;;  %v4551_v23 = vld [vmem:[%s10405_s1 + $0xc8] sm:$0xf] }
   0x6   :  { %3230 = vmatpush.bf16.msra.mxu2 %v4912_v8  ;;  %v5051_v20 = vld [vmem:[%s10405_s1 + $0x4b0] sm:$0xf]  ;;  %v4892_v21 = vor.u32 %v6675_v19, %v4891_v18  ;;  %v6715_v22 = vld [vmem:[%s10405_s1 + $0x4c0] sm:$0xf0]  ;;  %v6590_v24 = vld [vmem:[%s10405_s1 + $0xd8] sm:$0xf0] }
   0x7   :  { %3243 = vmatpush.bf16.msra.mxu3 %v5072_v12  ;;  %v5052_v25 = vor.u32 %v6715_v22, %v5051_v20  ;;  %v4711_v26 = vld [vmem:[%s10405_s1 + $0x208] sm:$0xf]  ;;  %v6630_v27 = vld [vmem:[%s10405_s1 + $0x218] sm:$0xf0]  ;;  %v4552_v29 = vor.u32 %v6590_v24, %v4551_v23  ;;  %v4531_v35 = vld [vmem:[%s10405_s1 + $0xa0] sm:$0xf] }
   0x8   :  { %v4871_v28 = vld [vmem:[%s10405_s1 + $0x348] sm:$0xf]  ;;  %3205 = vmatpush.bf16.msra.mxu0 %v4572_v16  ;;  %v6670_v30 = vld [vmem:[%s10405_s1 + $0x358] sm:$0xf0]  ;;  %v4712_v33 = vor.u32 %v6630_v27, %v4711_v26  ;;  %v6585_v36 = vld [vmem:[%s10405_s1 + $0xb0] sm:$0xf0] }
   0x9   :  { %v5031_v31 = vld [vmem:[%s10405_s1 + $0x488] sm:$0xf]  ;;  %v6710_v32 = vld [vmem:[%s10405_s1 + $0x498] sm:$0xf0]  ;;  %3218 = vmatpush.bf16.msra.mxu1 %v4732_v17  ;;  %v4872_v34 = vor.u32 %v6670_v30, %v4871_v28  ;;  %v4691_v37 = vld [vmem:[%s10405_s1 + $0x1e0] sm:$0xf]  ;;  %v4532_v44 = vor.u32 %v6585_v36, %v4531_v35 }
   0xa   :  { %3231 = vmatpush.bf16.msra.mxu2 %v4892_v21  ;;  %v5032_v38 = vor.u32 %v6710_v32, %v5031_v31  ;;  %v6625_v39 = vld [vmem:[%s10405_s1 + $0x1f0] sm:$0xf0]  ;;  %v4851_v40 = vld [vmem:[%s10405_s1 + $0x320] sm:$0xf]  ;;  %v4511_v47 = vld [vmem:[%s10405_s1 + $0x78] sm:$0xf] }
   0xb   :  { %3244 = vmatpush.bf16.msra.mxu3 %v5052_v25  ;;  %v6665_v41 = vld [vmem:[%s10405_s1 + $0x330] sm:$0xf0]  ;;  %v5011_v42 = vld [vmem:[%s10405_s1 + $0x460] sm:$0xf]  ;;  %v4692_v45 = vor.u32 %v6625_v39, %v4691_v37  ;;  %v6580_v48 = vld [vmem:[%s10405_s1 + $0x88] sm:$0xf0] }
   0xc   :  { %v6705_v43 = vld [vmem:[%s10405_s1 + $0x470] sm:$0xf0]  ;;  %3206 = vmatpush.bf16.msra.mxu0 %v4552_v29  ;;  %v4852_v46 = vor.u32 %v6665_v41, %v4851_v40  ;;  %v4671_v49 = vld [vmem:[%s10405_s1 + $0x1b8] sm:$0xf]  ;;  %v6620_v51 = vld [vmem:[%s10405_s1 + $0x1c8] sm:$0xf0]  ;;  %v4512_v56 = vor.u32 %v6580_v48, %v4511_v47 }
   0xd   :  { %3219 = vmatpush.bf16.msra.mxu1 %v4712_v33  ;;  %v5012_v50 = vor.u32 %v6705_v43, %v5011_v42  ;;  %v4831_v52 = vld [vmem:[%s10405_s1 + $0x2f8] sm:$0xf]  ;;  %v6660_v53 = vld [vmem:[%s10405_s1 + $0x308] sm:$0xf0]  ;;  %v4672_v57 = vor.u32 %v6620_v51, %v4671_v49  ;;  %v4491_v59 = vld [vmem:[%s10405_s1 + $0x50] sm:$0xf] }
   0xe   :  { %3232 = vmatpush.bf16.msra.mxu2 %v4872_v34  ;;  %v4991_v54 = vld [vmem:[%s10405_s1 + $0x438] sm:$0xf]  ;;  %v6700_v55 = vld [vmem:[%s10405_s1 + $0x448] sm:$0xf0]  ;;  %v4832_v58 = vor.u32 %v6660_v53, %v4831_v52  ;;  %v6575_v60 = vld [vmem:[%s10405_s1 + $0x60] sm:$0xf0] }
   0xf   :  { %3245 = vmatpush.bf16.msra.mxu3 %v5032_v38  ;;  %v4651_v61 = vld [vmem:[%s10405_s1 + $0x190] sm:$0xf]  ;;  %v4992_v62 = vor.u32 %v6700_v55, %v4991_v54  ;;  %v6615_v63 = vld [vmem:[%s10405_s1 + $0x1a0] sm:$0xf0]  ;;  %v4492_v4 = vor.u32 %v6575_v60, %v4491_v59  ;;  %v4471_v7 = vld [vmem:[%s10405_s1 + $0x28] sm:$0xf] }
  0x10   :  { %3207 = vmatpush.bf16.msra.mxu0 %v4532_v44  ;;  %v4811_v0 = vld [vmem:[%s10405_s1 + $0x2d0] sm:$0xf]  ;;  %v6655_v1 = vld [vmem:[%s10405_s1 + $0x2e0] sm:$0xf0]  ;;  %v4652_v5 = vor.u32 %v6615_v63, %v4651_v61  ;;  %v6570_v8 = vld [vmem:[%s10405_s1 + $0x38] sm:$0xf0] }
  0x11   :  { %3220 = vmatpush.bf16.msra.mxu1 %v4692_v45  ;;  %v4971_v2 = vld [vmem:[%s10405_s1 + $0x410] sm:$0xf]  ;;  %v6695_v3 = vld [vmem:[%s10405_s1 + $0x420] sm:$0xf0]  ;;  %v4812_v6 = vor.u32 %v6655_v1, %v4811_v0  ;;  %v4631_v9 = vld [vmem:[%s10405_s1 + $0x168] sm:$0xf]  ;;  %v4472_v16 = vor.u32 %v6570_v8, %v4471_v7 }
  0x12   :  { %3233 = vmatpush.bf16.msra.mxu2 %v4852_v46  ;;  %v4972_v10 = vor.u32 %v6695_v3, %v4971_v2  ;;  %v6610_v11 = vld [vmem:[%s10405_s1 + $0x178] sm:$0xf0]  ;;  %v4791_v12 = vld [vmem:[%s10405_s1 + $0x2a8] sm:$0xf]  ;;  %v4451_v17 = vld [vmem:[%s10405_s1] sm:$0xf] }
  0x13   :  { %3246 = vmatpush.bf16.msra.mxu3 %v5012_v50  ;;  %v6650_v13 = vld [vmem:[%s10405_s1 + $0x2b8] sm:$0xf0]  ;;  %v4951_v14 = vld [vmem:[%s10405_s1 + $0x3e8] sm:$0xf]  ;;  %v6565_v18 = vld [vmem:[%s10405_s1 + $0x10] sm:$0xf0]  ;;  %v4632_v19 = vor.u32 %v6610_v11, %v4631_v9 }
  0x14   :  { %3208 = vmatpush.bf16.msra.mxu0 %v4512_v56  ;;  %v6690_v15 = vld [vmem:[%s10405_s1 + $0x3f8] sm:$0xf0]  ;;  %v4792_v20 = vor.u32 %v6650_v13, %v4791_v12  ;;  %v4611_v21 = vld [vmem:[%s10405_s1 + $0x140] sm:$0xf]  ;;  %v6605_v22 = vld [vmem:[%s10405_s1 + $0x150] sm:$0xf0]  ;;  %v4452_v31 = vor.u32 %v6565_v18, %v4451_v17 }
  0x15   :  { %3221 = vmatpush.bf16.msra.mxu1 %v4672_v57  ;;  %v4771_v23 = vld [vmem:[%s10405_s1 + $0x280] sm:$0xf]  ;;  %v4952_v24 = vor.u32 %v6690_v15, %v4951_v14  ;;  %v6645_v25 = vld [vmem:[%s10405_s1 + $0x290] sm:$0xf0]  ;;  %v5231_v28 = vld [vmem:[%s10405_s1 + $0x618] sm:$0xf]  ;;  %v4612_v35 = vor.u32 %v6605_v22, %v4611_v21 }
  0x16   :  { %3234 = vmatpush.bf16.msra.mxu2 %v4832_v58  ;;  %v4931_v26 = vld [vmem:[%s10405_s1 + $0x3c0] sm:$0xf]  ;;  %v6685_v27 = vld [vmem:[%s10405_s1 + $0x3d0] sm:$0xf0]  ;;  %v6760_v29 = vld [vmem:[%s10405_s1 + $0x628] sm:$0xf0]  ;;  %v4772_v36 = vor.u32 %v6645_v25, %v4771_v23 }
  0x17   :  { %3247 = vmatpush.bf16.msra.mxu3 %v4992_v62  ;;  %v5391_v30 = vld [vmem:[%s10405_s1 + $0x758] sm:$0xf]  ;;  %v6800_v32 = vld [vmem:[%s10405_s1 + $0x768] sm:$0xf0]  ;;  %v4932_v39 = vor.u32 %v6685_v27, %v4931_v26  ;;  %v5232_v40 = vor.u32 %v6760_v29, %v5231_v28  ;;  %v5211_v43 = vld [vmem:[%s10405_s1 + $0x5f0] sm:$0xf] }
  0x18   :  { %3209 = vmatpush.bf16.msra.mxu0 %v4492_v4  ;;  %v5551_v33 = vld [vmem:[%s10405_s1 + $0x898] sm:$0xf]  ;;  %v6840_v34 = vld [vmem:[%s10405_s1 + $0x8a8] sm:$0xf0]  ;;  %v5392_v41 = vor.u32 %v6800_v32, %v5391_v30  ;;  %v6755_v44 = vld [vmem:[%s10405_s1 + $0x600] sm:$0xf0] }
  0x19   :  { %3222 = vmatpush.bf16.msra.mxu1 %v4652_v5  ;;  %v5711_v37 = vld [vmem:[%s10405_s1 + $0x9d8] sm:$0xf]  ;;  %v6880_v38 = vld [vmem:[%s10405_s1 + $0x9e8] sm:$0xf0]  ;;  %v5552_v42 = vor.u32 %v6840_v34, %v5551_v33  ;;  %v5371_v45 = vld [vmem:[%s10405_s1 + $0x730] sm:$0xf]  ;;  %v5212_v52 = vor.u32 %v6755_v44, %v5211_v43 }
  0x1a   :  { %3235 = vmatpush.bf16.msra.mxu2 %v4812_v6  ;;  %v5712_v46 = vor.u32 %v6880_v38, %v5711_v37  ;;  %v6795_v47 = vld [vmem:[%s10405_s1 + $0x740] sm:$0xf0]  ;;  %v5531_v48 = vld [vmem:[%s10405_s1 + $0x870] sm:$0xf]  ;;  %v5191_v53 = vld [vmem:[%s10405_s1 + $0x5c8] sm:$0xf] }
  0x1b   :  { %3248 = vmatpush.bf16.msra.mxu3 %v4972_v10  ;;  %v6835_v49 = vld [vmem:[%s10405_s1 + $0x880] sm:$0xf0]  ;;  %v5691_v50 = vld [vmem:[%s10405_s1 + $0x9b0] sm:$0xf]  ;;  %v6750_v54 = vld [vmem:[%s10405_s1 + $0x5d8] sm:$0xf0]  ;;  %v5372_v55 = vor.u32 %v6795_v47, %v5371_v45 }
  0x1c   :  { %3210 = vmatpush.bf16.msra.mxu0 %v4472_v16  ;;  %v6875_v51 = vld [vmem:[%s10405_s1 + $0x9c0] sm:$0xf0]  ;;  %v5532_v56 = vor.u32 %v6835_v49, %v5531_v48  ;;  %v5351_v57 = vld [vmem:[%s10405_s1 + $0x708] sm:$0xf]  ;;  %v6790_v58 = vld [vmem:[%s10405_s1 + $0x718] sm:$0xf0]  ;;  %v5192_v1 = vor.u32 %v6750_v54, %v5191_v53 }
  0x1d   :  { %3223 = vmatpush.bf16.msra.mxu1 %v4632_v19  ;;  %v22_v59 = vld [vmem:[%s10404_s0] sm:$0xff]  ;;  %v5692_v60 = vor.u32 %v6875_v51, %v5691_v50  ;;  %v5511_v61 = vld [vmem:[%s10405_s1 + $0x848] sm:$0xf]  ;;  %v6830_v62 = vld [vmem:[%s10405_s1 + $0x858] sm:$0xf0]  ;;  %v5352_v2 = vor.u32 %v6790_v58, %v5351_v57 }
  0x1e   :  { %3236 = vmatpush.bf16.msra.mxu2 %v4792_v20  ;;  %625 = vst [vmem:[#allocation1] ss:$9 sm:$0xff] %v22_v59  ;;  %v5671_v63 = vld [vmem:[%s10405_s1 + $0x988] sm:$0xf]  ;;  %v6870_v0 = vld [vmem:[%s10405_s1 + $0x998] sm:$0xf0]  ;;  %v5512_v3 = vor.u32 %v6830_v62, %v5511_v61 }
  0x1f   :  { %3249 = vmatpush.bf16.msra.mxu3 %v4952_v24  ;;  %v5171_v4 = vld [vmem:[%s10405_s1 + $0x5a0] sm:$0xf]  ;;  %v6745_v5 = vld [vmem:[%s10405_s1 + $0x5b0] sm:$0xf0]  ;;  %v5672_v7 = vor.u32 %v6870_v0, %v5671_v63  ;;  %v5151_v13 = vld [vmem:[%s10405_s1 + $0x578] sm:$0xf] }
  0x20   :  { %3211 = vmatpush.bf16.msra.mxu0 %v4452_v31  ;;  %v5331_v6 = vld [vmem:[%s10405_s1 + $0x6e0] sm:$0xf]  ;;  %v6785_v8 = vld [vmem:[%s10405_s1 + $0x6f0] sm:$0xf0]  ;;  %v5172_v14 = vor.u32 %v6745_v5, %v5171_v4  ;;  %v6740_v15 = vld [vmem:[%s10405_s1 + $0x588] sm:$0xf0] }
  0x21   :  { %3224 = vmatpush.bf16.msra.mxu1 %v4612_v35  ;;  %v5491_v9 = vld [vmem:[%s10405_s1 + $0x820] sm:$0xf]  ;;  %v6825_v10 = vld [vmem:[%s10405_s1 + $0x830] sm:$0xf0]  ;;  %v5311_v16 = vld [vmem:[%s10405_s1 + $0x6b8] sm:$0xf]  ;;  %v5332_v18 = vor.u32 %v6785_v8, %v5331_v6  ;;  %v5152_v29 = vor.u32 %v6740_v15, %v5151_v13 }
  0x22   :  { %3237 = vmatpush.bf16.msra.mxu2 %v4772_v36  ;;  %v5651_v11 = vld [vmem:[%s10405_s1 + $0x960] sm:$0xf]  ;;  %v6865_v12 = vld [vmem:[%s10405_s1 + $0x970] sm:$0xf0]  ;;  %v6780_v17 = vld [vmem:[%s10405_s1 + $0x6c8] sm:$0xf0]  ;;  %v5492_v19 = vor.u32 %v6825_v10, %v5491_v9 }
  0x23   :  { %3250 = vmatpush.bf16.msra.mxu3 %v4932_v39  ;;  %v5652_v23 = vor.u32 %v6865_v12, %v5651_v11  ;;  %v5471_v24 = vld [vmem:[%s10405_s1 + $0x7f8] sm:$0xf]  ;;  %v6820_v25 = vld [vmem:[%s10405_s1 + $0x808] sm:$0xf0]  ;;  %v5312_v30 = vor.u32 %v6780_v17, %v5311_v16  ;;  %v5131_v32 = vld [vmem:[%s10405_s1 + $0x550] sm:$0xf] }
  0x24   :  { %3256 = vmatpush.bf16.msrb.mxu0 %v5232_v40  ;;  %v5631_v27 = vld [vmem:[%s10405_s1 + $0x938] sm:$0xf]  ;;  %v6860_v28 = vld [vmem:[%s10405_s1 + $0x948] sm:$0xf0]  ;;  %v5472_v31 = vor.u32 %v6820_v25, %v5471_v24  ;;  %v6735_v33 = vld [vmem:[%s10405_s1 + $0x560] sm:$0xf0] }
  0x25   :  { %3269 = vmatpush.bf16.msrb.mxu1 %v5392_v41  ;;  %v7464_v20 = vld [vmem:[#allocation1 + $0x12] sm:$0xff]  ;;  %v7466_v21 = vld [vmem:[#allocation1] sm:$0xff]  ;;  %v7477_v26 = vld [vmem:[#allocation1 + $0x9] sm:$0xff]  ;;  %v5632_v35 = vor.u32 %v6860_v28, %v5631_v27  ;;  %v5132_v41 = vor.u32 %v6735_v33, %v5131_v32 }
  0x26   :  { %3282 = vmatpush.bf16.msrb.mxu2 %v5552_v42  ;;  %v7468_v22 = vld [vmem:[#allocation1 + $0x1b] sm:$0xff]  ;;  %3212 = vmatmul.bf16.vlgmr.msra.gmra.mxu0 %v7466_v21  ;;  %v5291_v34 = vld [vmem:[%s10405_s1 + $0x690] sm:$0xf]  ;;  %v6775_v36 = vld [vmem:[%s10405_s1 + $0x6a0] sm:$0xf0] }
  0x27   :  { %3295 = vmatpush.bf16.msrb.mxu3 %v5712_v46  ;;  %3238 = vmatmul.bf16.vlgmr.msra.gmra.mxu2 %v7464_v20  ;;  %v5451_v37 = vld [vmem:[%s10405_s1 + $0x7d0] sm:$0xf]  ;;  %v6815_v38 = vld [vmem:[%s10405_s1 + $0x7e0] sm:$0xf0]  ;;  %v5111_v42 = vld [vmem:[%s10405_s1 + $0x528] sm:$0xf]  ;;  %v5292_v43 = vor.u32 %v6775_v36, %v5291_v34 }
  0x28   :  { %3257 = vmatpush.bf16.msrb.mxu0 %v5212_v52  ;;  %3251 = vmatmul.bf16.vlgmr.msra.gmra.mxu3 %v7468_v22  ;;  %v5611_v39 = vld [vmem:[%s10405_s1 + $0x910] sm:$0xf]  ;;  %v6855_v40 = vld [vmem:[%s10405_s1 + $0x920] sm:$0xf0]  ;;  %v5452_v44 = vor.u32 %v6815_v38, %v5451_v37  ;;  %v6730_v45 = vld [vmem:[%s10405_s1 + $0x538] sm:$0xf0] }
  0x29   :  { %3270 = vmatpush.bf16.msrb.mxu1 %v5372_v55  ;;  %v5271_v46 = vld [vmem:[%s10405_s1 + $0x668] sm:$0xf]  ;;  %v6770_v47 = vld [vmem:[%s10405_s1 + $0x678] sm:$0xf0]  ;;  %v5612_v48 = vor.u32 %v6855_v40, %v5611_v39  ;;  %v5091_v53 = vld [vmem:[%s10405_s1 + $0x500] sm:$0xf]  ;;  %v5112_v55 = vor.u32 %v6730_v45, %v5111_v42 }
  0x2a   :  { %3283 = vmatpush.bf16.msrb.mxu2 %v5532_v56  ;;  %3225 = vmatmul.bf16.vlgmr.msra.gmra.mxu1 %v7477_v26  ;;  %v5431_v49 = vld [vmem:[%s10405_s1 + $0x7a8] sm:$0xf]  ;;  %v6810_v50 = vld [vmem:[%s10405_s1 + $0x7b8] sm:$0xf0]  ;;  %v6725_v54 = vld [vmem:[%s10405_s1 + $0x510] sm:$0xf0]  ;;  %v5272_v62 = vor.u32 %v6770_v47, %v5271_v46 }
  0x2b   :  { %3296 = vmatpush.bf16.msrb.mxu3 %v5692_v60  ;;  %v5591_v51 = vld [vmem:[%s10405_s1 + $0x8e8] sm:$0xf]  ;;  %v6850_v52 = vld [vmem:[%s10405_s1 + $0x8f8] sm:$0xf0]  ;;  %v5251_v56 = vld [vmem:[%s10405_s1 + $0x640] sm:$0xf]  ;;  %v5432_v63 = vor.u32 %v6810_v50, %v5431_v49  ;;  %v5092_v9 = vor.u32 %v6725_v54, %v5091_v53 }
  0x2c   :  { %3258 = vmatpush.bf16.msrb.mxu0 %v5192_v1  ;;  %v6765_v57 = vld [vmem:[%s10405_s1 + $0x650] sm:$0xf0]  ;;  %v5411_v58 = vld [vmem:[%s10405_s1 + $0x780] sm:$0xf]  ;;  %v23_v61 = vld [vmem:[%s10404_s0 + $0x8] sm:$0x1f] }
  0x2d   :  { %3271 = vmatpush.bf16.msrb.mxu1 %v5352_v2  ;;  %v6805_v59 = vld [vmem:[%s10405_s1 + $0x790] sm:$0xf0]  ;;  %v7559_v0 = vld [vmem:[#allocation1 + $0x24] sm:$0xff]  ;;  %v5571_v4 = vld [vmem:[%s10405_s1 + $0x8c0] sm:$0xf]  ;;  %v5252_v13 = vor.u32 %v6765_v57, %v5251_v56 }
  0x2e   :  { %3284 = vmatpush.bf16.msrb.mxu2 %v5512_v3  ;;  %v7554_v60 = vld [vmem:[#allocation1 + $0x36] sm:$0xff]  ;;  %v7561_v1 = vld [vmem:[#allocation1 + $0x3f] sm:$0xff]  ;;  %v7563_v2 = vld [vmem:[#allocation1 + $0x2d] sm:$0xff]  ;;  %v5592_v3 = vor.u32 %v6850_v52, %v5591_v51 }
  0x2f   :  { %3297 = vmatpush.bf16.msrb.mxu3 %v5672_v7  ;;  %v6845_v5 = vld [vmem:[%s10405_s1 + $0x8d0] sm:$0xf0]  ;;  %635 = vst [vmem:[#allocation1] ss:$9 sm:$0xff] %v23_v61  ;;  %v5871_v6 = vld [vmem:[%s10405_s1 + $0xb18] sm:$0xf] }
  0x30   :  { %3259 = vmatpush.bf16.msrb.mxu0 %v5172_v14  ;;  %v6920_v7 = vld [vmem:[%s10405_s1 + $0xb28] sm:$0xf0]  ;;  %v6031_v8 = vld [vmem:[%s10405_s1 + $0xc58] sm:$0xf]  ;;  %v5412_v14 = vor.u32 %v6805_v59, %v5411_v58  ;;  %v5572_v17 = vor.u32 %v6845_v5, %v5571_v4  ;;  %v5851_v24 = vld [vmem:[%s10405_s1 + $0xaf0] sm:$0xf] }
  0x31   :  { %3272 = vmatpush.bf16.msrb.mxu1 %v5332_v18  ;;  %v6960_v10 = vld [vmem:[%s10405_s1 + $0xc68] sm:$0xf0]  ;;  %v6191_v11 = vld [vmem:[%s10405_s1 + $0xd98] sm:$0xf]  ;;  %v5872_v18 = vor.u32 %v6920_v7, %v5871_v6  ;;  %v6915_v25 = vld [vmem:[%s10405_s1 + $0xb00] sm:$0xf0] }
  0x32   :  { %3285 = vmatpush.bf16.msrb.mxu2 %v5492_v19  ;;  %v7000_v12 = vld [vmem:[%s10405_s1 + $0xda8] sm:$0xf0]  ;;  %v6351_v15 = vld [vmem:[%s10405_s1 + $0xed8] sm:$0xf]  ;;  %v6032_v19 = vor.u32 %v6960_v10, %v6031_v8  ;;  %v6011_v27 = vld [vmem:[%s10405_s1 + $0xc30] sm:$0xf]  ;;  %v5852_v34 = vor.u32 %v6915_v25, %v5851_v24 }
  0x33   :  { %3298 = vmatpush.bf16.msrb.mxu3 %v5652_v23  ;;  %v7040_v16 = vld [vmem:[%s10405_s1 + $0xee8] sm:$0xf0]  ;;  %v6192_v23 = vor.u32 %v7000_v12, %v6191_v11  ;;  %v6331_v32 = vld [vmem:[%s10405_s1 + $0xeb0] sm:$0xf]  ;;  %v7035_v33 = vld [vmem:[%s10405_s1 + $0xec0] sm:$0xf0] }
  0x34   :  { %3260 = vmatpush.bf16.msrb.mxu0 %v5152_v29  ;;  %v6352_v28 = vor.u32 %v7040_v16, %v6351_v15  ;;  %v6955_v29 = vld [vmem:[%s10405_s1 + $0xc40] sm:$0xf0]  ;;  %v5831_v37 = vld [vmem:[%s10405_s1 + $0xac8] sm:$0xf]  ;;  %v6910_v38 = vld [vmem:[%s10405_s1 + $0xad8] sm:$0xf0]  ;;  %v6332_v40 = vor.u32 %v7035_v33, %v6331_v32 }
  0x35   :  { %3273 = vmatpush.bf16.msrb.mxu1 %v5312_v30  ;;  %v6171_v30 = vld [vmem:[%s10405_s1 + $0xd70] sm:$0xf]  ;;  %v5991_v39 = vld [vmem:[%s10405_s1 + $0xc08] sm:$0xf]  ;;  %v7030_v45 = vld [vmem:[%s10405_s1 + $0xe98] sm:$0xf0]  ;;  %v5832_v46 = vor.u32 %v6910_v38, %v5831_v37 }
  0x36   :  { %3286 = vmatpush.bf16.msrb.mxu2 %v5472_v31  ;;  %v6995_v31 = vld [vmem:[%s10405_s1 + $0xd80] sm:$0xf0]  ;;  %v6151_v42 = vld [vmem:[%s10405_s1 + $0xd48] sm:$0xf]  ;;  %v5811_v49 = vld [vmem:[%s10405_s1 + $0xaa0] sm:$0xf] }
  0x37   :  { %3299 = vmatpush.bf16.msrb.mxu3 %v5632_v35  ;;  %v6012_v35 = vor.u32 %v6955_v29, %v6011_v27  ;;  %v6172_v36 = vor.u32 %v6995_v31, %v6171_v30  ;;  %v6905_v50 = vld [vmem:[%s10405_s1 + $0xab0] sm:$0xf0]  ;;  %v5971_v51 = vld [vmem:[%s10405_s1 + $0xbe0] sm:$0xf]  ;;  %v6940_v5 = vld [vmem:[%s10405_s1 + $0xbc8] sm:$0xf0] }
  0x38   :  { %3261 = vmatpush.bf16.msrb.mxu0 %v5132_v41  ;;  %v6950_v41 = vld [vmem:[%s10405_s1 + $0xc18] sm:$0xf0]  ;;  %v6945_v53 = vld [vmem:[%s10405_s1 + $0xbf0] sm:$0xf0]  ;;  %v6131_v54 = vld [vmem:[%s10405_s1 + $0xd20] sm:$0xf]  ;;  %v5812_v58 = vor.u32 %v6905_v50, %v5811_v49 }
  0x39   :  { %3274 = vmatpush.bf16.msrb.mxu1 %v5292_v43  ;;  %v6990_v43 = vld [vmem:[%s10405_s1 + $0xd58] sm:$0xf0]  ;;  %v5992_v47 = vor.u32 %v6950_v41, %v5991_v39  ;;  %v6291_v56 = vld [vmem:[%s10405_s1 + $0xe60] sm:$0xf]  ;;  %v7025_v57 = vld [vmem:[%s10405_s1 + $0xe70] sm:$0xf0]  ;;  %v5972_v59 = vor.u32 %v6945_v53, %v5971_v51 }
  0x3a   :  { %3287 = vmatpush.bf16.msrb.mxu2 %v5452_v44  ;;  %v6311_v44 = vld [vmem:[%s10405_s1 + $0xe88] sm:$0xf]  ;;  %v6292_v4 = vor.u32 %v7025_v57, %v6291_v56  ;;  %v6111_v6 = vld [vmem:[%s10405_s1 + $0xcf8] sm:$0xf]  ;;  %v6980_v7 = vld [vmem:[%s10405_s1 + $0xd08] sm:$0xf0] }
  0x3b   :  { %3300 = vmatpush.bf16.msrb.mxu3 %v5612_v48  ;;  %v6152_v48 = vor.u32 %v6990_v43, %v6151_v42  ;;  %v6312_v52 = vor.u32 %v7030_v45, %v6311_v44  ;;  %v6271_v8 = vld [vmem:[%s10405_s1 + $0xe38] sm:$0xf]  ;;  %v6112_v12 = vor.u32 %v6980_v7, %v6111_v6  ;;  %v5931_v15 = vld [vmem:[%s10405_s1 + $0xb90] sm:$0xf]  ;;  %v7015_v24 = vld [vmem:[%s10405_s1 + $0xe20] sm:$0xf0] }
  0x3c   :  { %3262 = vmatpush.bf16.msrb.mxu0 %v5112_v55  ;;  %v6985_v55 = vld [vmem:[%s10405_s1 + $0xd30] sm:$0xf0]  ;;  %v5751_v29 = vld [vmem:[%s10405_s1 + $0xa28] sm:$0xf]  ;;  %v6890_v30 = vld [vmem:[%s10405_s1 + $0xa38] sm:$0xf0] }
  0x3d   :  { %3275 = vmatpush.bf16.msrb.mxu1 %v5272_v62  ;;  %v6132_v61 = vor.u32 %v6985_v55, %v6131_v54  ;;  %v5791_v62 = vld [vmem:[%s10405_s1 + $0xa78] sm:$0xf]  ;;  %v5911_v31 = vld [vmem:[%s10405_s1 + $0xb68] sm:$0xf]  ;;  %v6930_v33 = vld [vmem:[%s10405_s1 + $0xb78] sm:$0xf0]  ;;  %v5752_v38 = vor.u32 %v6890_v30, %v5751_v29 }
  0x3e   :  { %3288 = vmatpush.bf16.msrb.mxu2 %v5432_v63  ;;  %v6900_v63 = vld [vmem:[%s10405_s1 + $0xa88] sm:$0xf0]  ;;  %v7010_v37 = vld [vmem:[%s10405_s1 + $0xdf8] sm:$0xf0]  ;;  %v5731_v39 = vld [vmem:[%s10405_s1 + $0xa00] sm:$0xf]  ;;  %v5912_v41 = vor.u32 %v6930_v33, %v5911_v31 }
  0x3f   :  { %3301 = vmatpush.bf16.msrb.mxu3 %v5592_v3  ;;  %v5951_v3 = vld [vmem:[%s10405_s1 + $0xbb8] sm:$0xf]  ;;  %v5792_v10 = vor.u32 %v6900_v63, %v5791_v62  ;;  %v5891_v43 = vld [vmem:[%s10405_s1 + $0xb40] sm:$0xf]  ;;  %v6925_v44 = vld [vmem:[%s10405_s1 + $0xb50] sm:$0xf0] }
  0x40   :  { %3263 = vmatpush.bf16.msrb.mxu0 %v5092_v9  ;;  %v7020_v9 = vld [vmem:[%s10405_s1 + $0xe48] sm:$0xf0]  ;;  %v5952_v11 = vor.u32 %v6940_v5, %v5951_v3  ;;  %v6051_v45 = vld [vmem:[%s10405_s1 + $0xc80] sm:$0xf]  ;;  %v7005_v49 = vld [vmem:[%s10405_s1 + $0xdd0] sm:$0xf0]  ;;  %v5892_v57 = vor.u32 %v6925_v44, %v5891_v43 }
  0x41   :  { %3276 = vmatpush.bf16.msrb.mxu1 %v5252_v13  ;;  %v5771_v13 = vld [vmem:[%s10405_s1 + $0xa50] sm:$0xf]  ;;  %v6272_v16 = vor.u32 %v7020_v9, %v6271_v8  ;;  %v6391_v50 = vld [vmem:[%s10405_s1 + $0xf28] sm:$0xf]  ;;  %v7050_v51 = vld [vmem:[%s10405_s1 + $0xf38] sm:$0xf0] }
  0x42   :  { %3289 = vmatpush.bf16.msrb.mxu2 %v5412_v14  ;;  %v6895_v14 = vld [vmem:[%s10405_s1 + $0xa60] sm:$0xf0]  ;;  %v4593_v54 = vld [vmem:[%s10405_s1 + $0x12c] sm:$0xf0]  ;;  %v6638_v55 = vld [vmem:[%s10405_s1 + $0x25c] sm:$0xf]  ;;  %v6392_v63 = vor.u32 %v7050_v51, %v6391_v50 }
  0x43   :  { %3302 = vmatpush.bf16.msrb.mxu3 %v5572_v17  ;;  %3264 = vmatmul.bf16.vlgmr.msrb.gmra.mxu0 %v7559_v0  ;;  %v6935_v17 = vld [vmem:[%s10405_s1 + $0xba0] sm:$0xf0]  ;;  %v5772_v25 = vor.u32 %v6895_v14, %v5771_v13  ;;  %v4753_v56 = vld [vmem:[%s10405_s1 + $0x26c] sm:$0xf0]  ;;  %v6371_v3 = vld [vmem:[%s10405_s1 + $0xf00] sm:$0xf] }
  0x44   :  { %3308 = vmatpush.bf16.msra.mxu0 %v5872_v18  ;;  %3277 = vmatmul.bf16.vlgmr.msrb.gmra.mxu1 %v7563_v2  ;;  %v6091_v18 = vld [vmem:[%s10405_s1 + $0xcd0] sm:$0xf]  ;;  %v5932_v27 = vor.u32 %v6935_v17, %v5931_v15  ;;  %v4756_v5 = vor.u32 %v6638_v55, %v4753_v56  ;;  %v7794_v6 = vld [vmem:[#allocation1] sm:$0xff]  ;;  %v7045_v7 = vld [vmem:[%s10405_s1 + $0xf10] sm:$0xf0] }
  0x45   :  { %3321 = vmatpush.bf16.msra.mxu1 %v6032_v19  ;;  %3290 = vmatmul.bf16.vlgmr.msrb.gmra.mxu2 %v7554_v60  ;;  %v6975_v19 = vld [vmem:[%s10405_s1 + $0xce0] sm:$0xf0]  ;;  %v6593_v8 = vld [vmem:[%s10405_s1 + $0xf4] sm:$0xf]  ;;  %v4573_v9 = vld [vmem:[%s10405_s1 + $0x104] sm:$0xf0] }
  0x46   :  { %3334 = vmatpush.bf16.msra.mxu2 %v6192_v23  ;;  %3303 = vmatmul.bf16.vlgmr.msrb.gmra.mxu3 %v7561_v1  ;;  %v6251_v23 = vld [vmem:[%s10405_s1 + $0xe10] sm:$0xf]  ;;  %v6673_v13 = vld [vmem:[%s10405_s1 + $0x374] sm:$0xf]  ;;  %v4893_v14 = vld [vmem:[%s10405_s1 + $0x384] sm:$0xf0] }
  0x47   :  { %3347 = vmatpush.bf16.msra.mxu3 %v6352_v28  ;;  %v6092_v28 = vor.u32 %v6975_v19, %v6091_v18  ;;  %v6252_v32 = vor.u32 %v7015_v24, %v6251_v23  ;;  %v6718_v15 = vld [vmem:[%s10405_s1 + $0x4dc] sm:$0xf]  ;;  %v7823_v17 = vld [vmem:[#allocation1 + $0x12] sm:$0xff]  ;;  %v7825_v18 = vld [vmem:[#allocation1 + $0x9] sm:$0xff]  ;;  %v6372_v19 = vor.u32 %v7045_v7, %v6371_v3  ;;  %v4576_v24 = vor.u32 %v6593_v8, %v4573_v9 }
  0x48   :  { %3309 = vmatpush.bf16.msra.mxu0 %v5852_v34  ;;  %v6071_v34 = vld [vmem:[%s10405_s1 + $0xca8] sm:$0xf]  ;;  %v7827_v23 = vld [vmem:[#allocation1 + $0x1b] sm:$0xff]  ;;  %v4896_v29 = vor.u32 %v6673_v13, %v4893_v14  ;;  %v6628_v31 = vld [vmem:[%s10405_s1 + $0x20c] sm:$0xf] }
  0x49   :  { %3322 = vmatpush.bf16.msra.mxu1 %v6012_v35  ;;  %v6970_v35 = vld [vmem:[%s10405_s1 + $0xcb8] sm:$0xf0]  ;;  %v6668_v33 = vld [vmem:[%s10405_s1 + $0x34c] sm:$0xf]  ;;  %v4693_v44 = vld [vmem:[%s10405_s1 + $0x1f4] sm:$0xf0] }
  0x4a   :  { %3335 = vmatpush.bf16.msra.mxu2 %v6172_v36  ;;  %v6231_v36 = vld [vmem:[%s10405_s1 + $0xde8] sm:$0xf]  ;;  %v6072_v42 = vor.u32 %v6970_v35, %v6071_v34  ;;  %v4873_v34 = vld [vmem:[%s10405_s1 + $0x35c] sm:$0xf0]  ;;  %v6713_v35 = vld [vmem:[%s10405_s1 + $0x4b4] sm:$0xf] }
  0x4b   :  { %3348 = vmatpush.bf16.msra.mxu3 %v6332_v40  ;;  %v6885_v40 = vld [vmem:[%s10405_s1 + $0xa10] sm:$0xf0] }
  0x4c   :  { %3310 = vmatpush.bf16.msra.mxu0 %v5832_v46  ;;  %v6232_v46 = vor.u32 %v7010_v37, %v6231_v36  ;;  %v5732_v53 = vor.u32 %v6885_v40, %v5731_v39  ;;  %v5053_v36 = vld [vmem:[%s10405_s1 + $0x4c4] sm:$0xf0]  ;;  %v6583_v39 = vld [vmem:[%s10405_s1 + $0xa4] sm:$0xf]  ;;  %v4533_v40 = vld [vmem:[%s10405_s1 + $0xb4] sm:$0xf0] }
  0x4d   :  { %3323 = vmatpush.bf16.msra.mxu1 %v5992_v47  ;;  %v6965_v47 = vld [vmem:[%s10405_s1 + $0xc90] sm:$0xf0]  ;;  %v5056_v43 = vor.u32 %v6713_v35, %v5053_v36 }
  0x4e   :  { %3336 = vmatpush.bf16.msra.mxu2 %v6152_v48  ;;  %v6211_v48 = vld [vmem:[%s10405_s1 + $0xdc0] sm:$0xf] }
  0x4f   :  { %3349 = vmatpush.bf16.msra.mxu3 %v6312_v52  ;;  %v6598_v52 = vld [vmem:[%s10405_s1 + $0x11c] sm:$0xf]  ;;  %v6212_v62 = vor.u32 %v7005_v49, %v6211_v48  ;;  %v5033_v48 = vld [vmem:[%s10405_s1 + $0x49c] sm:$0xf0] }
  0x50   :  { %3311 = vmatpush.bf16.msra.mxu0 %v5812_v58  ;;  %v6052_v58 = vor.u32 %v6965_v47, %v6051_v45  ;;  %v6663_v45 = vld [vmem:[%s10405_s1 + $0x324] sm:$0xf]  ;;  %v6708_v47 = vld [vmem:[%s10405_s1 + $0x48c] sm:$0xf] }
  0x51   :  { %3324 = vmatpush.bf16.msra.mxu1 %v5972_v59  ;;  %v6678_v59 = vld [vmem:[%s10405_s1 + $0x39c] sm:$0xf] }
  0x52   :  { %3337 = vmatpush.bf16.msra.mxu2 %v6132_v61  ;;  %v4913_v61 = vld [vmem:[%s10405_s1 + $0x3ac] sm:$0xf0] }
  0x53   :  { %3350 = vmatpush.bf16.msra.mxu3 %v6292_v4  ;;  %v4596_v4 = vor.u32 %v6598_v52, %v4593_v54 }
  0x54   :  { %3312 = vmatpush.bf16.msra.mxu0 %v5792_v10  ;;  %v4916_v10 = vor.u32 %v6678_v59, %v4913_v61 }
  0x55   :  { %3325 = vmatpush.bf16.msra.mxu1 %v5952_v11  ;;  %v6633_v11 = vld [vmem:[%s10405_s1 + $0x234] sm:$0xf] }
  0x56   :  { %3338 = vmatpush.bf16.msra.mxu2 %v6112_v12  ;;  %v4733_v12 = vld [vmem:[%s10405_s1 + $0x244] sm:$0xf0] }
  0x57   :  { %3351 = vmatpush.bf16.msra.mxu3 %v6272_v16  ;;  %v5073_v16 = vld [vmem:[%s10405_s1 + $0x4ec] sm:$0xf0] }
  0x58   :  { %3313 = vmatpush.bf16.msra.mxu0 %v5772_v25  ;;  %v4736_v25 = vor.u32 %v6633_v11, %v4733_v12  ;;  %v5076_v30 = vor.u32 %v6718_v15, %v5073_v16 }
  0x59   :  { %3326 = vmatpush.bf16.msra.mxu1 %v5932_v27  ;;  %v6588_v27 = vld [vmem:[%s10405_s1 + $0xcc] sm:$0xf] }
  0x5a   :  { %3339 = vmatpush.bf16.msra.mxu2 %v6092_v28  ;;  %v4553_v28 = vld [vmem:[%s10405_s1 + $0xdc] sm:$0xf0] }
  0x5b   :  { %3352 = vmatpush.bf16.msra.mxu3 %v6252_v32  ;;  %v4713_v32 = vld [vmem:[%s10405_s1 + $0x21c] sm:$0xf0]  ;;  %v4556_v37 = vor.u32 %v6588_v27, %v4553_v28 }
  0x5c   :  { %3314 = vmatpush.bf16.msra.mxu0 %v5752_v38  ;;  %v4716_v38 = vor.u32 %v6628_v31, %v4713_v32 }
  0x5d   :  { %3327 = vmatpush.bf16.msra.mxu1 %v5912_v41  ;;  %v6623_v41 = vld [vmem:[%s10405_s1 + $0x1e4] sm:$0xf] }
  0x5e   :  { %3340 = vmatpush.bf16.msra.mxu2 %v6072_v42  ;;  %v4876_v42 = vor.u32 %v6668_v33, %v4873_v34 }
  0x5f   :  { %3353 = vmatpush.bf16.msra.mxu3 %v6232_v46  ;;  %v4853_v46 = vld [vmem:[%s10405_s1 + $0x334] sm:$0xf0] }
  0x60   :  { %3315 = vmatpush.bf16.msra.mxu0 %v5732_v53 }
  0x61   :  { %3328 = vmatpush.bf16.msra.mxu1 %v5892_v57 }
  0x62   :  { %3341 = vmatpush.bf16.msra.mxu2 %v6052_v58 }
  0x63   :  { %3354 = vmatpush.bf16.msra.mxu3 %v6212_v62  ;;  %3316 = vmatmul.bf16.vlgmr.msra.gmra.mxu0 %v7794_v6 }
  0x64   :  { %3366 = vmatpush.bf16.msrb.mxu0 %v6392_v63  ;;  %3329 = vmatmul.bf16.vlgmr.msra.gmra.mxu1 %v7825_v18 }
  0x65   :  { %3373 = vmatpush.bf16.msrb.mxu1 %v4596_v4  ;;  %3342 = vmatmul.bf16.vlgmr.msra.gmra.mxu2 %v7823_v17 }
  0x66   :  { %3386 = vmatpush.bf16.msrb.mxu2 %v4756_v5  ;;  %3355 = vmatmul.bf16.vlgmr.msra.gmra.mxu3 %v7827_v23 }
  0x67   :  { %3399 = vmatpush.bf16.msrb.mxu3 %v4916_v10 }
  0x68   :  { %3367 = vmatpush.bf16.msrb.mxu0 %v6372_v19 }
  0x69   :  { %3374 = vmatpush.bf16.msrb.mxu1 %v4576_v24 }
  0x6a   :  { %3387 = vmatpush.bf16.msrb.mxu2 %v4736_v25 }
  0x6b   :  { %3400 = vmatpush.bf16.msrb.mxu3 %v4896_v29 }
  0x6c   :  { %3412 = vmatpush.bf16.msra.mxu0 %v5076_v30 }
  0x6d   :  { %10 = vsyncpa [#allocation3], 0  ;;  %3375 = vmatpush.bf16.msrb.mxu1 %v4556_v37  ;;  %v4536_v49 = vor.u32 %v6583_v39, %v4533_v40  ;;  %v4696_v50 = vor.u32 %v6623_v41, %v4693_v44  ;;  %v6578_v51 = vld [vmem:[%s10405_s1 + $0x7c] sm:$0xf]  ;;  %v4513_v52 = vld [vmem:[%s10405_s1 + $0x8c] sm:$0xf0]  ;;  %v4856_v53 = vor.u32 %v6663_v45, %v4853_v46  ;;  %v5036_v54 = vor.u32 %v6708_v47, %v5033_v48 }
  0x6e   :  { %3388 = vmatpush.bf16.msrb.mxu2 %v4716_v38  ;;  %v6618_v55 = vld [vmem:[%s10405_s1 + $0x1bc] sm:$0xf]  ;;  %v4673_v56 = vld [vmem:[%s10405_s1 + $0x1cc] sm:$0xf0]  ;;  %v6703_v59 = vld [vmem:[%s10405_s1 + $0x464] sm:$0xf]  ;;  %v4516_v62 = vor.u32 %v6578_v51, %v4513_v52 }
  0x6f   :  { %3401 = vmatpush.bf16.msrb.mxu3 %v4876_v42  ;;  %v6658_v57 = vld [vmem:[%s10405_s1 + $0x2fc] sm:$0xf]  ;;  %v4833_v58 = vld [vmem:[%s10405_s1 + $0x30c] sm:$0xf0]  ;;  %v5013_v61 = vld [vmem:[%s10405_s1 + $0x474] sm:$0xf0]  ;;  %v4676_v63 = vor.u32 %v6618_v55, %v4673_v56 }
  0x70   :  { %3413 = vmatpush.bf16.msra.mxu0 %v5056_v43  ;;  %v6573_v3 = vld [vmem:[%s10405_s1 + $0x54] sm:$0xf]  ;;  %v4493_v4 = vld [vmem:[%s10405_s1 + $0x64] sm:$0xf0]  ;;  %v4836_v5 = vor.u32 %v6658_v57, %v4833_v58  ;;  %v5016_v7 = vor.u32 %v6703_v59, %v5013_v61  ;;  %v6698_v12 = vld [vmem:[%s10405_s1 + $0x43c] sm:$0xf] }
  0x71   :  { %3376 = vmatpush.bf16.msrb.mxu1 %v4536_v49  ;;  %v6613_v8 = vld [vmem:[%s10405_s1 + $0x194] sm:$0xf]  ;;  %v4653_v9 = vld [vmem:[%s10405_s1 + $0x1a4] sm:$0xf0]  ;;  %v4993_v13 = vld [vmem:[%s10405_s1 + $0x44c] sm:$0xf0]  ;;  %v4496_v15 = vor.u32 %v6573_v3, %v4493_v4 }
  0x72   :  { %3389 = vmatpush.bf16.msrb.mxu2 %v4696_v50  ;;  %v6653_v10 = vld [vmem:[%s10405_s1 + $0x2d4] sm:$0xf]  ;;  %v4813_v11 = vld [vmem:[%s10405_s1 + $0x2e4] sm:$0xf0]  ;;  %vm3201_vm0 = vcmask 261120   ;;  %v4656_v16 = vor.u32 %v6613_v8, %v4653_v9  ;;  %v4996_v27 = vor.u32 %v6698_v12, %v4993_v13  ;;  %vm4362_vm1 = vcmask 1043456  }
  0x73   :  { %3402 = vmatpush.bf16.msrb.mxu3 %v4856_v53  ;;  %v7929_v14 = vld [vmem:[#allocation1 + $0x24] sm:$0xff]  ;;  %v6568_v19 = vld [vmem:[%s10405_s1 + $0x2c] sm:$0xf]  ;;  %v4473_v24 = vld [vmem:[%s10405_s1 + $0x3c] sm:$0xf0]  ;;  %v4816_v25 = vor.u32 %v6653_v10, %v4813_v11  ;;  %vm4358_vm2 = vcmask 719872  }
  0x74   :  { %3414 = vmatpush.bf16.msra.mxu0 %v5036_v54  ;;  %v6608_v28 = vld [vmem:[%s10405_s1 + $0x16c] sm:$0xf]  ;;  %v4633_v29 = vld [vmem:[%s10405_s1 + $0x17c] sm:$0xf0]  ;;  %v6693_v32 = vld [vmem:[%s10405_s1 + $0x414] sm:$0xf]  ;;  %v4476_v34 = vor.u32 %v6568_v19, %v4473_v24 }
  0x75   :  { %3377 = vmatpush.bf16.msrb.mxu1 %v4516_v62  ;;  %v6648_v30 = vld [vmem:[%s10405_s1 + $0x2ac] sm:$0xf]  ;;  %6409 = vmatmul.msk.bf16.vlgmr.msrb.gmra.mxu0 %vm3201_vm0, %v7929_v14  ;;  %v4793_v31 = vld [vmem:[%s10405_s1 + $0x2bc] sm:$0xf0]  ;;  %v4973_v33 = vld [vmem:[%s10405_s1 + $0x424] sm:$0xf0]  ;;  %v4636_v35 = vor.u32 %v6608_v28, %v4633_v29 }
  0x76   :  { %3390 = vmatpush.bf16.msrb.mxu2 %v4676_v63  ;;  %v6563_v36 = vld [vmem:[%s10405_s1 + $0x4] sm:$0xf]  ;;  %v4453_v37 = vld [vmem:[%s10405_s1 + $0x14] sm:$0xf0]  ;;  %v4796_v39 = vor.u32 %v6648_v30, %v4793_v31  ;;  %v4976_v40 = vor.u32 %v6693_v32, %v4973_v33  ;;  %v6688_v44 = vld [vmem:[%s10405_s1 + $0x3ec] sm:$0xf] }
  0x77   :  { %3403 = vmatpush.bf16.msrb.mxu3 %v4836_v5  ;;  %v6603_v38 = vld [vmem:[%s10405_s1 + $0x144] sm:$0xf]  ;;  %v4613_v41 = vld [vmem:[%s10405_s1 + $0x154] sm:$0xf0]  ;;  %v4953_v45 = vld [vmem:[%s10405_s1 + $0x3fc] sm:$0xf0]  ;;  %v4456_v50 = vor.u32 %v6563_v36, %v4453_v37 }
  0x78   :  { %3415 = vmatpush.bf16.msra.mxu0 %v5016_v7  ;;  %v6643_v42 = vld [vmem:[%s10405_s1 + $0x284] sm:$0xf]  ;;  %v4773_v43 = vld [vmem:[%s10405_s1 + $0x294] sm:$0xf0]  ;;  %v6758_v46 = vld [vmem:[%s10405_s1 + $0x61c] sm:$0xf]  ;;  %v4616_v51 = vor.u32 %v6603_v38, %v4613_v41  ;;  %v4956_v55 = vor.u32 %v6688_v44, %v4953_v45 }
  0x79   :  { %3378 = vmatpush.bf16.msrb.mxu1 %v4496_v15  ;;  %v5233_v47 = vld [vmem:[%s10405_s1 + $0x62c] sm:$0xf0]  ;;  %v6798_v48 = vld [vmem:[%s10405_s1 + $0x75c] sm:$0xf]  ;;  %v4776_v54 = vor.u32 %v6643_v42, %v4773_v43  ;;  %v6683_v56 = vld [vmem:[%s10405_s1 + $0x3c4] sm:$0xf] }
  0x7a   :  { %3391 = vmatpush.bf16.msrb.mxu2 %v4656_v16  ;;  %v5393_v49 = vld [vmem:[%s10405_s1 + $0x76c] sm:$0xf0]  ;;  %v6838_v52 = vld [vmem:[%s10405_s1 + $0x89c] sm:$0xf]  ;;  %v5236_v57 = vor.u32 %v6758_v46, %v5233_v47  ;;  %v4933_v59 = vld [vmem:[%s10405_s1 + $0x3d4] sm:$0xf0] }
  0x7b   :  { %3404 = vmatpush.bf16.msrb.mxu3 %v4816_v25  ;;  %v5553_v53 = vld [vmem:[%s10405_s1 + $0x8ac] sm:$0xf0]  ;;  %v5396_v58 = vor.u32 %v6798_v48, %v5393_v49  ;;  %v6753_v61 = vld [vmem:[%s10405_s1 + $0x5f4] sm:$0xf]  ;;  %v5213_v62 = vld [vmem:[%s10405_s1 + $0x604] sm:$0xf0]  ;;  %v4936_v10 = vor.u32 %v6683_v56, %v4933_v59 }
  0x7c   :  { %3416 = vmatpush.bf16.msra.mxu0 %v4996_v27  ;;  %v5556_v63 = vor.u32 %v6838_v52, %v5553_v53  ;;  %v6793_v3 = vld [vmem:[%s10405_s1 + $0x734] sm:$0xf]  ;;  %v5373_v4 = vld [vmem:[%s10405_s1 + $0x744] sm:$0xf0]  ;;  %v6878_v8 = vld [vmem:[%s10405_s1 + $0x9dc] sm:$0xf]  ;;  %v5216_v11 = vor.u32 %v6753_v61, %v5213_v62 }
  0x7d   :  { %3379 = vmatpush.bf16.msrb.mxu1 %v4476_v34  ;;  %v6833_v5 = vld [vmem:[%s10405_s1 + $0x874] sm:$0xf]  ;;  %v5533_v7 = vld [vmem:[%s10405_s1 + $0x884] sm:$0xf0]  ;;  %v5713_v9 = vld [vmem:[%s10405_s1 + $0x9ec] sm:$0xf0]  ;;  %v5376_v12 = vor.u32 %v6793_v3, %v5373_v4 }
  0x7e   :  { %3392 = vmatpush.bf16.msrb.mxu2 %v4636_v35  ;;  %v6748_v13 = vld [vmem:[%s10405_s1 + $0x5cc] sm:$0xf]  ;;  %v5193_v15 = vld [vmem:[%s10405_s1 + $0x5dc] sm:$0xf0]  ;;  %v5536_v16 = vor.u32 %v6833_v5, %v5533_v7  ;;  %v5716_v19 = vor.u32 %v6878_v8, %v5713_v9  ;;  %v6873_v29 = vld [vmem:[%s10405_s1 + $0x9b4] sm:$0xf] }
  0x7f   :  { %3405 = vmatpush.bf16.msrb.mxu3 %v4796_v39  ;;  %v6788_v24 = vld [vmem:[%s10405_s1 + $0x70c] sm:$0xf]  ;;  %v5353_v25 = vld [vmem:[%s10405_s1 + $0x71c] sm:$0xf0]  ;;  %v5693_v30 = vld [vmem:[%s10405_s1 + $0x9c4] sm:$0xf0]  ;;  %v5196_v31 = vor.u32 %v6748_v13, %v5193_v15 }
  0x80   :  { %3417 = vmatpush.bf16.msra.mxu0 %v4976_v40  ;;  %v6828_v27 = vld [vmem:[%s10405_s1 + $0x84c] sm:$0xf]  ;;  %v5513_v28 = vld [vmem:[%s10405_s1 + $0x85c] sm:$0xf0]  ;;  %v5356_v32 = vor.u32 %v6788_v24, %v5353_v25  ;;  %v6743_v33 = vld [vmem:[%s10405_s1 + $0x5a4] sm:$0xf]  ;;  %v5696_v36 = vor.u32 %v6873_v29, %v5693_v30 }
  0x81   :  { %3380 = vmatpush.bf16.msrb.mxu1 %v4456_v50  ;;  %v5173_v34 = vld [vmem:[%s10405_s1 + $0x5b4] sm:$0xf0]  ;;  %v5516_v35 = vor.u32 %v6828_v27, %v5513_v28  ;;  %v6783_v37 = vld [vmem:[%s10405_s1 + $0x6e4] sm:$0xf]  ;;  %v6868_v41 = vld [vmem:[%s10405_s1 + $0x98c] sm:$0xf] }
  0x82   :  { %3393 = vmatpush.bf16.msrb.mxu2 %v4616_v51  ;;  %v5333_v38 = vld [vmem:[%s10405_s1 + $0x6f4] sm:$0xf0]  ;;  %v6823_v39 = vld [vmem:[%s10405_s1 + $0x824] sm:$0xf]  ;;  %v5673_v42 = vld [vmem:[%s10405_s1 + $0x99c] sm:$0xf0]  ;;  %v5176_v43 = vor.u32 %v6743_v33, %v5173_v34 }
  0x83   :  { %3406 = vmatpush.bf16.msrb.mxu3 %v4776_v54  ;;  %v5493_v40 = vld [vmem:[%s10405_s1 + $0x834] sm:$0xf0]  ;;  %v5336_v44 = vor.u32 %v6783_v37, %v5333_v38  ;;  %v6738_v45 = vld [vmem:[%s10405_s1 + $0x57c] sm:$0xf]  ;;  %v5153_v46 = vld [vmem:[%s10405_s1 + $0x58c] sm:$0xf0]  ;;  %v5676_v48 = vor.u32 %v6868_v41, %v5673_v42 }
  0x84   :  { %3418 = vmatpush.bf16.msra.mxu0 %v4956_v55  ;;  %3381 = vmatmul.bf16.vlgmr.msrb.gmra.mxu1 %v7466_v21  ;;  %v5496_v47 = vor.u32 %v6823_v39, %v5493_v40  ;;  %v6778_v49 = vld [vmem:[%s10405_s1 + $0x6bc] sm:$0xf]  ;;  %v5313_v50 = vld [vmem:[%s10405_s1 + $0x6cc] sm:$0xf0]  ;;  %v6863_v53 = vld [vmem:[%s10405_s1 + $0x964] sm:$0xf]  ;;  %v5156_v55 = vor.u32 %v6738_v45, %v5153_v46 }
  0x85   :  { %3425 = vmatpush.bf16.msra.mxu1 %v5236_v57  ;;  %3394 = vmatmul.bf16.vlgmr.msrb.gmra.mxu2 %v7477_v26  ;;  %v6818_v51 = vld [vmem:[%s10405_s1 + $0x7fc] sm:$0xf]  ;;  %v5473_v52 = vld [vmem:[%s10405_s1 + $0x80c] sm:$0xf0]  ;;  %v5653_v54 = vld [vmem:[%s10405_s1 + $0x974] sm:$0xf0]  ;;  %v5316_v56 = vor.u32 %v6778_v49, %v5313_v50 }
  0x86   :  { %3438 = vmatpush.bf16.msra.mxu2 %v5396_v58  ;;  %3407 = vmatmul.bf16.vlgmr.msrb.gmra.mxu3 %v7464_v20  ;;  %v6733_v57 = vld [vmem:[%s10405_s1 + $0x554] sm:$0xf]  ;;  %v5133_v58 = vld [vmem:[%s10405_s1 + $0x564] sm:$0xf0]  ;;  %v5476_v59 = vor.u32 %v6818_v51, %v5473_v52  ;;  %v5656_v61 = vor.u32 %v6863_v53, %v5653_v54  ;;  %v6858_v5 = vld [vmem:[%s10405_s1 + $0x93c] sm:$0xf] }
  0x87   :  { %3451 = vmatpush.bf16.msra.mxu3 %v5556_v63  ;;  %v6773_v62 = vld [vmem:[%s10405_s1 + $0x694] sm:$0xf]  ;;  %v5293_v63 = vld [vmem:[%s10405_s1 + $0x6a4] sm:$0xf0]  ;;  %v5633_v7 = vld [vmem:[%s10405_s1 + $0x94c] sm:$0xf0]  ;;  %v5136_v8 = vor.u32 %v6733_v57, %v5133_v58 }
  0x88   :  { %3419 = vmatpush.bf16.msra.mxu0 %v4936_v10  ;;  %v6813_v3 = vld [vmem:[%s10405_s1 + $0x7d4] sm:$0xf]  ;;  %v5453_v4 = vld [vmem:[%s10405_s1 + $0x7e4] sm:$0xf0]  ;;  %v5296_v9 = vor.u32 %v6773_v62, %v5293_v63  ;;  %v6728_v10 = vld [vmem:[%s10405_s1 + $0x52c] sm:$0xf]  ;;  %v5636_v13 = vor.u32 %v6858_v5, %v5633_v7 }
  0x89   :  { %3426 = vmatpush.bf16.msra.mxu1 %v5216_v11  ;;  %v5113_v11 = vld [vmem:[%s10405_s1 + $0x53c] sm:$0xf0]  ;;  %v6768_v15 = vld [vmem:[%s10405_s1 + $0x66c] sm:$0xf]  ;;  %v6853_v25 = vld [vmem:[%s10405_s1 + $0x914] sm:$0xf] }
  0x8a   :  { %3439 = vmatpush.bf16.msra.mxu2 %v5376_v12  ;;  %v5456_v12 = vor.u32 %v6813_v3, %v5453_v4  ;;  %v5433_v24 = vld [vmem:[%s10405_s1 + $0x7bc] sm:$0xf0]  ;;  %v5613_v27 = vld [vmem:[%s10405_s1 + $0x924] sm:$0xf0]  ;;  %v5116_v28 = vor.u32 %v6728_v10, %v5113_v11  ;;  %v6723_v30 = vld [vmem:[%s10405_s1 + $0x504] sm:$0xf] }
  0x8b   :  { %3452 = vmatpush.bf16.msra.mxu3 %v5536_v16  ;;  %3420 = vmatmul.bf16.vlgmr.msra.gmra.mxu0 %v7468_v22  ;;  %v5273_v16 = vld [vmem:[%s10405_s1 + $0x67c] sm:$0xf0]  ;;  %v5616_v34 = vor.u32 %v6853_v25, %v5613_v27  ;;  %v5413_v37 = vld [vmem:[%s10405_s1 + $0x794] sm:$0xf0]  ;;  %v6848_v38 = vld [vmem:[%s10405_s1 + $0x8ec] sm:$0xf] }
  0x8c   :  { %3464 = vmatpush.bf16.msrb.mxu0 %v5716_v19  ;;  %v6808_v19 = vld [vmem:[%s10405_s1 + $0x7ac] sm:$0xf]  ;;  %v5276_v29 = vor.u32 %v6768_v15, %v5273_v16  ;;  %v5593_v39 = vld [vmem:[%s10405_s1 + $0x8fc] sm:$0xf0]  ;;  %v6918_v40 = vld [vmem:[%s10405_s1 + $0xb1c] sm:$0xf] }
  0x8d   :  { %3427 = vmatpush.bf16.msra.mxu1 %v5196_v31  ;;  %v5093_v31 = vld [vmem:[%s10405_s1 + $0x514] sm:$0xf0]  ;;  %v5436_v33 = vor.u32 %v6808_v19, %v5433_v24  ;;  %v5873_v41 = vld [vmem:[%s10405_s1 + $0xb2c] sm:$0xf0]  ;;  %v6958_v42 = vld [vmem:[%s10405_s1 + $0xc5c] sm:$0xf]  ;;  %v5596_v49 = vor.u32 %v6848_v38, %v5593_v39 }
  0x8e   :  { %3440 = vmatpush.bf16.msra.mxu2 %v5356_v32  ;;  %v6763_v32 = vld [vmem:[%s10405_s1 + $0x644] sm:$0xf]  ;;  %v6998_v46 = vld [vmem:[%s10405_s1 + $0xd9c] sm:$0xf]  ;;  %v5876_v51 = vor.u32 %v6918_v40, %v5873_v41  ;;  %v5573_v53 = vld [vmem:[%s10405_s1 + $0x8d4] sm:$0xf0] }
  0x8f   :  { %3453 = vmatpush.bf16.msra.mxu3 %v5516_v35  ;;  %v5253_v35 = vld [vmem:[%s10405_s1 + $0x654] sm:$0xf0]  ;;  %v6843_v50 = vld [vmem:[%s10405_s1 + $0x8c4] sm:$0xf]  ;;  %v6913_v54 = vld [vmem:[%s10405_s1 + $0xaf4] sm:$0xf] }
  0x90   :  { %3465 = vmatpush.bf16.msrb.mxu0 %v5696_v36  ;;  %v6803_v36 = vld [vmem:[%s10405_s1 + $0x784] sm:$0xf]  ;;  %v5256_v45 = vor.u32 %v6763_v32, %v5253_v35  ;;  %v6953_v57 = vld [vmem:[%s10405_s1 + $0xc34] sm:$0xf]  ;;  %v6013_v58 = vld [vmem:[%s10405_s1 + $0xc44] sm:$0xf0]  ;;  %v5576_v3 = vor.u32 %v6843_v50, %v5573_v53 }
  0x91   :  { %3428 = vmatpush.bf16.msra.mxu1 %v5176_v43  ;;  %v6033_v43 = vld [vmem:[%s10405_s1 + $0xc6c] sm:$0xf0]  ;;  %v7038_v62 = vld [vmem:[%s10405_s1 + $0xedc] sm:$0xf]  ;;  %v6016_v5 = vor.u32 %v6953_v57, %v6013_v58  ;;  %v6908_v7 = vld [vmem:[%s10405_s1 + $0xacc] sm:$0xf] }
  0x92   :  { %3441 = vmatpush.bf16.msra.mxu2 %v5336_v44  ;;  %v5096_v44 = vor.u32 %v6723_v30, %v5093_v31  ;;  %v6036_v52 = vor.u32 %v6958_v42, %v6033_v43  ;;  %v6353_v63 = vld [vmem:[%s10405_s1 + $0xeec] sm:$0xf0]  ;;  %v6948_v11 = vld [vmem:[%s10405_s1 + $0xc0c] sm:$0xf]  ;;  %v6153_v15 = vld [vmem:[%s10405_s1 + $0xd5c] sm:$0xf0] }
  0x93   :  { %3454 = vmatpush.bf16.msra.mxu3 %v5496_v47  ;;  %v6193_v47 = vld [vmem:[%s10405_s1 + $0xdac] sm:$0xf0]  ;;  %v6356_v10 = vor.u32 %v7038_v62, %v6353_v63  ;;  %v7033_v16 = vld [vmem:[%s10405_s1 + $0xeb4] sm:$0xf]  ;;  %v6333_v19 = vld [vmem:[%s10405_s1 + $0xec4] sm:$0xf0] }
  0x94   :  { %3466 = vmatpush.bf16.msrb.mxu0 %v5676_v48  ;;  %v5416_v48 = vor.u32 %v6803_v36, %v5413_v37  ;;  %v6903_v27 = vld [vmem:[%s10405_s1 + $0xaa4] sm:$0xf]  ;;  %v6336_v30 = vor.u32 %v7033_v16, %v6333_v19  ;;  %v5973_v32 = vld [vmem:[%s10405_s1 + $0xbf4] sm:$0xf0]  ;;  %v7028_v35 = vld [vmem:[%s10405_s1 + $0xe8c] sm:$0xf] }
  0x95   :  { %3429 = vmatpush.bf16.msra.mxu1 %v5156_v55  ;;  %v5853_v55 = vld [vmem:[%s10405_s1 + $0xb04] sm:$0xf0]  ;;  %v6943_v31 = vld [vmem:[%s10405_s1 + $0xbe4] sm:$0xf]  ;;  %v6313_v36 = vld [vmem:[%s10405_s1 + $0xe9c] sm:$0xf0] }
  0x96   :  { %3442 = vmatpush.bf16.msra.mxu2 %v5316_v56  ;;  %v6196_v56 = vor.u32 %v6998_v46, %v6193_v47  ;;  %v5856_v4 = vor.u32 %v6913_v54, %v5853_v55  ;;  %v5976_v38 = vor.u32 %v6943_v31, %v5973_v32  ;;  %v6898_v39 = vld [vmem:[%s10405_s1 + $0xa7c] sm:$0xf]  ;;  %v5793_v40 = vld [vmem:[%s10405_s1 + $0xa8c] sm:$0xf0]  ;;  %v6316_v43 = vor.u32 %v7028_v35, %v6313_v36  ;;  %v8295_v46 = vld [vmem:[%s10406_s2] sm:$0x1f] }
  0x97   :  { %3455 = vmatpush.bf16.msra.mxu3 %v5476_v59  ;;  %v6993_v59 = vld [vmem:[%s10405_s1 + $0xd74] sm:$0xf]  ;;  %v6938_v41 = vld [vmem:[%s10405_s1 + $0xbbc] sm:$0xf]  ;;  %v6113_v47 = vld [vmem:[%s10405_s1 + $0xd0c] sm:$0xf0]  ;;  %v5796_v50 = vor.u32 %v6898_v39, %v5793_v40 }
  0x98   :  { %3467 = vmatpush.bf16.msrb.mxu0 %v5656_v61  ;;  %v6173_v61 = vld [vmem:[%s10405_s1 + $0xd84] sm:$0xf0]  ;;  %v614_v54 = vperm.slane %v8295_v46, 0  ;;  %v6933_v57 = vld [vmem:[%s10405_s1 + $0xb94] sm:$0xf]  ;;  %s7130_s16 = smov [#allocation2]  }
  0x99   :  { %3430 = vmatpush.bf16.msra.mxu1 %v5136_v8  ;;  %v5833_v8 = vld [vmem:[%s10405_s1 + $0xadc] sm:$0xf0]  ;;  %v5773_v53 = vld [vmem:[%s10405_s1 + $0xa64] sm:$0xf0]  ;;  %v7018_v62 = vld [vmem:[%s10405_s1 + $0xe3c] sm:$0xf] }
  0x9a   :  { %3443 = vmatpush.bf16.msra.mxu2 %v5296_v9  ;;  %v6176_v9 = vor.u32 %v6993_v59, %v6173_v61  ;;  %v5836_v24 = vor.u32 %v6908_v7, %v5833_v8  ;;  %v5933_v58 = vld [vmem:[%s10405_s1 + $0xba4] sm:$0xf0]  ;;  %v6973_v59 = vld [vmem:[%s10405_s1 + $0xcd4] sm:$0xf]  ;;  %v6273_v63 = vld [vmem:[%s10405_s1 + $0xe4c] sm:$0xf0] }
  0x9b   :  { %3456 = vmatpush.bf16.msra.mxu3 %v5456_v12  ;;  %v5993_v12 = vld [vmem:[%s10405_s1 + $0xc1c] sm:$0xf0]  ;;  %v6093_v61 = vld [vmem:[%s10405_s1 + $0xce4] sm:$0xf0]  ;;  %v6888_v7 = vld [vmem:[%s10405_s1 + $0xa2c] sm:$0xf] }
  0x9c   :  { %3468 = vmatpush.bf16.msrb.mxu0 %v5636_v13  ;;  %v6988_v13 = vld [vmem:[%s10405_s1 + $0xd4c] sm:$0xf]  ;;  %v5996_v25 = vor.u32 %v6948_v11, %v5993_v12  ;;  %v5753_v8 = vld [vmem:[%s10405_s1 + $0xa3c] sm:$0xf0]  ;;  %v6096_v11 = vor.u32 %v6973_v59, %v6093_v61  ;;  %v6276_v12 = vor.u32 %v7018_v62, %v6273_v63  ;;  %v5733_v31 = vld [vmem:[%s10405_s1 + $0xa14] sm:$0xf0] }
  0x9d   :  { %3431 = vmatpush.bf16.msra.mxu1 %v5116_v28  ;;  %v5813_v28 = vld [vmem:[%s10405_s1 + $0xab4] sm:$0xf0]  ;;  %v6968_v16 = vld [vmem:[%s10405_s1 + $0xcac] sm:$0xf]  ;;  %v6073_v19 = vld [vmem:[%s10405_s1 + $0xcbc] sm:$0xf0] }
  0x9e   :  { %3444 = vmatpush.bf16.msra.mxu2 %v5276_v29  ;;  %v6156_v29 = vor.u32 %v6988_v13, %v6153_v15  ;;  %v5816_v37 = vor.u32 %v6903_v27, %v5813_v28  ;;  %v6928_v13 = vld [vmem:[%s10405_s1 + $0xb6c] sm:$0xf]  ;;  %v5913_v15 = vld [vmem:[%s10405_s1 + $0xb7c] sm:$0xf0]  ;;  %v5756_v28 = vor.u32 %v6888_v7, %v5753_v8  ;;  %v6923_v32 = vld [vmem:[%s10405_s1 + $0xb44] sm:$0xf] }
  0x9f   :  { %3457 = vmatpush.bf16.msra.mxu3 %v5436_v33  ;;  %v6983_v33 = vld [vmem:[%s10405_s1 + $0xd24] sm:$0xf]  ;;  %v5893_v36 = vld [vmem:[%s10405_s1 + $0xb54] sm:$0xf0]  ;;  %v6716_v8 = vld [vmem:[%s10405_s1 + $0x4c8] sm:$0xf0] }
  0xa0   :  { %3469 = vmatpush.bf16.msrb.mxu0 %v5616_v34  ;;  %v6133_v34 = vld [vmem:[%s10405_s1 + $0xd34] sm:$0xf0]  ;;  %v7043_v62 = vld [vmem:[%s10405_s1 + $0xf04] sm:$0xf]  ;;  %s4438_s17 = sshll.u32 %s7130_s16, 4  ;;  %s4440_s20 = sshll.u32 %s10409_s5, 4  ;;  %s4439_s17 = int_to_ptr.vmem [resolvable:$true] %s4438_s17  ;;  %s4441_s20 = int_to_ptr.hbm [resolvable:$true] %s4440_s20 }
  0xa1   :  { %3432 = vmatpush.bf16.msra.mxu1 %v5096_v44  ;;  %v6136_v42 = vor.u32 %v6983_v33, %v6133_v34  ;;  %v5953_v44 = vld [vmem:[%s10405_s1 + $0xbcc] sm:$0xf0]  ;;  %v6076_v34 = vor.u32 %v6968_v16, %v6073_v19  ;;  %v6213_v61 = vld [vmem:[%s10405_s1 + $0xdd4] sm:$0xf0]  ;;  %vm4431_vm3 = vcmask 74752  }
  0xa2   :  { %3445 = vmatpush.bf16.msra.mxu2 %v5256_v45  ;;  %v6978_v45 = vld [vmem:[%s10405_s1 + $0xcfc] sm:$0xf]  ;;  %v6373_v63 = vld [vmem:[%s10405_s1 + $0xf14] sm:$0xf0] }
  0xa3   :  { %3458 = vmatpush.bf16.msra.mxu3 %v5416_v48  ;;  %v7023_v48 = vld [vmem:[%s10405_s1 + $0xe64] sm:$0xf]  ;;  %v6116_v55 = vor.u32 %v6978_v45, %v6113_v47  ;;  %v4759_v45 = vld [vmem:[%s10405_s1 + $0x260] sm:$0xf]  ;;  %v6641_v47 = vld [vmem:[%s10405_s1 + $0x270] sm:$0xf0]  ;;  %v6376_v19 = vor.u32 %v7043_v62, %v6373_v63 }
  0xa4   :  { %3470 = vmatpush.bf16.msrb.mxu0 %v5596_v49  ;;  %3433 = vmatmul.bf16.vlgmr.msra.gmra.mxu1 %v7559_v0  ;;  %v6293_v49 = vld [vmem:[%s10405_s1 + $0xe74] sm:$0xf0]  ;;  %v4760_v59 = vor.u32 %v6641_v47, %v4759_v45  ;;  %v6671_v45 = vld [vmem:[%s10405_s1 + $0x360] sm:$0xf0]  ;;  %v6666_v62 = vld [vmem:[%s10405_s1 + $0x338] sm:$0xf0] }
  0xa5   :  { %3477 = vmatpush.bf16.msrb.mxu1 %v5876_v51  ;;  %3446 = vmatmul.bf16.vlgmr.msra.gmra.mxu2 %v7563_v2  ;;  %v5956_v51 = vor.u32 %v6938_v41, %v5953_v44  ;;  %v7008_v41 = vld [vmem:[%s10405_s1 + $0xdec] sm:$0xf]  ;;  %v6393_v44 = vld [vmem:[%s10405_s1 + $0xf3c] sm:$0xf0]  ;;  %v5059_v7 = vld [vmem:[%s10405_s1 + $0x4b8] sm:$0xf] }
  0xa6   :  { %3490 = vmatpush.bf16.msrb.mxu2 %v6036_v52  ;;  %3459 = vmatmul.bf16.vlgmr.msra.gmra.mxu3 %v7554_v60  ;;  %v6893_v52 = vld [vmem:[%s10405_s1 + $0xa54] sm:$0xf] }
  0xa7   :  { %3503 = vmatpush.bf16.msrb.mxu3 %v6196_v56  ;;  %v6296_v56 = vor.u32 %v7023_v48, %v6293_v49 }
  0xa8   :  { %3471 = vmatpush.bf16.msrb.mxu0 %v5576_v3  ;;  %v3213_v3 = vpop.f32.mrf.mxu0 }
  0xa9   :  { %3478 = vmatpush.bf16.msrb.mxu1 %v5856_v4  ;;  %v5776_v4 = vor.u32 %v6893_v52, %v5773_v53  ;;  %v5079_v52 = vld [vmem:[%s10405_s1 + $0x4e0] sm:$0xf]  ;;  %v6721_v53 = vld [vmem:[%s10405_s1 + $0x4f0] sm:$0xf0] }
  0xaa   :  { %3491 = vmatpush.bf16.msrb.mxu2 %v6016_v5  ;;  %v5936_v5 = vor.u32 %v6933_v57, %v5933_v58  ;;  %v3239_v33 = vpop.f32.mrf.mxu2  ;;  %v7003_v57 = vld [vmem:[%s10405_s1 + $0xdc4] sm:$0xf] }
  0xab   :  { %3504 = vmatpush.bf16.msrb.mxu3 %v6176_v9  ;;  %3472 = vmatmul.bf16.vlgmr.msrb.gmra.mxu0 %v7561_v1  ;;  %v3214_v9 = vadd.f32 %v3213_v3, %v614_v54  ;;  %v3252_v40 = vpop.f32.mrf.mxu3  ;;  %v5080_v3 = vor.u32 %v6721_v53, %v5079_v52 }
  0xac   :  { %3516 = vmatpush.bf16.msra.mxu0 %v6356_v10  ;;  %v3226_v10 = vpop.f32.mrf.mxu1 }
  0xad   :  { %3479 = vmatpush.bf16.msrb.mxu1 %v5836_v24  ;;  %v7013_v24 = vld [vmem:[%s10405_s1 + $0xe14] sm:$0xf]  ;;  %v3227_v27 = vadd.f32 %v3226_v10, %v3214_v9  ;;  %v4599_v9 = vld [vmem:[%s10405_s1 + $0x120] sm:$0xf] }
  0xae   :  { %3492 = vmatpush.bf16.msrb.mxu2 %v5996_v25  ;;  %v6253_v25 = vld [vmem:[%s10405_s1 + $0xe24] sm:$0xf0]  ;;  %v6601_v10 = vld [vmem:[%s10405_s1 + $0x130] sm:$0xf0] }
  0xaf   :  { %3505 = vmatpush.bf16.msrb.mxu3 %v6156_v29  ;;  %v5916_v29 = vor.u32 %v6928_v13, %v5913_v15  ;;  %v6256_v35 = vor.u32 %v7013_v24, %v6253_v25  ;;  %v3240_v39 = vadd.f32 %v3239_v33, %v3227_v27  ;;  %v4919_v13 = vld [vmem:[%s10405_s1 + $0x3a0] sm:$0xf]  ;;  %v6681_v15 = vld [vmem:[%s10405_s1 + $0x3b0] sm:$0xf0]  ;;  %v5060_v25 = vor.u32 %v6716_v8, %v5059_v7  ;;  %v6596_v33 = vld [vmem:[%s10405_s1 + $0x108] sm:$0xf0] }
  0xb0   :  { %3517 = vmatpush.bf16.msra.mxu0 %v6336_v30  ;;  %v6883_v30 = vld [vmem:[%s10405_s1 + $0xa04] sm:$0xf]  ;;  %v3215_v49 = vpop.f32.mrf.mxu0  ;;  %v4600_v27 = vor.u32 %v6601_v10, %v4599_v9  ;;  %v4659_v7 = vld [vmem:[%s10405_s1 + $0x198] sm:$0xf]  ;;  %v6616_v8 = vld [vmem:[%s10405_s1 + $0x1a8] sm:$0xf0] }
  0xb1   :  { %3480 = vmatpush.bf16.msrb.mxu1 %v5816_v37  ;;  %v6963_v37 = vld [vmem:[%s10405_s1 + $0xc84] sm:$0xf]  ;;  %v8391_v48 = vadd.f32 %v3252_v40, %v3240_v39  ;;  %v5019_v39 = vld [vmem:[%s10405_s1 + $0x468] sm:$0xf]  ;;  %v4979_v9 = vld [vmem:[%s10405_s1 + $0x418] sm:$0xf] }
  0xb2   :  { %3493 = vmatpush.bf16.msrb.mxu2 %v5976_v38  ;;  %v6053_v38 = vld [vmem:[%s10405_s1 + $0xc94] sm:$0xf0] }
  0xb3   :  { %3506 = vmatpush.bf16.msrb.mxu3 %v6136_v42  ;;  %v6233_v42 = vld [vmem:[%s10405_s1 + $0xdfc] sm:$0xf0]  ;;  %v3254_v16 = vpop.f32.mrf.mxu3 }
  0xb4   :  { %3518 = vmatpush.bf16.msra.mxu0 %v6316_v43  ;;  %v7048_v43 = vld [vmem:[%s10405_s1 + $0xf2c] sm:$0xf]  ;;  %v3228_v54 = vpop.f32.mrf.mxu1  ;;  %v6581_v16 = vld [vmem:[%s10405_s1 + $0x90] sm:$0xf0] }
  0xb5   :  { %3481 = vmatpush.bf16.msrb.mxu1 %v5796_v50  ;;  %v5736_v50 = vor.u32 %v6883_v30, %v5733_v31  ;;  %v6396_v58 = vor.u32 %v7048_v43, %v6393_v44  ;;  %v5039_v30 = vld [vmem:[%s10405_s1 + $0x490] sm:$0xf]  ;;  %v4920_v31 = vor.u32 %v6681_v15, %v4919_v13  ;;  %v6591_v43 = vld [vmem:[%s10405_s1 + $0xe0] sm:$0xf0]  ;;  %v6621_v54 = vld [vmem:[%s10405_s1 + $0x1d0] sm:$0xf0] }
  0xb6   :  { %3494 = vmatpush.bf16.msrb.mxu2 %v5956_v51  ;;  %v5896_v51 = vor.u32 %v6923_v32, %v5893_v36  ;;  %v4579_v32 = vld [vmem:[%s10405_s1 + $0xf8] sm:$0xf]  ;;  %v4879_v44 = vld [vmem:[%s10405_s1 + $0x350] sm:$0xf]  ;;  %v6696_v13 = vld [vmem:[%s10405_s1 + $0x428] sm:$0xf0] }
  0xb7   :  { %3507 = vmatpush.bf16.msrb.mxu3 %v6116_v55  ;;  %v6056_v55 = vor.u32 %v6963_v37, %v6053_v38  ;;  %v4580_v36 = vor.u32 %v6596_v33, %v4579_v32  ;;  %v4699_v37 = vld [vmem:[%s10405_s1 + $0x1e8] sm:$0xf]  ;;  %v6626_v38 = vld [vmem:[%s10405_s1 + $0x1f8] sm:$0xf0]  ;;  %v4519_v15 = vld [vmem:[%s10405_s1 + $0x80] sm:$0xf] }
  0xb8   :  { %3519 = vmatpush.bf16.msra.mxu0 %v6296_v56  ;;  %v6236_v56 = vor.u32 %v7008_v41, %v6233_v42  ;;  %v6706_v41 = vld [vmem:[%s10405_s1 + $0x478] sm:$0xf0]  ;;  %v4559_v42 = vld [vmem:[%s10405_s1 + $0xd0] sm:$0xf]  ;;  %v4700_v49 = vor.u32 %v6626_v38, %v4699_v37  ;;  %v6611_v32 = vld [vmem:[%s10405_s1 + $0x180] sm:$0xf0] }
  0xb9   :  { %3482 = vmatpush.bf16.msrb.mxu1 %v5776_v4  ;;  %v4739_v4 = vld [vmem:[%s10405_s1 + $0x238] sm:$0xf]  ;;  %v5020_v52 = vor.u32 %v6706_v41, %v5019_v39  ;;  %v4560_v53 = vor.u32 %v6591_v43, %v4559_v42  ;;  %v4959_v33 = vld [vmem:[%s10405_s1 + $0x3f0] sm:$0xf]  ;;  %v4619_v38 = vld [vmem:[%s10405_s1 + $0x148] sm:$0xf] }
  0xba   :  { %3495 = vmatpush.bf16.msrb.mxu2 %v5936_v5  ;;  %v6636_v5 = vld [vmem:[%s10405_s1 + $0x248] sm:$0xf0]  ;;  %v6606_v42 = vld [vmem:[%s10405_s1 + $0x158] sm:$0xf0]  ;;  %v4939_v43 = vld [vmem:[%s10405_s1 + $0x3c8] sm:$0xf] }
  0xbb   :  { %3508 = vmatpush.bf16.msrb.mxu3 %v6096_v11  ;;  %v3241_v11 = vpop.f32.mrf.mxu2  ;;  %v4740_v24 = vor.u32 %v6636_v5, %v4739_v4 }
  0xbc   :  { %3520 = vmatpush.bf16.msra.mxu0 %v6276_v12  ;;  %v6216_v12 = vor.u32 %v7003_v57, %v6213_v61  ;;  %v4539_v57 = vld [vmem:[%s10405_s1 + $0xa8] sm:$0xf] }
  0xbd   :  { %3483 = vmatpush.bf16.msrb.mxu1 %v5756_v28  ;;  %v4719_v28 = vld [vmem:[%s10405_s1 + $0x210] sm:$0xf]  ;;  %v4859_v61 = vld [vmem:[%s10405_s1 + $0x328] sm:$0xf] }
  0xbe   :  { %3496 = vmatpush.bf16.msrb.mxu2 %v5916_v29  ;;  %v6631_v29 = vld [vmem:[%s10405_s1 + $0x220] sm:$0xf0] }
  0xbf   :  { %3509 = vmatpush.bf16.msrb.mxu3 %v6076_v34  ;;  %v4720_v34 = vor.u32 %v6631_v29, %v4719_v28  ;;  %v4660_v28 = vor.u32 %v6616_v8, %v4659_v7  ;;  %v6796_v7 = vld [vmem:[%s10405_s1 + $0x748] sm:$0xf0]  ;;  %v5699_v8 = vld [vmem:[%s10405_s1 + $0x9b8] sm:$0xf] }
  0xc0   :  { %3521 = vmatpush.bf16.msra.mxu0 %v6256_v35  ;;  %v3265_v47 = vpop.f32.mrf.mxu0 }
  0xc1   :  { %3484 = vmatpush.bf16.msrb.mxu1 %v5736_v50  ;;  %v3266_v50 = vadd.f32 %v3265_v47, %v8391_v48  ;;  %v6701_v48 = vld [vmem:[%s10405_s1 + $0x450] sm:$0xf0] }
  0xc2   :  { %3497 = vmatpush.bf16.msrb.mxu2 %v5896_v51  ;;  %v3278_v51 = vpop.f32.mrf.mxu1 }
  0xc3   :  { %3510 = vmatpush.bf16.msrb.mxu3 %v6056_v55  ;;  %v4999_v55 = vld [vmem:[%s10405_s1 + $0x440] sm:$0xf] }
  0xc4   :  { %3522 = vmatpush.bf16.msra.mxu0 %v6236_v56  ;;  %3485 = vmatmul.bf16.vlgmr.msrb.gmra.mxu1 %v7794_v6  ;;  %v4899_v6 = vld [vmem:[%s10405_s1 + $0x378] sm:$0xf]  ;;  %v4880_v56 = vor.u32 %v6671_v45, %v4879_v44  ;;  %v5000_v4 = vor.u32 %v6701_v48, %v4999_v55  ;;  %v6686_v44 = vld [vmem:[%s10405_s1 + $0x3d8] sm:$0xf0]  ;;  %v5719_v55 = vld [vmem:[%s10405_s1 + $0x9e0] sm:$0xf] }
  0xc5   :  { %3581 = vmatpush.bf16.msra.mxu1 %v5080_v3  ;;  %3498 = vmatmul.bf16.vlgmr.msrb.gmra.mxu2 %v7825_v18  ;;  %v6711_v18 = vld [vmem:[%s10405_s1 + $0x4a0] sm:$0xf0]  ;;  %v4940_v48 = vor.u32 %v6686_v44, %v4939_v43 }
  0xc6   :  { %3535 = vmatpush.bf16.msra.mxu2 %v6396_v58  ;;  %3511 = vmatmul.bf16.vlgmr.msrb.gmra.mxu3 %v7823_v17  ;;  %v6676_v17 = vld [vmem:[%s10405_s1 + $0x388] sm:$0xf0]  ;;  %v5040_v35 = vor.u32 %v6711_v18, %v5039_v30  ;;  %v6586_v58 = vld [vmem:[%s10405_s1 + $0xb8] sm:$0xf0]  ;;  %v4980_v30 = vor.u32 %v6696_v13, %v4979_v9  ;;  %v4639_v18 = vld [vmem:[%s10405_s1 + $0x170] sm:$0xf] }
  0xc7   :  { %3555 = vmatpush.bf16.msra.mxu3 %v4760_v59  ;;  %v4900_v40 = vor.u32 %v6676_v17, %v4899_v6  ;;  %v3279_v59 = vadd.f32 %v3278_v51, %v3266_v50  ;;  %v4540_v5 = vor.u32 %v6586_v58, %v4539_v57  ;;  %v6691_v17 = vld [vmem:[%s10405_s1 + $0x400] sm:$0xf0]  ;;  %v4640_v37 = vor.u32 %v6611_v32, %v4639_v18  ;;  %v4799_v51 = vld [vmem:[%s10405_s1 + $0x2b0] sm:$0xf]  ;;  %v4459_v58 = vld [vmem:[%s10405_s1 + $0x8] sm:$0xf] }
  0xc8   :  { %3523 = vmatpush.bf16.msra.mxu0 %v6216_v12  ;;  %v3291_v3 = vpop.f32.mrf.mxu2  ;;  %v4860_v12 = vor.u32 %v6666_v62, %v4859_v61  ;;  %v6571_v50 = vld [vmem:[%s10405_s1 + $0x40] sm:$0xf0]  ;;  %v6566_v62 = vld [vmem:[%s10405_s1 + $0x18] sm:$0xf0]  ;;  %v6876_v9 = vld [vmem:[%s10405_s1 + $0x9c8] sm:$0xf0] }
  0xc9   :  { %3582 = vmatpush.bf16.msra.mxu1 %v5060_v25  ;;  %v3292_v10 = vadd.f32 %v3291_v3, %v3279_v59  ;;  %v3304_v11 = vpop.f32.mrf.mxu3  ;;  %v6646_v3 = vld [vmem:[%s10405_s1 + $0x298] sm:$0xf0]  ;;  %v5559_v13 = vld [vmem:[%s10405_s1 + $0x8a0] sm:$0xf]  ;;  %v6871_v18 = vld [vmem:[%s10405_s1 + $0x9a0] sm:$0xf0] }
  0xca   :  { %3536 = vmatpush.bf16.msra.mxu2 %v6376_v19  ;;  %v4839_v19 = vld [vmem:[%s10405_s1 + $0x300] sm:$0xf]  ;;  %v3280_v29 = vpop.f32.mrf.mxu1  ;;  %v5219_v32 = vld [vmem:[%s10405_s1 + $0x5f8] sm:$0xf]  ;;  %v6751_v43 = vld [vmem:[%s10405_s1 + $0x5e0] sm:$0xf0] }
  0xcb   :  { %3556 = vmatpush.bf16.msra.mxu3 %v4740_v24  ;;  %3524 = vmatmul.bf16.vlgmr.msra.gmra.mxu0 %v7827_v23  ;;  %v4679_v23 = vld [vmem:[%s10405_s1 + $0x1c0] sm:$0xf]  ;;  %v6661_v24 = vld [vmem:[%s10405_s1 + $0x310] sm:$0xf0]  ;;  %v8536_v25 = vadd.f32 %v3304_v11, %v3292_v10  ;;  %v6791_v29 = vld [vmem:[%s10405_s1 + $0x720] sm:$0xf0] }
  0xcc   :  { %3568 = vmatpush.bf16.msrb.mxu0 %v4920_v31  ;;  %v4680_v63 = vor.u32 %v6621_v54, %v4679_v23  ;;  %v4520_v31 = vor.u32 %v6581_v16, %v4519_v15  ;;  %v4840_v6 = vor.u32 %v6661_v24, %v4839_v19  ;;  %v6801_v23 = vld [vmem:[%s10405_s1 + $0x770] sm:$0xf0]  ;;  %v4620_v54 = vor.u32 %v6606_v42, %v4619_v38  ;;  %v5239_v10 = vld [vmem:[%s10405_s1 + $0x620] sm:$0xf]  ;;  %v5659_v38 = vld [vmem:[%s10405_s1 + $0x968] sm:$0xf] }
  0xcd   :  { %3583 = vmatpush.bf16.msra.mxu1 %v5040_v35  ;;  %v6576_v35 = vld [vmem:[%s10405_s1 + $0x68] sm:$0xf0]  ;;  %v6761_v11 = vld [vmem:[%s10405_s1 + $0x630] sm:$0xf0]  ;;  %v5700_v24 = vor.u32 %v6876_v9, %v5699_v8  ;;  %v5199_v42 = vld [vmem:[%s10405_s1 + $0x5d0] sm:$0xf] }
  0xce   :  { %3542 = vmatpush.bf16.msrb.mxu2 %v4600_v27  ;;  %v3267_v27 = vpop.f32.mrf.mxu0  ;;  %v6841_v15 = vld [vmem:[%s10405_s1 + $0x8b0] sm:$0xf0] }
  0xcf   :  { %3557 = vmatpush.bf16.msra.mxu3 %v4720_v34  ;;  %v4499_v34 = vld [vmem:[%s10405_s1 + $0x58] sm:$0xf]  ;;  %v5240_v27 = vor.u32 %v6761_v11, %v5239_v10 }
  0xd0   :  { %3569 = vmatpush.bf16.msrb.mxu0 %v4900_v40  ;;  %v3293_v39 = vpop.f32.mrf.mxu2  ;;  %v4960_v40 = vor.u32 %v6691_v17, %v4959_v33  ;;  %v4500_v41 = vor.u32 %v6576_v35, %v4499_v34  ;;  %v6756_v33 = vld [vmem:[%s10405_s1 + $0x608] sm:$0xf0] }
  0xd1   :  { %3584 = vmatpush.bf16.msra.mxu1 %v5020_v52  ;;  %v3306_v45 = vpop.f32.mrf.mxu3  ;;  %v6651_v52 = vld [vmem:[%s10405_s1 + $0x2c0] sm:$0xf0]  ;;  %v6836_v17 = vld [vmem:[%s10405_s1 + $0x888] sm:$0xf0] }
  0xd2   :  { %3543 = vmatpush.bf16.msrb.mxu2 %v4580_v36  ;;  %v4819_v36 = vld [vmem:[%s10405_s1 + $0x2d8] sm:$0xf]  ;;  %v4800_v59 = vor.u32 %v6651_v52, %v4799_v51 }
  0xd3   :  { %3558 = vmatpush.bf16.msra.mxu3 %v4700_v49  ;;  %v4479_v49 = vld [vmem:[%s10405_s1 + $0x30] sm:$0xf] }
  0xd4   :  { %3570 = vmatpush.bf16.msrb.mxu0 %v4880_v56  ;;  %v6881_v56 = vld [vmem:[%s10405_s1 + $0x9f0] sm:$0xf0]  ;;  %v4480_v57 = vor.u32 %v6571_v50, %v4479_v49  ;;  %v6831_v49 = vld [vmem:[%s10405_s1 + $0x860] sm:$0xf0] }
  0xd5   :  { %3585 = vmatpush.bf16.msra.mxu1 %v5000_v4  ;;  %6410 = vmatmul.msk.bf16.vlgmr.msra.gmra.mxu2 %vm3201_vm0, %v7929_v14  ;;  %v6656_v14 = vld [vmem:[%s10405_s1 + $0x2e8] sm:$0xf0]  ;;  %v5720_v4 = vor.u32 %v6881_v56, %v5719_v55  ;;  %v6861_v56 = vld [vmem:[%s10405_s1 + $0x950] sm:$0xf0] }
  0xd6   :  { %3544 = vmatpush.bf16.msrb.mxu2 %v4560_v53  ;;  %v4820_v47 = vor.u32 %v6656_v14, %v4819_v36  ;;  %v5399_v53 = vld [vmem:[%s10405_s1 + $0x760] sm:$0xf]  ;;  %v5220_v36 = vor.u32 %v6756_v33, %v5219_v32  ;;  %v5339_v14 = vld [vmem:[%s10405_s1 + $0x6e8] sm:$0xf]  ;;  %v5599_v32 = vld [vmem:[%s10405_s1 + $0x8f0] sm:$0xf] }
  0xd7   :  { %3559 = vmatpush.bf16.msra.mxu3 %v4680_v63  ;;  %v5400_v61 = vor.u32 %v6801_v23, %v5399_v53  ;;  %v4779_v63 = vld [vmem:[%s10405_s1 + $0x288] sm:$0xf]  ;;  %v5200_v53 = vor.u32 %v6751_v43, %v5199_v42  ;;  %v6781_v23 = vld [vmem:[%s10405_s1 + $0x6d0] sm:$0xf0]  ;;  %v6846_v42 = vld [vmem:[%s10405_s1 + $0x8d8] sm:$0xf0] }
  0xd8   :  { %3571 = vmatpush.bf16.msrb.mxu0 %v4860_v12  ;;  %v4460_v12 = vor.u32 %v6566_v62, %v4459_v58  ;;  %v4780_v16 = vor.u32 %v6646_v3, %v4779_v63  ;;  %v5499_v58 = vld [vmem:[%s10405_s1 + $0x828] sm:$0xf] }
  0xd9   :  { %3586 = vmatpush.bf16.msra.mxu1 %v4980_v30  ;;  %v5679_v30 = vld [vmem:[%s10405_s1 + $0x990] sm:$0xf] }
  0xda   :  { %3545 = vmatpush.bf16.msrb.mxu2 %v4540_v5  ;;  %v5379_v5 = vld [vmem:[%s10405_s1 + $0x738] sm:$0xf]  ;;  %v5680_v35 = vor.u32 %v6871_v18, %v5679_v30  ;;  %v6771_v18 = vld [vmem:[%s10405_s1 + $0x680] sm:$0xf0] }
  0xdb   :  { %3560 = vmatpush.bf16.msra.mxu3 %v4660_v28  ;;  %v5380_v19 = vor.u32 %v6796_v7, %v5379_v5  ;;  %v5359_v28 = vld [vmem:[%s10405_s1 + $0x710] sm:$0xf]  ;;  %v6776_v5 = vld [vmem:[%s10405_s1 + $0x6a8] sm:$0xf0]  ;;  %v5619_v7 = vld [vmem:[%s10405_s1 + $0x918] sm:$0xf] }
  0xdc   :  { %3572 = vmatpush.bf16.msrb.mxu0 %v4840_v6  ;;  %v5539_v6 = vld [vmem:[%s10405_s1 + $0x878] sm:$0xf]  ;;  %v5360_v34 = vor.u32 %v6791_v29, %v5359_v28 }
  0xdd   :  { %3587 = vmatpush.bf16.msra.mxu1 %v4960_v40  ;;  %v5540_v39 = vor.u32 %v6836_v17, %v5539_v6  ;;  %v6851_v6 = vld [vmem:[%s10405_s1 + $0x900] sm:$0xf0]  ;;  %v5139_v17 = vld [vmem:[%s10405_s1 + $0x558] sm:$0xf] }
  0xde   :  { %3546 = vmatpush.bf16.msrb.mxu2 %v4520_v31  ;;  %v5560_v31 = vor.u32 %v6841_v15, %v5559_v13  ;;  %v5159_v13 = vld [vmem:[%s10405_s1 + $0x580] sm:$0xf]  ;;  %v6741_v15 = vld [vmem:[%s10405_s1 + $0x590] sm:$0xf0] }
  0xdf   :  { %3561 = vmatpush.bf16.msra.mxu3 %v4640_v37  ;;  %v6786_v37 = vld [vmem:[%s10405_s1 + $0x6f8] sm:$0xf0]  ;;  %v5160_v30 = vor.u32 %v6741_v15, %v5159_v13  ;;  %v6199_v13 = vld [vmem:[%s10405_s1 + $0xda0] sm:$0xf]  ;;  %v7001_v15 = vld [vmem:[%s10405_s1 + $0xdb0] sm:$0xf0] }
  0xe0   :  { %3573 = vmatpush.bf16.msrb.mxu0 %v4820_v47  ;;  %v3317_v40 = vpop.f32.mrf.mxu0  ;;  %v5519_v47 = vld [vmem:[%s10405_s1 + $0x850] sm:$0xf]  ;;  %v5340_v50 = vor.u32 %v6786_v37, %v5339_v14  ;;  %v5259_v37 = vld [vmem:[%s10405_s1 + $0x648] sm:$0xf] }
  0xe1   :  { %3588 = vmatpush.bf16.msra.mxu1 %v4940_v48  ;;  %v3318_v44 = vadd.f32 %v3317_v40, %v8536_v25  ;;  %v3330_v45 = vpop.f32.mrf.mxu1  ;;  %v5319_v25 = vld [vmem:[%s10405_s1 + $0x6c0] sm:$0xf]  ;;  %v5520_v55 = vor.u32 %v6831_v49, %v5519_v47  ;;  %v5179_v48 = vld [vmem:[%s10405_s1 + $0x5a8] sm:$0xf]  ;;  %v6766_v40 = vld [vmem:[%s10405_s1 + $0x658] sm:$0xf0] }
  0xe2   :  { %3547 = vmatpush.bf16.msrb.mxu2 %v4500_v41  ;;  %v6866_v41 = vld [vmem:[%s10405_s1 + $0x978] sm:$0xf0]  ;;  %v6731_v47 = vld [vmem:[%s10405_s1 + $0x540] sm:$0xf0]  ;;  %v5439_v49 = vld [vmem:[%s10405_s1 + $0x7b0] sm:$0xf] }
  0xe3   :  { %3562 = vmatpush.bf16.msra.mxu3 %v4620_v54  ;;  %v5660_v51 = vor.u32 %v6866_v41, %v5659_v38  ;;  %v3331_v52 = vadd.f32 %v3330_v45, %v3318_v44  ;;  %v5639_v54 = vld [vmem:[%s10405_s1 + $0x940] sm:$0xf]  ;;  %v5600_v38 = vor.u32 %v6851_v6, %v5599_v32  ;;  %v5579_v41 = vld [vmem:[%s10405_s1 + $0x8c8] sm:$0xf]  ;;  %v5119_v45 = vld [vmem:[%s10405_s1 + $0x530] sm:$0xf] }
  0xe4   :  { %3574 = vmatpush.bf16.msrb.mxu0 %v4800_v59  ;;  %3589 = vmatmul.bf16.vlgmr.msra.gmra.mxu1 %v7468_v22  ;;  %v6826_v59 = vld [vmem:[%s10405_s1 + $0x838] sm:$0xf0]  ;;  %v5640_v62 = vor.u32 %v6861_v56, %v5639_v54  ;;  %v5260_v54 = vor.u32 %v6766_v40, %v5259_v37  ;;  %v7041_v56 = vld [vmem:[%s10405_s1 + $0xef0] sm:$0xf0]  ;;  %v7031_v32 = vld [vmem:[%s10405_s1 + $0xea0] sm:$0xf0] }
  0xe5   :  { %3633 = vmatpush.bf16.msrb.mxu1 %v5720_v4  ;;  %v5299_v4 = vld [vmem:[%s10405_s1 + $0x698] sm:$0xf]  ;;  %v5500_v9 = vor.u32 %v6826_v59, %v5499_v58  ;;  %v5099_v58 = vld [vmem:[%s10405_s1 + $0x508] sm:$0xf]  ;;  %v6916_v6 = vld [vmem:[%s10405_s1 + $0xb08] sm:$0xf0] }
  0xe6   :  { %3548 = vmatpush.bf16.msrb.mxu2 %v4480_v57  ;;  %3563 = vmatmul.bf16.vlgmr.msra.gmra.mxu3 %v7477_v26  ;;  %v6746_v57 = vld [vmem:[%s10405_s1 + $0x5b8] sm:$0xf0]  ;;  %v5300_v28 = vor.u32 %v6776_v5, %v5299_v4  ;;  %v6019_v5 = vld [vmem:[%s10405_s1 + $0xc38] sm:$0xf]  ;;  %v615_v40 = vperm.slane %v8295_v46, 1 }
  0xe7   :  { %3607 = vmatpush.bf16.msrb.mxu3 %v5400_v61  ;;  %v5320_v61 = vor.u32 %v6781_v23, %v5319_v25  ;;  %v5180_v3 = vor.u32 %v6746_v57, %v5179_v48  ;;  %v6961_v25 = vld [vmem:[%s10405_s1 + $0xc70] sm:$0xf0]  ;;  %v5580_v48 = vor.u32 %v6846_v42, %v5579_v41  ;;  %v5120_v57 = vor.u32 %v6731_v47, %v5119_v45  ;;  %v7026_v42 = vld [vmem:[%s10405_s1 + $0xe78] sm:$0xf0]  ;;  %v6159_v46 = vld [vmem:[%s10405_s1 + $0xd50] sm:$0xf] }
  0xe8   :  { %3575 = vmatpush.bf16.msrb.mxu0 %v4780_v16  ;;  %v3343_v63 = vpop.f32.mrf.mxu2  ;;  %v3319_v10 = vpop.f32.mrf.mxu0  ;;  %v5479_v16 = vld [vmem:[%s10405_s1 + $0x800] sm:$0xf]  ;;  %v6991_v45 = vld [vmem:[%s10405_s1 + $0xd60] sm:$0xf0] }
  0xe9   :  { %3634 = vmatpush.bf16.msrb.mxu1 %v5700_v24  ;;  %v3344_v8 = vadd.f32 %v3343_v63, %v3331_v52  ;;  %v3356_v11 = vpop.f32.mrf.mxu3  ;;  %v3332_v24 = vpop.f32.mrf.mxu1  ;;  %v6811_v52 = vld [vmem:[%s10405_s1 + $0x7c0] sm:$0xf0]  ;;  %v5419_v63 = vld [vmem:[%s10405_s1 + $0x788] sm:$0xf]  ;;  %v5879_v10 = vld [vmem:[%s10405_s1 + $0xb20] sm:$0xf] }
  0xea   :  { %3549 = vmatpush.bf16.msrb.mxu2 %v4460_v12  ;;  %v6856_v12 = vld [vmem:[%s10405_s1 + $0x928] sm:$0xf0]  ;;  %v5440_v59 = vor.u32 %v6811_v52, %v5439_v49  ;;  %v5959_v52 = vld [vmem:[%s10405_s1 + $0xbc0] sm:$0xf] }
  0xeb   :  { %3608 = vmatpush.bf16.msrb.mxu3 %v5380_v19  ;;  %3576 = vmatmul.bf16.vlgmr.msrb.gmra.mxu0 %v7464_v20  ;;  %v6821_v19 = vld [vmem:[%s10405_s1 + $0x810] sm:$0xf0]  ;;  %v5620_v29 = vor.u32 %v6856_v12, %v5619_v7  ;;  %v6956_v7 = vld [vmem:[%s10405_s1 + $0xc48] sm:$0xf0] }
  0xec   :  { %3620 = vmatpush.bf16.msra.mxu0 %v5560_v31  ;;  %v5279_v31 = vld [vmem:[%s10405_s1 + $0x670] sm:$0xf]  ;;  %v5480_v33 = vor.u32 %v6821_v19, %v5479_v16  ;;  %v6020_v19 = vor.u32 %v6956_v7, %v6019_v5  ;;  %v5939_v5 = vld [vmem:[%s10405_s1 + $0xb98] sm:$0xf]  ;;  %v6936_v7 = vld [vmem:[%s10405_s1 + $0xba8] sm:$0xf0] }
  0xed   :  { %3550 = vmatmul.bf16.vlgmr.msrb.gmra.mxu2 %v7466_v21  ;;  %3635 = vmatpush.bf16.msrb.mxu1 %v5680_v35  ;;  %v5459_v35 = vld [vmem:[%s10405_s1 + $0x7d8] sm:$0xf]  ;;  %v5280_v14 = vor.u32 %v6771_v18, %v5279_v31  ;;  %v6200_v18 = vor.u32 %v7001_v15, %v6199_v13  ;;  %v5799_v13 = vld [vmem:[%s10405_s1 + $0xa80] sm:$0xf]  ;;  %v6901_v15 = vld [vmem:[%s10405_s1 + $0xa90] sm:$0xf0] }
  0xee   :  { %3594 = vmatpush.bf16.msra.mxu2 %v5240_v27  ;;  %v3357_v27 = vadd.f32 %v3356_v11, %v3344_v8  ;;  %v6339_v8 = vld [vmem:[%s10405_s1 + $0xeb8] sm:$0xf]  ;;  %v6921_v11 = vld [vmem:[%s10405_s1 + $0xb30] sm:$0xf0] }
  0xef   :  { %3609 = vmatpush.bf16.msrb.mxu3 %v5360_v34  ;;  %v6736_v34 = vld [vmem:[%s10405_s1 + $0x568] sm:$0xf0] }
  0xf0   :  { %3621 = vmatpush.bf16.msra.mxu0 %v5540_v39  ;;  %v5140_v39 = vor.u32 %v6736_v34, %v5139_v17  ;;  %v3345_v43 = vpop.f32.mrf.mxu2  ;;  %v6179_v17 = vld [vmem:[%s10405_s1 + $0xd78] sm:$0xf]  ;;  %v6996_v34 = vld [vmem:[%s10405_s1 + $0xd88] sm:$0xf0] }
  0xf1   :  { %3636 = vmatpush.bf16.msrb.mxu1 %v5660_v51  ;;  %v6180_v41 = vor.u32 %v6996_v34, %v6179_v17  ;;  %v5839_v43 = vld [vmem:[%s10405_s1 + $0xad0] sm:$0xf]  ;;  %v7011_v17 = vld [vmem:[%s10405_s1 + $0xe00] sm:$0xf0]  ;;  %v5779_v34 = vld [vmem:[%s10405_s1 + $0xa58] sm:$0xf] }
  0xf2   :  { %3595 = vmatpush.bf16.msra.mxu2 %v5220_v36  ;;  %v6816_v36 = vld [vmem:[%s10405_s1 + $0x7e8] sm:$0xf0]  ;;  %v3369_v51 = vpop.f32.mrf.mxu0 }
  0xf3   :  { %3610 = vmatpush.bf16.msrb.mxu3 %v5340_v50  ;;  %v5460_v44 = vor.u32 %v6816_v36, %v5459_v35  ;;  %v3358_v50 = vpop.f32.mrf.mxu3  ;;  %v8791_v23 = vadd.f32 %v3369_v51, %v3357_v27  ;;  %v5880_v27 = vor.u32 %v6921_v11, %v5879_v10  ;;  %v5979_v36 = vld [vmem:[%s10405_s1 + $0xbe8] sm:$0xf] }
  0xf4   :  { %3622 = vmatpush.bf16.msra.mxu0 %v5520_v55  ;;  %v6359_v55 = vld [vmem:[%s10405_s1 + $0xee0] sm:$0xf] }
  0xf5   :  { %3637 = vmatpush.bf16.msrb.mxu1 %v5640_v62  ;;  %v6726_v62 = vld [vmem:[%s10405_s1 + $0x518] sm:$0xf0]  ;;  %v6360_v4 = vor.u32 %v7041_v56, %v6359_v55  ;;  %v6160_v55 = vor.u32 %v6991_v45, %v6159_v46  ;;  %v7021_v56 = vld [vmem:[%s10405_s1 + $0xe50] sm:$0xf0] }
  0xf6   :  { %3596 = vmatpush.bf16.msra.mxu2 %v5200_v53  ;;  %v6039_v53 = vld [vmem:[%s10405_s1 + $0xc60] sm:$0xf]  ;;  %v5100_v12 = vor.u32 %v6726_v62, %v5099_v58  ;;  %v6139_v58 = vld [vmem:[%s10405_s1 + $0xd28] sm:$0xf]  ;;  %v7006_v46 = vld [vmem:[%s10405_s1 + $0xdd8] sm:$0xf0] }
  0xf7   :  { %3611 = vmatpush.bf16.msrb.mxu3 %v5320_v61  ;;  %v6040_v61 = vor.u32 %v6961_v25, %v6039_v53  ;;  %v6941_v53 = vld [vmem:[%s10405_s1 + $0xbd0] sm:$0xf0]  ;;  %v6279_v25 = vld [vmem:[%s10405_s1 + $0xe40] sm:$0xf] }
  0xf8   :  { %3623 = vmatpush.bf16.msra.mxu0 %v5500_v9  ;;  %v7036_v9 = vld [vmem:[%s10405_s1 + $0xec8] sm:$0xf0]  ;;  %v5960_v62 = vor.u32 %v6941_v53, %v5959_v52  ;;  %v6971_v52 = vld [vmem:[%s10405_s1 + $0xcc0] sm:$0xf0] }
  0xf9   :  { %3638 = vmatpush.bf16.msrb.mxu1 %v5620_v29  ;;  %v6340_v24 = vor.u32 %v7036_v9, %v6339_v8  ;;  %v6951_v29 = vld [vmem:[%s10405_s1 + $0xc20] sm:$0xf0]  ;;  %v6259_v8 = vld [vmem:[%s10405_s1 + $0xe18] sm:$0xf] }
  0xfa   :  { %3597 = vmatpush.bf16.msra.mxu2 %v5180_v3  ;;  %v6806_v3 = vld [vmem:[%s10405_s1 + $0x798] sm:$0xf0]  ;;  %v3371_v31 = vpop.f32.mrf.mxu0  ;;  %v6599_v53 = vld [vmem:[%s10405_s1 + $0x124] sm:$0xf] }
  0xfb   :  { %3612 = vmatpush.bf16.msrb.mxu3 %v5300_v28  ;;  %v5420_v16 = vor.u32 %v6806_v3, %v5419_v63  ;;  %v5999_v28 = vld [vmem:[%s10405_s1 + $0xc10] sm:$0xf]  ;;  %v6280_v3 = vor.u32 %v7021_v56, %v6279_v25  ;;  %v4601_v25 = vld [vmem:[%s10405_s1 + $0x134] sm:$0xf0] }
  0xfc   :  { %3624 = vmatpush.bf16.msra.mxu0 %v5480_v33  ;;  %v5859_v33 = vld [vmem:[%s10405_s1 + $0xaf8] sm:$0xf]  ;;  %v6000_v35 = vor.u32 %v6951_v29, %v5999_v28  ;;  %v5940_v28 = vor.u32 %v6936_v7, %v5939_v5  ;;  %v5919_v31 = vld [vmem:[%s10405_s1 + $0xb70] sm:$0xf]  ;;  %v6594_v5 = vld [vmem:[%s10405_s1 + $0xfc] sm:$0xf] }
  0xfd   :  { %3639 = vmatpush.bf16.msrb.mxu1 %v5600_v38  ;;  %v5860_v37 = vor.u32 %v6916_v6, %v5859_v33  ;;  %v6946_v38 = vld [vmem:[%s10405_s1 + $0xbf8] sm:$0xf0]  ;;  %v4921_v56 = vld [vmem:[%s10405_s1 + $0x3b4] sm:$0xf0]  ;;  %v4581_v7 = vld [vmem:[%s10405_s1 + $0x10c] sm:$0xf0] }
  0xfe   :  { %3598 = vmatpush.bf16.msra.mxu2 %v5160_v30  ;;  %v6319_v30 = vld [vmem:[%s10405_s1 + $0xe90] sm:$0xf]  ;;  %v5980_v49 = vor.u32 %v6946_v38, %v5979_v36  ;;  %v6099_v36 = vld [vmem:[%s10405_s1 + $0xcd8] sm:$0xf] }
  0xff   :  { %3613 = vmatpush.bf16.msrb.mxu3 %v5280_v14  ;;  %v6320_v14 = vor.u32 %v7031_v32, %v6319_v30  ;;  %v5800_v30 = vor.u32 %v6901_v15, %v5799_v13  ;;  %v6239_v32 = vld [vmem:[%s10405_s1 + $0xdf0] sm:$0xf]  ;;  %v6639_v13 = vld [vmem:[%s10405_s1 + $0x264] sm:$0xf]  ;;  %v4761_v15 = vld [vmem:[%s10405_s1 + $0x274] sm:$0xf0] }
 0x100   :  { %3625 = vmatpush.bf16.msra.mxu0 %v5460_v44  ;;  %v6911_v44 = vld [vmem:[%s10405_s1 + $0xae0] sm:$0xf0] }
 0x101   :  { %3640 = vmatpush.bf16.msrb.mxu1 %v5580_v48  ;;  %v3382_v47 = vpop.f32.mrf.mxu1  ;;  %v5840_v51 = vor.u32 %v6911_v44, %v5839_v43  ;;  %v5819_v48 = vld [vmem:[%s10405_s1 + $0xaa8] sm:$0xf]  ;;  %v6926_v43 = vld [vmem:[%s10405_s1 + $0xb58] sm:$0xf0] }
 0x102   :  { %3599 = vmatpush.bf16.msra.mxu2 %v5140_v39  ;;  %v6299_v39 = vld [vmem:[%s10405_s1 + $0xe68] sm:$0xf] }
 0x103   :  { %3614 = vmatpush.bf16.msrb.mxu3 %v5260_v54  ;;  %v6300_v50 = vor.u32 %v7026_v42, %v6299_v39  ;;  %v3383_v54 = vadd.f32 %v3382_v47, %v615_v40  ;;  %v5899_v39 = vld [vmem:[%s10405_s1 + $0xb48] sm:$0xf] }
 0x104   :  { %3626 = vmatpush.bf16.msra.mxu0 %v5440_v59  ;;  %3641 = vmatmul.bf16.vlgmr.msrb.gmra.mxu1 %v7561_v1  ;;  %v6986_v59 = vld [vmem:[%s10405_s1 + $0xd38] sm:$0xf0]  ;;  %v6219_v44 = vld [vmem:[%s10405_s1 + $0xdc8] sm:$0xf] }
 0x105   :  { %3685 = vmatpush.bf16.msra.mxu1 %v6360_v4  ;;  %v6140_v11 = vor.u32 %v6986_v59, %v6139_v58  ;;  %v5739_v58 = vld [vmem:[%s10405_s1 + $0xa08] sm:$0xf] }
 0x106   :  { %3600 = vmatpush.bf16.msra.mxu2 %v5120_v57  ;;  %3615 = vmatmul.bf16.vlgmr.msrb.gmra.mxu3 %v7563_v2  ;;  %v6906_v57 = vld [vmem:[%s10405_s1 + $0xab8] sm:$0xf0] }
 0x107   :  { %3659 = vmatpush.bf16.msra.mxu3 %v6040_v61  ;;  %v5820_v4 = vor.u32 %v6906_v57, %v5819_v48  ;;  %v6220_v48 = vor.u32 %v7006_v46, %v6219_v44 }
 0x108   :  { %3627 = vmatpush.bf16.msra.mxu0 %v5420_v16  ;;  %v3421_v61 = vpop.f32.mrf.mxu0  ;;  %v3395_v63 = vpop.f32.mrf.mxu2  ;;  %v6119_v16 = vld [vmem:[%s10405_s1 + $0xd00] sm:$0xf] }
 0x109   :  { %3686 = vmatpush.bf16.msra.mxu1 %v6340_v24  ;;  %v3396_v9 = vadd.f32 %v3395_v63, %v3383_v54  ;;  %v3408_v10 = vpop.f32.mrf.mxu3  ;;  %v5900_v54 = vor.u32 %v6926_v43, %v5899_v39  ;;  %v6059_v63 = vld [vmem:[%s10405_s1 + $0xc88] sm:$0xf]  ;;  %v9076_v43 = vld [vmem:[#allocation1] sm:$0xff] }
 0x10a   :  { %3601 = vmatpush.bf16.msra.mxu2 %v5100_v12  ;;  %v7016_v12 = vld [vmem:[%s10405_s1 + $0xe28] sm:$0xf0] }
 0x10b   :  { %3660 = vmatpush.bf16.msra.mxu3 %v6020_v19  ;;  %3628 = vmatmul.bf16.vlgmr.msra.gmra.mxu0 %v7554_v60  ;;  %v6981_v19 = vld [vmem:[%s10405_s1 + $0xd10] sm:$0xf0]  ;;  %v3409_v24 = vadd.f32 %v3408_v10, %v3396_v9  ;;  %v6260_v29 = vor.u32 %v7016_v12, %v6259_v8  ;;  %v6674_v8 = vld [vmem:[%s10405_s1 + $0x37c] sm:$0xf]  ;;  %v4901_v9 = vld [vmem:[%s10405_s1 + $0x38c] sm:$0xf0] }
 0x10c   :  { %3672 = vmatpush.bf16.msrb.mxu0 %v6200_v18  ;;  %v6931_v18 = vld [vmem:[%s10405_s1 + $0xb80] sm:$0xf0]  ;;  %v6120_v6 = vor.u32 %v6981_v19, %v6119_v16  ;;  %v6399_v10 = vld [vmem:[%s10405_s1 + $0xf30] sm:$0xf]  ;;  %v4584_v19 = vor.u32 %v6594_v5, %v4581_v7 }
 0x10d   :  { %3602 = vmatmul.bf16.vlgmr.msra.gmra.mxu2 %v7559_v0  ;;  %3687 = vmatpush.bf16.msra.mxu1 %v6320_v14  ;;  %v8945_v33 = vadd.f32 %v3421_v61, %v3409_v24  ;;  %v6976_v14 = vld [vmem:[%s10405_s1 + $0xce8] sm:$0xf0]  ;;  %v5920_v38 = vor.u32 %v6931_v18, %v5919_v31  ;;  %v4604_v61 = vor.u32 %v6599_v53, %v4601_v25  ;;  %v6589_v24 = vld [vmem:[%s10405_s1 + $0xd4] sm:$0xf]  ;;  %v4881_v31 = vld [vmem:[%s10405_s1 + $0x364] sm:$0xf0] }
 0x10e   :  { %3646 = vmatpush.bf16.msrb.mxu2 %v5880_v27  ;;  %v3384_v27 = vpop.f32.mrf.mxu1  ;;  %v6100_v47 = vor.u32 %v6976_v14, %v6099_v36  ;;  %v9046_v18 = vld [vmem:[#allocation1 + $0x9] sm:$0xff]  ;;  %v6719_v14 = vld [vmem:[%s10405_s1 + $0x4e4] sm:$0xf]  ;;  %v9097_v25 = vld [vmem:[#allocation1 + $0x12] sm:$0xff] }
 0x10f   :  { %3661 = vmatpush.bf16.msra.mxu3 %v6000_v35  ;;  %v6896_v35 = vld [vmem:[%s10405_s1 + $0xa68] sm:$0xf0]  ;;  %v4904_v27 = vor.u32 %v6674_v8, %v4901_v9  ;;  %v4741_v36 = vld [vmem:[%s10405_s1 + $0x24c] sm:$0xf0] }
 0x110   :  { %3673 = vmatpush.bf16.msrb.mxu0 %v6180_v41  ;;  %v3397_v40 = vpop.f32.mrf.mxu2  ;;  %v6240_v41 = vor.u32 %v7011_v17, %v6239_v32  ;;  %v5780_v42 = vor.u32 %v6896_v35, %v5779_v34  ;;  %v4764_v32 = vor.u32 %v6639_v13, %v4761_v15  ;;  %v7046_v17 = vld [vmem:[%s10405_s1 + $0xf18] sm:$0xf0]  ;;  %v4501_v13 = vld [vmem:[%s10405_s1 + $0x6c] sm:$0xf0] }
 0x111   :  { %3688 = vmatpush.bf16.msra.mxu1 %v6300_v50  ;;  %v3410_v45 = vpop.f32.mrf.mxu3  ;;  %v6891_v50 = vld [vmem:[%s10405_s1 + $0xa40] sm:$0xf0]  ;;  %v6634_v34 = vld [vmem:[%s10405_s1 + $0x23c] sm:$0xf] }
 0x112   :  { %3647 = vmatpush.bf16.msrb.mxu2 %v5860_v37  ;;  %v3423_v37 = vpop.f32.mrf.mxu0  ;;  %v9058_v35 = vld [vmem:[#allocation1 + $0x1b] sm:$0xff]  ;;  %v4744_v44 = vor.u32 %v6634_v34, %v4741_v36  ;;  %v6664_v45 = vld [vmem:[%s10405_s1 + $0x32c] sm:$0xf]  ;;  %v6569_v36 = vld [vmem:[%s10405_s1 + $0x34] sm:$0xf] }
 0x113   :  { %3662 = vmatpush.bf16.msra.mxu3 %v5980_v49  ;;  %v5759_v49 = vld [vmem:[%s10405_s1 + $0xa30] sm:$0xf]  ;;  %v5081_v37 = vld [vmem:[%s10405_s1 + $0x4f4] sm:$0xf0] }
 0x114   :  { %3674 = vmatpush.bf16.msrb.mxu0 %v6160_v55  ;;  %v6679_v55 = vld [vmem:[%s10405_s1 + $0x3a4] sm:$0xf]  ;;  %v5760_v57 = vor.u32 %v6891_v50, %v5759_v49  ;;  %v5084_v46 = vor.u32 %v6719_v14, %v5081_v37  ;;  %v6629_v49 = vld [vmem:[%s10405_s1 + $0x214] sm:$0xf]  ;;  %v4721_v50 = vld [vmem:[%s10405_s1 + $0x224] sm:$0xf0] }
 0x115   :  { %3689 = vmatpush.bf16.msra.mxu1 %v6280_v3  ;;  %v6966_v3 = vld [vmem:[%s10405_s1 + $0xc98] sm:$0xf0]  ;;  %v4481_v14 = vld [vmem:[%s10405_s1 + $0x44] sm:$0xf0] }
 0x116   :  { %3648 = vmatpush.bf16.msrb.mxu2 %v5840_v51  ;;  %v6079_v51 = vld [vmem:[%s10405_s1 + $0xcb0] sm:$0xf]  ;;  %v6060_v16 = vor.u32 %v6966_v3, %v6059_v63  ;;  %v4701_v63 = vld [vmem:[%s10405_s1 + $0x1fc] sm:$0xf0]  ;;  %v6709_v3 = vld [vmem:[%s10405_s1 + $0x494] sm:$0xf] }
 0x117   :  { %3663 = vmatpush.bf16.msra.mxu3 %v5960_v62  ;;  %v6080_v59 = vor.u32 %v6971_v52, %v6079_v51  ;;  %v6886_v62 = vld [vmem:[%s10405_s1 + $0xa18] sm:$0xf0]  ;;  %v5061_v52 = vld [vmem:[%s10405_s1 + $0x4cc] sm:$0xf0] }
 0x118   :  { %3675 = vmatpush.bf16.msrb.mxu0 %v6140_v11  ;;  %v7051_v11 = vld [vmem:[%s10405_s1 + $0xf40] sm:$0xf0]  ;;  %v5740_v12 = vor.u32 %v6886_v62, %v5739_v58  ;;  %v6714_v51 = vld [vmem:[%s10405_s1 + $0x4bc] sm:$0xf]  ;;  %v4724_v58 = vor.u32 %v6629_v49, %v4721_v50  ;;  %v6624_v62 = vld [vmem:[%s10405_s1 + $0x1ec] sm:$0xf] }
 0x119   :  { %3690 = vmatpush.bf16.msra.mxu1 %v6260_v29  ;;  %v4561_v29 = vld [vmem:[%s10405_s1 + $0xe4] sm:$0xf0]  ;;  %v4704_v15 = vor.u32 %v6624_v62, %v4701_v63  ;;  %v6564_v49 = vld [vmem:[%s10405_s1 + $0xc] sm:$0xf]  ;;  %v6839_v62 = vld [vmem:[%s10405_s1 + $0x8a4] sm:$0xf] }
 0x11a   :  { %3649 = vmatpush.bf16.msrb.mxu2 %v5820_v4  ;;  %v4924_v4 = vor.u32 %v6679_v55, %v4921_v56  ;;  %v5561_v63 = vld [vmem:[%s10405_s1 + $0x8b4] sm:$0xf0] }
 0x11b   :  { %3664 = vmatpush.bf16.msra.mxu3 %v5940_v28  ;;  %v6400_v28 = vor.u32 %v7051_v11, %v6399_v10 }
 0x11c   :  { %3676 = vmatpush.bf16.msrb.mxu0 %v6120_v6  ;;  %v6379_v6 = vld [vmem:[%s10405_s1 + $0xf08] sm:$0xf] }
 0x11d   :  { %3691 = vmatpush.bf16.msra.mxu1 %v6240_v41  ;;  %v6380_v40 = vor.u32 %v7046_v17, %v6379_v6  ;;  %v6584_v41 = vld [vmem:[%s10405_s1 + $0xac] sm:$0xf] }
 0x11e   :  { %3650 = vmatpush.bf16.msrb.mxu2 %v5800_v30  ;;  %v6669_v30 = vld [vmem:[%s10405_s1 + $0x354] sm:$0xf] }
 0x11f   :  { %3665 = vmatpush.bf16.msra.mxu3 %v5920_v38  ;;  %v4564_v38 = vor.u32 %v6589_v24, %v4561_v29  ;;  %v4884_v39 = vor.u32 %v6669_v30, %v4881_v31  ;;  %v4821_v24 = vld [vmem:[%s10405_s1 + $0x2ec] sm:$0xf0]  ;;  %v4681_v29 = vld [vmem:[%s10405_s1 + $0x1d4] sm:$0xf0]  ;;  %v6704_v30 = vld [vmem:[%s10405_s1 + $0x46c] sm:$0xf] }
 0x120   :  { %3677 = vmatpush.bf16.msrb.mxu0 %v6100_v47  ;;  %v4861_v47 = vld [vmem:[%s10405_s1 + $0x33c] sm:$0xf0] }
 0x121   :  { %3692 = vmatpush.bf16.msra.mxu1 %v6220_v48  ;;  %v3434_v53 = vpop.f32.mrf.mxu1  ;;  %v4864_v56 = vor.u32 %v6664_v45, %v4861_v47  ;;  %v6579_v48 = vld [vmem:[%s10405_s1 + $0x84] sm:$0xf]  ;;  %v5021_v31 = vld [vmem:[%s10405_s1 + $0x47c] sm:$0xf0]  ;;  %v4484_v47 = vor.u32 %v6569_v36, %v4481_v14  ;;  %v5201_v36 = vld [vmem:[%s10405_s1 + $0x5e4] sm:$0xf0] }
 0x122   :  { %3651 = vmatpush.bf16.msrb.mxu2 %v5780_v42  ;;  %v4541_v42 = vld [vmem:[%s10405_s1 + $0xbc] sm:$0xf0]  ;;  %v3435_v55 = vadd.f32 %v3434_v53, %v8945_v33  ;;  %v4841_v33 = vld [vmem:[%s10405_s1 + $0x314] sm:$0xf0]  ;;  %v6644_v53 = vld [vmem:[%s10405_s1 + $0x28c] sm:$0xf] }
 0x123   :  { %3666 = vmatpush.bf16.msra.mxu3 %v5900_v54  ;;  %v4544_v54 = vor.u32 %v6584_v41, %v4541_v42  ;;  %v6614_v41 = vld [vmem:[%s10405_s1 + $0x19c] sm:$0xf]  ;;  %v4661_v42 = vld [vmem:[%s10405_s1 + $0x1ac] sm:$0xf0] }
 0x124   :  { %3678 = vmatpush.bf16.msrb.mxu0 %v6080_v59  ;;  %3693 = vmatmul.bf16.vlgmr.msra.gmra.mxu1 %v9058_v35  ;;  %v5064_v59 = vor.u32 %v6714_v51, %v5061_v52  ;;  %v4461_v52 = vld [vmem:[%s10405_s1 + $0x1c] sm:$0xf0] }
 0x125   :  { %3737 = vmatpush.bf16.msrb.mxu1 %v4924_v4  ;;  %v5041_v4 = vld [vmem:[%s10405_s1 + $0x4a4] sm:$0xf0] }
 0x126   :  { %3652 = vmatpush.bf16.msrb.mxu2 %v5760_v57  ;;  %3667 = vmatmul.bf16.vlgmr.msra.gmra.mxu3 %v9046_v18  ;;  %v4521_v57 = vld [vmem:[%s10405_s1 + $0x94] sm:$0xf0] }
 0x127   :  { %3711 = vmatpush.bf16.msrb.mxu3 %v4604_v61  ;;  %v6659_v61 = vld [vmem:[%s10405_s1 + $0x304] sm:$0xf]  ;;  %v4524_v7 = vor.u32 %v6579_v48, %v4521_v57  ;;  %v6609_v57 = vld [vmem:[%s10405_s1 + $0x174] sm:$0xf] }
 0x128   :  { %3679 = vmatpush.bf16.msrb.mxu0 %v6060_v16  ;;  %v3473_v5 = vpop.f32.mrf.mxu0  ;;  %v3447_v8 = vpop.f32.mrf.mxu2  ;;  %v4844_v9 = vor.u32 %v6659_v61, %v4841_v33  ;;  %v5044_v16 = vor.u32 %v6709_v3, %v5041_v4  ;;  %v9196_v61 = vld [vmem:[#allocation1 + $0x24] sm:$0xff]  ;;  %v4464_v3 = vor.u32 %v6564_v49, %v4461_v52  ;;  %v6694_v4 = vld [vmem:[%s10405_s1 + $0x41c] sm:$0xf] }
 0x129   :  { %3738 = vmatpush.bf16.msrb.mxu1 %v4904_v27  ;;  %v3448_v10 = vadd.f32 %v3447_v8, %v3435_v55  ;;  %v3460_v11 = vpop.f32.mrf.mxu3  ;;  %v6619_v27 = vld [vmem:[%s10405_s1 + $0x1c4] sm:$0xf]  ;;  %v4641_v33 = vld [vmem:[%s10405_s1 + $0x184] sm:$0xf0] }
 0x12a   :  { %3653 = vmatpush.bf16.msrb.mxu2 %v5740_v12  ;;  %v6574_v12 = vld [vmem:[%s10405_s1 + $0x5c] sm:$0xf]  ;;  %v4684_v37 = vor.u32 %v6619_v27, %v4681_v29  ;;  %v6689_v27 = vld [vmem:[%s10405_s1 + $0x3f4] sm:$0xf]  ;;  %v6799_v29 = vld [vmem:[%s10405_s1 + $0x764] sm:$0xf] }
 0x12b   :  { %3712 = vmatpush.bf16.msrb.mxu3 %v4584_v19  ;;  %3680 = vmatmul.bf16.vlgmr.msrb.gmra.mxu0 %v9097_v25  ;;  %v6654_v19 = vld [vmem:[%s10405_s1 + $0x2dc] sm:$0xf]  ;;  %v4504_v6 = vor.u32 %v6574_v12, %v4501_v13  ;;  %v4621_v12 = vld [vmem:[%s10405_s1 + $0x15c] sm:$0xf0] }
 0x12c   :  { %3724 = vmatpush.bf16.msra.mxu0 %v4764_v32  ;;  %v3436_v32 = vpop.f32.mrf.mxu1  ;;  %v4824_v17 = vor.u32 %v6654_v19, %v4821_v24  ;;  %v6754_v13 = vld [vmem:[%s10405_s1 + $0x5fc] sm:$0xf]  ;;  %v5541_v24 = vld [vmem:[%s10405_s1 + $0x88c] sm:$0xf0] }
 0x12d   :  { %3654 = vmatmul.bf16.vlgmr.msrb.gmra.mxu2 %v9076_v43  ;;  %3739 = vmatpush.bf16.msrb.mxu1 %v4884_v39  ;;  %v6649_v39 = vld [vmem:[%s10405_s1 + $0x2b4] sm:$0xf]  ;;  %v6834_v19 = vld [vmem:[%s10405_s1 + $0x87c] sm:$0xf] }
 0x12e   :  { %3704 = vmatpush.bf16.msra.mxu2 %v6400_v28  ;;  %v3461_v28 = vadd.f32 %v3460_v11, %v3448_v10  ;;  %v4644_v10 = vor.u32 %v6609_v57, %v4641_v33  ;;  %v5564_v11 = vor.u32 %v6839_v62, %v5561_v63  ;;  %v5361_v57 = vld [vmem:[%s10405_s1 + $0x724] sm:$0xf0]  ;;  %v6874_v33 = vld [vmem:[%s10405_s1 + $0x9bc] sm:$0xf]  ;;  %v5701_v62 = vld [vmem:[%s10405_s1 + $0x9cc] sm:$0xf0] }
 0x12f   :  { %3713 = vmatpush.bf16.msrb.mxu3 %v4564_v38  ;;  %v5024_v38 = vor.u32 %v6704_v30, %v5021_v31  ;;  %v5401_v30 = vld [vmem:[%s10405_s1 + $0x774] sm:$0xf0] }
 0x130   :  { %3725 = vmatpush.bf16.msra.mxu0 %v4744_v44  ;;  %v9149_v34 = vadd.f32 %v3473_v5, %v3461_v28  ;;  %v6699_v44 = vld [vmem:[%s10405_s1 + $0x444] sm:$0xf]  ;;  %v3475_v45 = vpop.f32.mrf.mxu0  ;;  %v3449_v50 = vpop.f32.mrf.mxu2  ;;  %v4981_v5 = vld [vmem:[%s10405_s1 + $0x42c] sm:$0xf0]  ;;  %v4961_v28 = vld [vmem:[%s10405_s1 + $0x404] sm:$0xf0] }
 0x131   :  { %3740 = vmatpush.bf16.msrb.mxu1 %v4864_v56  ;;  %v3462_v55 = vpop.f32.mrf.mxu3  ;;  %v4664_v56 = vor.u32 %v6614_v41, %v4661_v42  ;;  %v4964_v14 = vor.u32 %v6689_v27, %v4961_v28  ;;  %v4941_v41 = vld [vmem:[%s10405_s1 + $0x3dc] sm:$0xf0]  ;;  %v6794_v42 = vld [vmem:[%s10405_s1 + $0x73c] sm:$0xf]  ;;  %v6879_v45 = vld [vmem:[%s10405_s1 + $0x9e4] sm:$0xf] }
 0x132   :  { %3705 = vmatpush.bf16.msra.mxu2 %v6380_v40  ;;  %v4801_v40 = vld [vmem:[%s10405_s1 + $0x2c4] sm:$0xf0]  ;;  %v6744_v50 = vld [vmem:[%s10405_s1 + $0x5ac] sm:$0xf]  ;;  %v5501_v55 = vld [vmem:[%s10405_s1 + $0x83c] sm:$0xf0] }
 0x133   :  { %3714 = vmatpush.bf16.msrb.mxu3 %v4544_v54  ;;  %v4804_v51 = vor.u32 %v6649_v39, %v4801_v40  ;;  %v4781_v54 = vld [vmem:[%s10405_s1 + $0x29c] sm:$0xf0]  ;;  %v5521_v39 = vld [vmem:[%s10405_s1 + $0x864] sm:$0xf0]  ;;  %v6684_v40 = vld [vmem:[%s10405_s1 + $0x3cc] sm:$0xf] }
 0x134   :  { %3726 = vmatpush.bf16.msra.mxu0 %v4724_v58  ;;  %v6759_v58 = vld [vmem:[%s10405_s1 + $0x624] sm:$0xf]  ;;  %v4944_v52 = vor.u32 %v6684_v40, %v4941_v41  ;;  %v5141_v27 = vld [vmem:[%s10405_s1 + $0x56c] sm:$0xf0]  ;;  %v5661_v40 = vld [vmem:[%s10405_s1 + $0x97c] sm:$0xf0] }
 0x135   :  { %3741 = vmatpush.bf16.msrb.mxu1 %v4844_v9  ;;  %v6604_v9 = vld [vmem:[%s10405_s1 + $0x14c] sm:$0xf] }
 0x136   :  { %3750 = vmatpush.bf16.msrb.mxu2 %v5084_v46  ;;  %v5001_v46 = vld [vmem:[%s10405_s1 + $0x454] sm:$0xf0]  ;;  %v4624_v32 = vor.u32 %v6604_v9, %v4621_v12  ;;  %v5704_v9 = vor.u32 %v6874_v33, %v5701_v62  ;;  %v6804_v33 = vld [vmem:[%s10405_s1 + $0x78c] sm:$0xf]  ;;  %v5421_v62 = vld [vmem:[%s10405_s1 + $0x79c] sm:$0xf0] }
 0x137   :  { %3715 = vmatpush.bf16.msrb.mxu3 %v4524_v7  ;;  %v5004_v48 = vor.u32 %v6699_v44, %v5001_v46  ;;  %v4784_v7 = vor.u32 %v6644_v53, %v4781_v54  ;;  %v5381_v44 = vld [vmem:[%s10405_s1 + $0x74c] sm:$0xf0]  ;;  %v6824_v54 = vld [vmem:[%s10405_s1 + $0x82c] sm:$0xf] }
 0x138   :  { %3727 = vmatpush.bf16.msra.mxu0 %v4704_v15  ;;  %v5221_v15 = vld [vmem:[%s10405_s1 + $0x60c] sm:$0xf0]  ;;  %v5384_v53 = vor.u32 %v6794_v42, %v5381_v44  ;;  %v6729_v44 = vld [vmem:[%s10405_s1 + $0x534] sm:$0xf] }
 0x139   :  { %3742 = vmatpush.bf16.msrb.mxu1 %v4824_v17  ;;  %v5224_v31 = vor.u32 %v6754_v13, %v5221_v15  ;;  %v6749_v17 = vld [vmem:[%s10405_s1 + $0x5d4] sm:$0xf]  ;;  %v5681_v15 = vld [vmem:[%s10405_s1 + $0x9a4] sm:$0xf0] }
 0x13a   :  { %3751 = vmatpush.bf16.msrb.mxu2 %v5064_v59  ;;  %v5241_v59 = vld [vmem:[%s10405_s1 + $0x634] sm:$0xf0]  ;;  %v5204_v46 = vor.u32 %v6749_v17, %v5201_v36  ;;  %v6869_v13 = vld [vmem:[%s10405_s1 + $0x994] sm:$0xf]  ;;  %v6779_v36 = vld [vmem:[%s10405_s1 + $0x6c4] sm:$0xf] }
 0x13b   :  { %3716 = vmatpush.bf16.msrb.mxu3 %v4504_v6  ;;  %v5244_v8 = vor.u32 %v6759_v58, %v5241_v59  ;;  %v5544_v6 = vor.u32 %v6834_v19, %v5541_v24  ;;  %v6734_v24 = vld [vmem:[%s10405_s1 + $0x55c] sm:$0xf]  ;;  %v5684_v17 = vor.u32 %v6869_v13, %v5681_v15  ;;  %v5621_v15 = vld [vmem:[%s10405_s1 + $0x92c] sm:$0xf0] }
 0x13c   :  { %3728 = vmatpush.bf16.msra.mxu0 %v4684_v37  ;;  %v5404_v37 = vor.u32 %v6799_v29, %v5401_v30  ;;  %v6854_v13 = vld [vmem:[%s10405_s1 + $0x91c] sm:$0xf] }
 0x13d   :  { %6411 = vmatmul.msk.bf16.vlgmr.msra.gmra.mxu2 %vm3201_vm0, %v9196_v61  ;;  %3743 = vmatpush.bf16.msrb.mxu1 %v4804_v51  ;;  %v5181_v51 = vld [vmem:[%s10405_s1 + $0x5bc] sm:$0xf0] }
 0x13e   :  { %3752 = vmatpush.bf16.msrb.mxu2 %v5044_v16  ;;  %v4984_v16 = vor.u32 %v6694_v4, %v4981_v5  ;;  %v5184_v59 = vor.u32 %v6744_v50, %v5181_v51  ;;  %v6739_v4 = vld [vmem:[%s10405_s1 + $0x584] sm:$0xf]  ;;  %v5161_v5 = vld [vmem:[%s10405_s1 + $0x594] sm:$0xf0]  ;;  %v5441_v50 = vld [vmem:[%s10405_s1 + $0x7c4] sm:$0xf0] }
 0x13f   :  { %3717 = vmatpush.bf16.msrb.mxu3 %v4484_v47  ;;  %v5721_v47 = vld [vmem:[%s10405_s1 + $0x9f4] sm:$0xf0]  ;;  %v5164_v12 = vor.u32 %v6739_v4, %v5161_v5  ;;  %v6769_v4 = vld [vmem:[%s10405_s1 + $0x674] sm:$0xf]  ;;  %v6919_v5 = vld [vmem:[%s10405_s1 + $0xb24] sm:$0xf] }
 0x140   :  { %3729 = vmatpush.bf16.msra.mxu0 %v4664_v56  ;;  %v5724_v56 = vor.u32 %v6879_v45, %v5721_v47 }
 0x141   :  { %3744 = vmatpush.bf16.msrb.mxu1 %v4784_v7  ;;  %v3486_v58 = vpop.f32.mrf.mxu1 }
 0x142   :  { %3753 = vmatpush.bf16.msrb.mxu2 %v5024_v38  ;;  %v6829_v38 = vld [vmem:[%s10405_s1 + $0x854] sm:$0xf]  ;;  %v3487_v63 = vadd.f32 %v3486_v58, %v9149_v34  ;;  %v5481_v34 = vld [vmem:[%s10405_s1 + $0x814] sm:$0xf0] }
 0x143   :  { %3718 = vmatpush.bf16.msrb.mxu3 %v4464_v3  ;;  %v5524_v49 = vor.u32 %v6829_v38, %v5521_v39  ;;  %v5504_v3 = vor.u32 %v6824_v54, %v5501_v55  ;;  %v5144_v38 = vor.u32 %v6734_v24, %v5141_v27  ;;  %v6864_v39 = vld [vmem:[%s10405_s1 + $0x96c] sm:$0xf]  ;;  %v6859_v55 = vld [vmem:[%s10405_s1 + $0x944] sm:$0xf] }
 0x144   :  { %3730 = vmatpush.bf16.msra.mxu0 %v4644_v10  ;;  %3745 = vmatmul.bf16.vlgmr.msrb.gmra.mxu1 %v7464_v20  ;;  %v6784_v10 = vld [vmem:[%s10405_s1 + $0x6ec] sm:$0xf]  ;;  %v5664_v51 = vor.u32 %v6864_v39, %v5661_v40 }
 0x145   :  { %3789 = vmatpush.bf16.msra.mxu1 %v5564_v11  ;;  %v5341_v11 = vld [vmem:[%s10405_s1 + $0x6fc] sm:$0xf0]  ;;  %v6764_v24 = vld [vmem:[%s10405_s1 + $0x64c] sm:$0xf] }
 0x146   :  { %3754 = vmatpush.bf16.msrb.mxu2 %v5004_v48  ;;  %3719 = vmatmul.bf16.vlgmr.msrb.gmra.mxu3 %v7466_v21  ;;  %v6789_v48 = vld [vmem:[%s10405_s1 + $0x714] sm:$0xf]  ;;  %v5344_v30 = vor.u32 %v6784_v10, %v5341_v11  ;;  %v6999_v10 = vld [vmem:[%s10405_s1 + $0xda4] sm:$0xf]  ;;  %v6201_v11 = vld [vmem:[%s10405_s1 + $0xdb4] sm:$0xf0] }
 0x147   :  { %3763 = vmatpush.bf16.msra.mxu3 %v5244_v8  ;;  %v5364_v7 = vor.u32 %v6789_v48, %v5361_v57  ;;  %v6819_v8 = vld [vmem:[%s10405_s1 + $0x804] sm:$0xf]  ;;  %v6724_v48 = vld [vmem:[%s10405_s1 + $0x50c] sm:$0xf] }
 0x148   :  { %3731 = vmatpush.bf16.msra.mxu0 %v4624_v32  ;;  %v3499_v19 = vpop.f32.mrf.mxu2  ;;  %v3525_v28 = vpop.f32.mrf.mxu0  ;;  %v6814_v32 = vld [vmem:[%s10405_s1 + $0x7dc] sm:$0xf] }
 0x149   :  { %3790 = vmatpush.bf16.msra.mxu1 %v5544_v6  ;;  %v3500_v29 = vadd.f32 %v3499_v19, %v3487_v63  ;;  %v5461_v6 = vld [vmem:[%s10405_s1 + $0x7ec] sm:$0xf0]  ;;  %v3488_v41 = vpop.f32.mrf.mxu1 }
 0x14a   :  { %3755 = vmatpush.bf16.msrb.mxu2 %v4984_v16  ;;  %v5484_v16 = vor.u32 %v6819_v8, %v5481_v34  ;;  %v5464_v42 = vor.u32 %v6814_v32, %v5461_v6  ;;  %v5624_v32 = vor.u32 %v6854_v13, %v5621_v15  ;;  %v6994_v6 = vld [vmem:[%s10405_s1 + $0xd7c] sm:$0xf]  ;;  %v5801_v13 = vld [vmem:[%s10405_s1 + $0xa94] sm:$0xf0] }
 0x14b   :  { %3764 = vmatpush.bf16.msra.mxu3 %v5224_v31  ;;  %3732 = vmatmul.bf16.vlgmr.msra.gmra.mxu0 %v7477_v26  ;;  %v3512_v31 = vpop.f32.mrf.mxu3 }
 0x14c   :  { %3776 = vmatpush.bf16.msrb.mxu0 %v5404_v37  ;;  %v3513_v37 = vadd.f32 %v3512_v31, %v3500_v29  ;;  %v5261_v29 = vld [vmem:[%s10405_s1 + $0x65c] sm:$0xf0]  ;;  %v5861_v31 = vld [vmem:[%s10405_s1 + $0xb0c] sm:$0xf0] }
 0x14d   :  { %3791 = vmatpush.bf16.msra.mxu1 %v5524_v49  ;;  %v6809_v49 = vld [vmem:[%s10405_s1 + $0x7b4] sm:$0xf]  ;;  %v5264_v41 = vor.u32 %v6764_v24, %v5261_v29  ;;  %v6979_v24 = vld [vmem:[%s10405_s1 + $0xd04] sm:$0xf]  ;;  %v6944_v29 = vld [vmem:[%s10405_s1 + $0xbec] sm:$0xf] }
 0x14e   :  { %3756 = vmatpush.bf16.msrb.mxu2 %v4964_v14  ;;  %v5321_v14 = vld [vmem:[%s10405_s1 + $0x6d4] sm:$0xf0]  ;;  %v9358_v45 = vadd.f32 %v3525_v28, %v3513_v37  ;;  %v5444_v57 = vor.u32 %v6809_v49, %v5441_v50  ;;  %v6204_v28 = vor.u32 %v6999_v10, %v6201_v11  ;;  %v6959_v37 = vld [vmem:[%s10405_s1 + $0xc64] sm:$0xf]  ;;  %v6341_v10 = vld [vmem:[%s10405_s1 + $0xecc] sm:$0xf0] }
 0x14f   :  { %3765 = vmatpush.bf16.msra.mxu3 %v5204_v46  ;;  %v5121_v46 = vld [vmem:[%s10405_s1 + $0x544] sm:$0xf0]  ;;  %v5324_v47 = vor.u32 %v6779_v36, %v5321_v14  ;;  %v6849_v36 = vld [vmem:[%s10405_s1 + $0x8f4] sm:$0xf] }
 0x150   :  { %3777 = vmatpush.bf16.msrb.mxu0 %v5384_v53  ;;  %v5301_v53 = vld [vmem:[%s10405_s1 + $0x6ac] sm:$0xf0]  ;;  %v5124_v54 = vor.u32 %v6729_v44, %v5121_v46  ;;  %v3501_v58 = vpop.f32.mrf.mxu2  ;;  %v3527_v63 = vpop.f32.mrf.mxu0  ;;  %v5601_v14 = vld [vmem:[%s10405_s1 + $0x904] sm:$0xf0]  ;;  %v6909_v44 = vld [vmem:[%s10405_s1 + $0xad4] sm:$0xf] }
 0x151   :  { %3792 = vmatpush.bf16.msra.mxu1 %v5504_v3  ;;  %v5841_v46 = vld [vmem:[%s10405_s1 + $0xae4] sm:$0xf0]  ;;  %v5604_v49 = vor.u32 %v6849_v36, %v5601_v14  ;;  %v6894_v36 = vld [vmem:[%s10405_s1 + $0xa5c] sm:$0xf]  ;;  %v5781_v14 = vld [vmem:[%s10405_s1 + $0xa6c] sm:$0xf0] }
 0x152   :  { %3757 = vmatpush.bf16.msrb.mxu2 %v4944_v52  ;;  %v6774_v52 = vld [vmem:[%s10405_s1 + $0x69c] sm:$0xf] }
 0x153   :  { %3766 = vmatpush.bf16.msra.mxu3 %v5184_v59  ;;  %v5101_v59 = vld [vmem:[%s10405_s1 + $0x51c] sm:$0xf0]  ;;  %v5304_v3 = vor.u32 %v6774_v52, %v5301_v53  ;;  %v3514_v8 = vpop.f32.mrf.mxu3  ;;  %v6161_v52 = vld [vmem:[%s10405_s1 + $0xd64] sm:$0xf0]  ;;  %v6844_v53 = vld [vmem:[%s10405_s1 + $0x8cc] sm:$0xf] }
 0x154   :  { %3778 = vmatpush.bf16.msrb.mxu0 %v5364_v7  ;;  %v5881_v7 = vld [vmem:[%s10405_s1 + $0xb34] sm:$0xf0]  ;;  %v6001_v8 = vld [vmem:[%s10405_s1 + $0xc24] sm:$0xf0] }
 0x155   :  { %3758 = vmatmul.bf16.vlgmr.msrb.gmra.mxu2 %v7468_v22  ;;  %3793 = vmatpush.bf16.msra.mxu1 %v5484_v16  ;;  %v5424_v16 = vor.u32 %v6804_v33, %v5421_v62  ;;  %v5884_v19 = vor.u32 %v6919_v5, %v5881_v7  ;;  %v5821_v33 = vld [vmem:[%s10405_s1 + $0xabc] sm:$0xf0]  ;;  %v6949_v7 = vld [vmem:[%s10405_s1 + $0xc14] sm:$0xf] }
 0x156   :  { %3802 = vmatpush.bf16.msra.mxu2 %v5724_v56  ;;  %v5641_v56 = vld [vmem:[%s10405_s1 + $0x954] sm:$0xf0] }
 0x157   :  { %3767 = vmatpush.bf16.msra.mxu3 %v5164_v12  ;;  %v5644_v34 = vor.u32 %v6859_v55, %v5641_v56  ;;  %v5104_v12 = vor.u32 %v6724_v48, %v5101_v59  ;;  %v6021_v55 = vld [vmem:[%s10405_s1 + $0xc4c] sm:$0xf0]  ;;  %v5844_v56 = vor.u32 %v6909_v44, %v5841_v46  ;;  %v7039_v48 = vld [vmem:[%s10405_s1 + $0xee4] sm:$0xf]  ;;  %v6904_v59 = vld [vmem:[%s10405_s1 + $0xaac] sm:$0xf] }
 0x158   :  { %3779 = vmatpush.bf16.msrb.mxu0 %v5344_v30  ;;  %v6914_v30 = vld [vmem:[%s10405_s1 + $0xafc] sm:$0xf]  ;;  %v3538_v40 = vpop.f32.mrf.mxu2  ;;  %v6939_v44 = vld [vmem:[%s10405_s1 + $0xbc4] sm:$0xf]  ;;  %v5961_v46 = vld [vmem:[%s10405_s1 + $0xbd4] sm:$0xf0] }
 0x159   :  { %3794 = vmatpush.bf16.msra.mxu1 %v5464_v42  ;;  %v5864_v39 = vor.u32 %v6914_v30, %v5861_v31  ;;  %v5981_v30 = vld [vmem:[%s10405_s1 + $0xbfc] sm:$0xf0] }
 0x15a   :  { %3803 = vmatpush.bf16.msra.mxu2 %v5704_v9  ;;  %v5281_v9 = vld [vmem:[%s10405_s1 + $0x684] sm:$0xf0] }
 0x15b   :  { %3768 = vmatpush.bf16.msra.mxu3 %v5144_v38  ;;  %v5284_v27 = vor.u32 %v6769_v4, %v5281_v9  ;;  %v6041_v38 = vld [vmem:[%s10405_s1 + $0xc74] sm:$0xf0]  ;;  %v6141_v4 = vld [vmem:[%s10405_s1 + $0xd3c] sm:$0xf0]  ;;  %v7034_v9 = vld [vmem:[%s10405_s1 + $0xebc] sm:$0xf] }
 0x15c   :  { %3780 = vmatpush.bf16.msrb.mxu0 %v5324_v47  ;;  %v9451_v47 = vadd.f32 %v3538_v40, %v9358_v45  ;;  %v6044_v50 = vor.u32 %v6959_v37, %v6041_v38  ;;  %v5581_v45 = vld [vmem:[%s10405_s1 + $0x8dc] sm:$0xf0]  ;;  %v5984_v37 = vor.u32 %v6944_v29, %v5981_v30  ;;  %v6974_v38 = vld [vmem:[%s10405_s1 + $0xcdc] sm:$0xf]  ;;  %v5921_v30 = vld [vmem:[%s10405_s1 + $0xb84] sm:$0xf0] }
 0x15d   :  { %3795 = vmatpush.bf16.msra.mxu1 %v5444_v57  ;;  %v6361_v57 = vld [vmem:[%s10405_s1 + $0xef4] sm:$0xf0]  ;;  %v5584_v62 = vor.u32 %v6844_v53, %v5581_v45 }
 0x15e   :  { %3804 = vmatpush.bf16.msra.mxu2 %v5684_v17  ;;  %v6181_v17 = vld [vmem:[%s10405_s1 + $0xd8c] sm:$0xf0]  ;;  %v6364_v5 = vor.u32 %v7039_v48, %v6361_v57  ;;  %v5964_v48 = vor.u32 %v6939_v44, %v5961_v46  ;;  %v6969_v57 = vld [vmem:[%s10405_s1 + $0xcb4] sm:$0xf]  ;;  %v5901_v44 = vld [vmem:[%s10405_s1 + $0xb5c] sm:$0xf0] }
 0x15f   :  { %3769 = vmatpush.bf16.msra.mxu3 %v5124_v54  ;;  %v6184_v42 = vor.u32 %v6994_v6, %v6181_v17  ;;  %v6954_v54 = vld [vmem:[%s10405_s1 + $0xc3c] sm:$0xf]  ;;  %v6321_v6 = vld [vmem:[%s10405_s1 + $0xea4] sm:$0xf0]  ;;  %v7044_v46 = vld [vmem:[%s10405_s1 + $0xf0c] sm:$0xf] }
 0x160   :  { %3781 = vmatpush.bf16.msrb.mxu0 %v5304_v3  ;;  %v6024_v63 = vor.u32 %v6954_v54, %v6021_v55  ;;  %v6984_v3 = vld [vmem:[%s10405_s1 + $0xd2c] sm:$0xf]  ;;  %v3540_v15 = vpop.f32.mrf.mxu2  ;;  %v6889_v54 = vld [vmem:[%s10405_s1 + $0xa34] sm:$0xf]  ;;  %v5761_v55 = vld [vmem:[%s10405_s1 + $0xa44] sm:$0xf0] }
 0x161   :  { %3796 = vmatpush.bf16.msra.mxu1 %v5424_v16  ;;  %v6144_v11 = vor.u32 %v6984_v3, %v6141_v4  ;;  %v9510_v16 = vpop.f32.mrf.mxu1  ;;  %v5764_v3 = vor.u32 %v6889_v54, %v5761_v55  ;;  %v7019_v4 = vld [vmem:[%s10405_s1 + $0xe44] sm:$0xf]  ;;  %v7049_v15 = vld [vmem:[%s10405_s1 + $0xf34] sm:$0xf]  ;;  %v4607_v54 = vld [vmem:[%s10405_s1 + $0x128] sm:$0xf] }
 0x162   :  { %3805 = vmatpush.bf16.msra.mxu2 %v5664_v51  ;;  %v6989_v51 = vld [vmem:[%s10405_s1 + $0xd54] sm:$0xf]  ;;  %v6602_v55 = vld [vmem:[%s10405_s1 + $0x138] sm:$0xf0] }
 0x163   :  { %3770 = vmatpush.bf16.msra.mxu3 %v5104_v12  ;;  %v6164_v58 = vor.u32 %v6989_v51, %v6161_v52  ;;  %v6899_v12 = vld [vmem:[%s10405_s1 + $0xa84] sm:$0xf]  ;;  %v6301_v51 = vld [vmem:[%s10405_s1 + $0xe7c] sm:$0xf0] }
 0x164   :  { %3782 = vmatpush.bf16.msrb.mxu0 %v5284_v27  ;;  %3797 = vmatmul.bf16.vlgmr.msra.gmra.mxu1 %v7554_v60  ;;  %v6121_v27 = vld [vmem:[%s10405_s1 + $0xd14] sm:$0xf0]  ;;  %v5804_v31 = vor.u32 %v6899_v12, %v5801_v13  ;;  %v7097_v52 = vld [vmem:[%s10406_s2] sm:$0x1f]  ;;  %v6929_v13 = vld [vmem:[%s10405_s1 + $0xb74] sm:$0xf] }
 0x165   :  { %3841 = vmatpush.bf16.msrb.mxu1 %v6204_v28  ;;  %v6344_v28 = vor.u32 %v7034_v9, %v6341_v10  ;;  %v6124_v17 = vor.u32 %v6979_v24, %v6121_v27  ;;  %v616_v53 = vperm.slane %v7097_v52, 2  ;;  %v5741_v9 = vld [vmem:[%s10405_s1 + $0xa1c] sm:$0xf0]  ;;  %v6964_v10 = vld [vmem:[%s10405_s1 + $0xc8c] sm:$0xf] }
 0x166   :  { %3806 = vmatpush.bf16.msra.mxu2 %v5644_v34  ;;  %3771 = vmatmul.bf16.vlgmr.msra.gmra.mxu3 %v7559_v0  ;;  %v5824_v34 = vor.u32 %v6904_v59, %v5821_v33  ;;  %v6934_v33 = vld [vmem:[%s10405_s1 + $0xb9c] sm:$0xf]  ;;  %v6637_v52 = vld [vmem:[%s10405_s1 + $0x250] sm:$0xf0] }
 0x167   :  { %3815 = vmatpush.bf16.msrb.mxu3 %v5884_v19  ;;  %v6004_v19 = vor.u32 %v6949_v7, %v6001_v8  ;;  %v6884_v7 = vld [vmem:[%s10405_s1 + $0xa0c] sm:$0xf] }
 0x168   :  { %3783 = vmatpush.bf16.msrb.mxu0 %v5264_v41  ;;  %v3577_v40 = vpop.f32.mrf.mxu0 }
 0x169   :  { %3842 = vmatpush.bf16.msrb.mxu1 %v6184_v42  ;;  %v3564_v41 = vpop.f32.mrf.mxu3 }
 0x16a   :  { %3807 = vmatpush.bf16.msra.mxu2 %v5624_v32  ;;  %v7029_v32 = vld [vmem:[%s10405_s1 + $0xe94] sm:$0xf] }
 0x16b   :  { %3816 = vmatpush.bf16.msrb.mxu3 %v5864_v39  ;;  %3784 = vmatmul.bf16.vlgmr.msrb.gmra.mxu0 %v7563_v2  ;;  %v6101_v39 = vld [vmem:[%s10405_s1 + $0xcec] sm:$0xf0]  ;;  %v6324_v42 = vor.u32 %v7029_v32, %v6321_v6  ;;  %v6642_v32 = vld [vmem:[%s10405_s1 + $0x278] sm:$0xf0]  ;;  %v5744_v6 = vor.u32 %v6884_v7, %v5741_v9  ;;  %v6717_v9 = vld [vmem:[%s10405_s1 + $0x4d0] sm:$0xf0] }
 0x16c   :  { %3828 = vmatpush.bf16.msra.mxu0 %v6044_v50  ;;  %v7024_v50 = vld [vmem:[%s10405_s1 + $0xe6c] sm:$0xf]  ;;  %v6104_v45 = vor.u32 %v6974_v38, %v6101_v39 }
 0x16d   :  { %3843 = vmatpush.bf16.msrb.mxu1 %v6164_v58  ;;  %v6081_v58 = vld [vmem:[%s10405_s1 + $0xcc4] sm:$0xf0]  ;;  %v6304_v59 = vor.u32 %v7024_v50, %v6301_v51  ;;  %v6924_v39 = vld [vmem:[%s10405_s1 + $0xb4c] sm:$0xf]  ;;  %v4747_v51 = vld [vmem:[%s10405_s1 + $0x240] sm:$0xf] }
 0x16e   :  { %3808 = vmatpush.bf16.msra.mxu2 %v5604_v49  ;;  %v5784_v49 = vor.u32 %v6894_v36, %v5781_v14  ;;  %v6261_v36 = vld [vmem:[%s10405_s1 + $0xe2c] sm:$0xf0] }
 0x16f   :  { %3817 = vmatpush.bf16.msrb.mxu3 %v5844_v56  ;;  %v3592_v56 = vpop.f32.mrf.mxu1 }
 0x170   :  { %3829 = vmatpush.bf16.msra.mxu0 %v6024_v63  ;;  %v3551_v63 = vpop.f32.mrf.mxu2  ;;  %v3579_v27 = vpop.f32.mrf.mxu0 }
 0x171   :  { %3844 = vmatpush.bf16.msrb.mxu1 %v6144_v11  ;;  %v3552_v8 = vadd.f32 %v3551_v63, %v616_v53  ;;  %v6061_v11 = vld [vmem:[%s10405_s1 + $0xc9c] sm:$0xf0]  ;;  %v7009_v53 = vld [vmem:[%s10405_s1 + $0xdf4] sm:$0xf]  ;;  %v4608_v63 = vor.u32 %v6602_v55, %v4607_v54  ;;  %v6582_v55 = vld [vmem:[%s10405_s1 + $0x98] sm:$0xf0] }
 0x172   :  { %3809 = vmatpush.bf16.msra.mxu2 %v5584_v62  ;;  %v5941_v62 = vld [vmem:[%s10405_s1 + $0xbac] sm:$0xf0] }
 0x173   :  { %3818 = vmatpush.bf16.msrb.mxu3 %v5824_v34  ;;  %v6084_v34 = vor.u32 %v6969_v57, %v6081_v58  ;;  %v5944_v12 = vor.u32 %v6934_v33, %v5941_v62  ;;  %v3565_v24 = vadd.f32 %v3564_v41, %v3552_v8  ;;  %v5924_v41 = vor.u32 %v6929_v13, %v5921_v30  ;;  %v6722_v57 = vld [vmem:[%s10405_s1 + $0x4f8] sm:$0xf0]  ;;  %v4727_v33 = vld [vmem:[%s10405_s1 + $0x218] sm:$0xf]  ;;  %v4587_v8 = vld [vmem:[%s10405_s1 + $0x100] sm:$0xf] }
 0x174   :  { %3830 = vmatpush.bf16.msra.mxu0 %v6004_v19  ;;  %v6401_v19 = vld [vmem:[%s10405_s1 + $0xf44] sm:$0xf0]  ;;  %v5904_v58 = vor.u32 %v6924_v39, %v5901_v44  ;;  %v5047_v30 = vld [vmem:[%s10405_s1 + $0x498] sm:$0xf]  ;;  %v5027_v44 = vld [vmem:[%s10405_s1 + $0x470] sm:$0xf] }
 0x175   :  { %3810 = vmatmul.bf16.vlgmr.msra.gmra.mxu2 %v7561_v1  ;;  %3845 = vmatpush.bf16.msrb.mxu1 %v6124_v17  ;;  %v7014_v17 = vld [vmem:[%s10405_s1 + $0xe1c] sm:$0xf]  ;;  %v3578_v14 = vadd.f32 %v3577_v40, %v3565_v24  ;;  %v6404_v38 = vor.u32 %v7049_v15, %v6401_v19  ;;  %v6381_v40 = vld [vmem:[%s10405_s1 + $0xf1c] sm:$0xf0]  ;;  %v4707_v15 = vld [vmem:[%s10405_s1 + $0x1f0] sm:$0xf] }
 0x176   :  { %3854 = vmatpush.bf16.msrb.mxu2 %v6364_v5  ;;  %v6281_v5 = vld [vmem:[%s10405_s1 + $0xe54] sm:$0xf0]  ;;  %v6264_v50 = vor.u32 %v7014_v17, %v6261_v36  ;;  %v6384_v56 = vor.u32 %v7044_v46, %v6381_v40  ;;  %v6627_v19 = vld [vmem:[%s10405_s1 + $0x200] sm:$0xf0] }
 0x177   :  { %3819 = vmatpush.bf16.msrb.mxu3 %v5804_v31  ;;  %v6284_v29 = vor.u32 %v7019_v4, %v6281_v5  ;;  %v4767_v31 = vld [vmem:[%s10405_s1 + $0x268] sm:$0xf]  ;;  %v7004_v4 = vld [vmem:[%s10405_s1 + $0xdcc] sm:$0xf]  ;;  %v6221_v5 = vld [vmem:[%s10405_s1 + $0xddc] sm:$0xf0]  ;;  %v4708_v17 = vor.u32 %v6627_v19, %v4707_v15 }
 0x178   :  { %3831 = vmatpush.bf16.msra.mxu0 %v5984_v37  ;;  %v6064_v37 = vor.u32 %v6964_v10, %v6061_v11  ;;  %v4927_v10 = vld [vmem:[%s10405_s1 + $0x3a8] sm:$0xf]  ;;  %v6682_v11 = vld [vmem:[%s10405_s1 + $0x3b8] sm:$0xf0]  ;;  %v6224_v13 = vor.u32 %v7004_v4, %v6221_v5  ;;  %v6707_v46 = vld [vmem:[%s10405_s1 + $0x480] sm:$0xf0] }
 0x179   :  { %3846 = vmatpush.bf16.msrb.mxu1 %v6104_v45  ;;  %v3553_v45 = vpop.f32.mrf.mxu2  ;;  %v4928_v27 = vor.u32 %v6682_v11, %v4927_v10  ;;  %v4887_v40 = vld [vmem:[%s10405_s1 + $0x358] sm:$0xf]  ;;  %v6612_v4 = vld [vmem:[%s10405_s1 + $0x188] sm:$0xf0]  ;;  %v6697_v10 = vld [vmem:[%s10405_s1 + $0x430] sm:$0xf0] }
 0x17a   :  { %3855 = vmatpush.bf16.msrb.mxu2 %v6344_v28  ;;  %v3566_v28 = vpop.f32.mrf.mxu3  ;;  %v6617_v45 = vld [vmem:[%s10405_s1 + $0x1b0] sm:$0xf0]  ;;  %v4847_v11 = vld [vmem:[%s10405_s1 + $0x308] sm:$0xf]  ;;  %v4627_v15 = vld [vmem:[%s10405_s1 + $0x150] sm:$0xf] }
 0x17b   :  { %3820 = vmatpush.bf16.msrb.mxu3 %v5784_v49  ;;  %v9631_v49 = vadd.f32 %v9510_v16, %v3578_v14  ;;  %v6241_v16 = vld [vmem:[%s10405_s1 + $0xe04] sm:$0xf0]  ;;  %v4567_v28 = vld [vmem:[%s10405_s1 + $0xd8] sm:$0xf]  ;;  %v6622_v14 = vld [vmem:[%s10405_s1 + $0x1d8] sm:$0xf0] }
 0x17c   :  { %3832 = vmatpush.bf16.msra.mxu0 %v5964_v48  ;;  %v5087_v48 = vld [vmem:[%s10405_s1 + $0x4e8] sm:$0xf]  ;;  %v6244_v62 = vor.u32 %v7009_v53, %v6241_v16  ;;  %v4667_v53 = vld [vmem:[%s10405_s1 + $0x1a0] sm:$0xf]  ;;  %v5028_v16 = vor.u32 %v6707_v46, %v5027_v44  ;;  %v4467_v46 = vld [vmem:[%s10405_s1 + $0x10] sm:$0xf] }
 0x17d   :  { %3847 = vmatpush.bf16.msrb.mxu1 %v6084_v34  ;;  %v5088_v7 = vor.u32 %v6722_v57, %v5087_v48  ;;  %v5067_v34 = vld [vmem:[%s10405_s1 + $0x4c0] sm:$0xf] }
 0x17e   :  { %3856 = vmatpush.bf16.msrb.mxu2 %v6324_v42  ;;  %v4768_v42 = vor.u32 %v6642_v32, %v4767_v31  ;;  %v5068_v24 = vor.u32 %v6717_v9, %v5067_v34  ;;  %v6712_v31 = vld [vmem:[%s10405_s1 + $0x4a8] sm:$0xf0]  ;;  %v4907_v32 = vld [vmem:[%s10405_s1 + $0x380] sm:$0xf] }
 0x17f   :  { %3821 = vmatpush.bf16.msrb.mxu3 %v5764_v3  ;;  %v6632_v3 = vld [vmem:[%s10405_s1 + $0x228] sm:$0xf0]  ;;  %v4987_v34 = vld [vmem:[%s10405_s1 + $0x420] sm:$0xf] }
 0x180   :  { %3833 = vmatpush.bf16.msra.mxu0 %v5944_v12  ;;  %v4728_v12 = vor.u32 %v6632_v3, %v4727_v33  ;;  %v6667_v33 = vld [vmem:[%s10405_s1 + $0x340] sm:$0xf0]  ;;  %v4647_v3 = vld [vmem:[%s10405_s1 + $0x178] sm:$0xf] }
 0x181   :  { %3848 = vmatpush.bf16.msrb.mxu1 %v6064_v37  ;;  %v9720_v37 = vpop.f32.mrf.mxu1 }
 0x182   :  { %3857 = vmatpush.bf16.msrb.mxu2 %v6304_v59  ;;  %v4748_v59 = vor.u32 %v6637_v52, %v4747_v51 }
 0x183   :  { %3822 = vmatpush.bf16.msrb.mxu3 %v5744_v6  ;;  %v6677_v6 = vld [vmem:[%s10405_s1 + $0x390] sm:$0xf0] }
 0x184   :  { %3834 = vmatpush.bf16.msra.mxu0 %v5924_v41  ;;  %3849 = vmatmul.bf16.vlgmr.msrb.gmra.mxu1 %v9097_v25  ;;  %v4908_v39 = vor.u32 %v6677_v6, %v4907_v32  ;;  %v4547_v41 = vld [vmem:[%s10405_s1 + $0xb0] sm:$0xf]  ;;  %v5407_v32 = vld [vmem:[%s10405_s1 + $0x768] sm:$0xf]  ;;  %v6802_v6 = vld [vmem:[%s10405_s1 + $0x778] sm:$0xf0] }
 0x185   :  { %3893 = vmatpush.bf16.msra.mxu1 %v4768_v42  ;;  %v6587_v42 = vld [vmem:[%s10405_s1 + $0xc0] sm:$0xf0]  ;;  %v5408_v44 = vor.u32 %v6802_v6, %v5407_v32  ;;  %v5547_v32 = vld [vmem:[%s10405_s1 + $0x880] sm:$0xf]  ;;  %v6837_v6 = vld [vmem:[%s10405_s1 + $0x890] sm:$0xf0] }
 0x186   :  { %3858 = vmatpush.bf16.msrb.mxu2 %v6284_v29  ;;  %3823 = vmatmul.bf16.vlgmr.msrb.gmra.mxu3 %v9076_v43  ;;  %v6597_v43 = vld [vmem:[%s10405_s1 + $0x110] sm:$0xf0]  ;;  %v6592_v29 = vld [vmem:[%s10405_s1 + $0xe8] sm:$0xf0]  ;;  %v4548_v52 = vor.u32 %v6587_v42, %v4547_v41 }
 0x187   :  { %3873 = vmatpush.bf16.msra.mxu3 %v6404_v38  ;;  %v4588_v25 = vor.u32 %v6597_v43, %v4587_v8  ;;  %v4568_v36 = vor.u32 %v6592_v29, %v4567_v28  ;;  %v5048_v38 = vor.u32 %v6712_v31, %v5047_v30  ;;  %v4507_v43 = vld [vmem:[%s10405_s1 + $0x60] sm:$0xf]  ;;  %v6572_v28 = vld [vmem:[%s10405_s1 + $0x48] sm:$0xf0]  ;;  %v4988_v29 = vor.u32 %v6697_v10, %v4987_v34  ;;  %v4967_v31 = vld [vmem:[%s10405_s1 + $0x3f8] sm:$0xf] }
 0x188   :  { %3835 = vmatpush.bf16.msra.mxu0 %v5904_v58  ;;  %v3629_v57 = vpop.f32.mrf.mxu0  ;;  %v6702_v58 = vld [vmem:[%s10405_s1 + $0x458] sm:$0xf0]  ;;  %v6757_v34 = vld [vmem:[%s10405_s1 + $0x610] sm:$0xf0] }
 0x189   :  { %3894 = vmatpush.bf16.msra.mxu1 %v4748_v59  ;;  %v3616_v48 = vpop.f32.mrf.mxu3  ;;  %v4867_v59 = vld [vmem:[%s10405_s1 + $0x330] sm:$0xf]  ;;  %v3644_v5 = vpop.f32.mrf.mxu1  ;;  %v6877_v10 = vld [vmem:[%s10405_s1 + $0x9d0] sm:$0xf0] }
 0x18a   :  { %3859 = vmatpush.bf16.msrb.mxu2 %v6264_v50  ;;  %v6672_v50 = vld [vmem:[%s10405_s1 + $0x368] sm:$0xf0]  ;;  %v4868_v8 = vor.u32 %v6667_v33, %v4867_v59 }
 0x18b   :  { %3874 = vmatpush.bf16.msra.mxu3 %v6384_v56  ;;  %3836 = vmatmul.bf16.vlgmr.msra.gmra.mxu0 %v9046_v18  ;;  %v4687_v18 = vld [vmem:[%s10405_s1 + $0x1c8] sm:$0xf]  ;;  %v4888_v54 = vor.u32 %v6672_v50, %v4887_v40  ;;  %v6567_v40 = vld [vmem:[%s10405_s1 + $0x20] sm:$0xf0]  ;;  %v4947_v50 = vld [vmem:[%s10405_s1 + $0x3d0] sm:$0xf] }
 0x18c   :  { %3880 = vmatpush.bf16.msrb.mxu0 %v4608_v63  ;;  %v4688_v51 = vor.u32 %v6622_v14, %v4687_v18  ;;  %v5007_v56 = vld [vmem:[%s10405_s1 + $0x448] sm:$0xf]  ;;  %v6692_v18 = vld [vmem:[%s10405_s1 + $0x408] sm:$0xf0]  ;;  %v4827_v14 = vld [vmem:[%s10405_s1 + $0x2e0] sm:$0xf]  ;;  %v4468_v59 = vor.u32 %v6567_v40, %v4467_v46 }
 0x18d   :  { %3895 = vmatpush.bf16.msra.mxu1 %v4728_v12  ;;  %v6662_v12 = vld [vmem:[%s10405_s1 + $0x318] sm:$0xf0]  ;;  %v5527_v46 = vld [vmem:[%s10405_s1 + $0x858] sm:$0xf]  ;;  %v6832_v40 = vld [vmem:[%s10405_s1 + $0x868] sm:$0xf0] }
 0x18e   :  { %3860 = vmatpush.bf16.msrb.mxu2 %v6244_v62  ;;  %v4668_v62 = vor.u32 %v6617_v45, %v4667_v53  ;;  %v4848_v30 = vor.u32 %v6662_v12, %v4847_v11  ;;  %v6687_v45 = vld [vmem:[%s10405_s1 + $0x3e0] sm:$0xf0]  ;;  %v5567_v12 = vld [vmem:[%s10405_s1 + $0x8a8] sm:$0xf] }
 0x18f   :  { %3919 = vmatpush.bf16.msrb.mxu3 %v5088_v7  ;;  %v5008_v7 = vor.u32 %v6702_v58, %v5007_v56  ;;  %v6882_v58 = vld [vmem:[%s10405_s1 + $0x9f8] sm:$0xf0] }
 0x190   :  { %3881 = vmatpush.bf16.msrb.mxu0 %v4588_v25  ;;  %v3603_v9 = vpop.f32.mrf.mxu2  ;;  %v4648_v25 = vor.u32 %v6612_v4, %v4647_v3  ;;  %v5367_v3 = vld [vmem:[%s10405_s1 + $0x718] sm:$0xf]  ;;  %v6792_v4 = vld [vmem:[%s10405_s1 + $0x728] sm:$0xf0] }
 0x191   :  { %3896 = vmatpush.bf16.msra.mxu1 %v4708_v17  ;;  %v3631_v17 = vpop.f32.mrf.mxu0  ;;  %v5368_v11 = vor.u32 %v6792_v4, %v5367_v3  ;;  %v5147_v3 = vld [vmem:[%s10405_s1 + $0x560] sm:$0xf] }
 0x192   :  { %3861 = vmatpush.bf16.msrb.mxu2 %v6224_v13  ;;  %v3604_v13 = vadd.f32 %v3603_v9, %v9631_v49  ;;  %v5707_v9 = vld [vmem:[%s10405_s1 + $0x9c0] sm:$0xf]  ;;  %v5327_v17 = vld [vmem:[%s10405_s1 + $0x6c8] sm:$0xf] }
 0x193   :  { %3920 = vmatpush.bf16.msrb.mxu3 %v5068_v24  ;;  %v6607_v24 = vld [vmem:[%s10405_s1 + $0x160] sm:$0xf0] }
 0x194   :  { %3882 = vmatpush.bf16.msrb.mxu0 %v4568_v36  ;;  %v3617_v49 = vadd.f32 %v3616_v48, %v3604_v13  ;;  %v3618_v36 = vpop.f32.mrf.mxu3  ;;  %v4628_v41 = vor.u32 %v6607_v24, %v4627_v15  ;;  %v6762_v48 = vld [vmem:[%s10405_s1 + $0x638] sm:$0xf0]  ;;  %v6787_v15 = vld [vmem:[%s10405_s1 + $0x700] sm:$0xf0]  ;;  %v5708_v24 = vor.u32 %v6877_v10, %v5707_v9  ;;  %v5487_v9 = vld [vmem:[%s10405_s1 + $0x808] sm:$0xf] }
 0x195   :  { %3862 = vmatmul.bf16.vlgmr.msrb.gmra.mxu2 %v9058_v35  ;;  %v4527_v35 = vld [vmem:[%s10405_s1 + $0x88] sm:$0xf]  ;;  %3897 = vmatpush.bf16.msra.mxu1 %v4688_v51  ;;  %v6822_v10 = vld [vmem:[%s10405_s1 + $0x818] sm:$0xf0] }
 0x196   :  { %3906 = vmatpush.bf16.msra.mxu2 %v4928_v27  ;;  %6412 = vmatmul.msk.bf16.vlgmr.msra.gmra.mxu3 %vm3201_vm0, %v9196_v61  ;;  %v4528_v63 = vor.u32 %v6582_v55, %v4527_v35  ;;  %v6577_v61 = vld [vmem:[%s10405_s1 + $0x70] sm:$0xf0]  ;;  %v4487_v27 = vld [vmem:[%s10405_s1 + $0x38] sm:$0xf]  ;;  %v5247_v55 = vld [vmem:[%s10405_s1 + $0x628] sm:$0xf] }
 0x197   :  { %3921 = vmatpush.bf16.msrb.mxu3 %v5048_v38  ;;  %v4508_v19 = vor.u32 %v6577_v61, %v4507_v43  ;;  %v6657_v38 = vld [vmem:[%s10405_s1 + $0x2f0] sm:$0xf0]  ;;  %v4488_v42 = vor.u32 %v6572_v28, %v4487_v27  ;;  %v4807_v35 = vld [vmem:[%s10405_s1 + $0x2b8] sm:$0xf]  ;;  %v5248_v5 = vor.u32 %v6762_v48, %v5247_v55  ;;  %v6647_v43 = vld [vmem:[%s10405_s1 + $0x2a0] sm:$0xf0] }
 0x198   :  { %3883 = vmatpush.bf16.msrb.mxu0 %v4548_v52  ;;  %v4968_v52 = vor.u32 %v6692_v18, %v4967_v31  ;;  %v4828_v53 = vor.u32 %v6657_v38, %v4827_v14  ;;  %v3605_v56 = vpop.f32.mrf.mxu2  ;;  %v5227_v61 = vld [vmem:[%s10405_s1 + $0x600] sm:$0xf]  ;;  %v5207_v27 = vld [vmem:[%s10405_s1 + $0x5d8] sm:$0xf]  ;;  %v5187_v14 = vld [vmem:[%s10405_s1 + $0x5b0] sm:$0xf] }
 0x199   :  { %3898 = vmatpush.bf16.msra.mxu1 %v4668_v62  ;;  %v4948_v62 = vor.u32 %v6687_v45, %v4947_v50  ;;  %v5307_v50 = vld [vmem:[%s10405_s1 + $0x6a0] sm:$0xf] }
 0x19a   :  { %3907 = vmatpush.bf16.msra.mxu2 %v4908_v39  ;;  %v3630_v39 = vadd.f32 %v3629_v57, %v3617_v49  ;;  %v5727_v57 = vld [vmem:[%s10405_s1 + $0x9e8] sm:$0xf]  ;;  %v6752_v49 = vld [vmem:[%s10405_s1 + $0x5e8] sm:$0xf0] }
 0x19b   :  { %3922 = vmatpush.bf16.msrb.mxu3 %v5028_v16  ;;  %v5387_v16 = vld [vmem:[%s10405_s1 + $0x740] sm:$0xf]  ;;  %v5208_v36 = vor.u32 %v6752_v49, %v5207_v27  ;;  %v5488_v27 = vor.u32 %v6822_v10, %v5487_v9  ;;  %v5607_v49 = vld [vmem:[%s10405_s1 + $0x8f8] sm:$0xf] }
 0x19c   :  { %3884 = vmatpush.bf16.msrb.mxu0 %v4528_v63  ;;  %v9832_v51 = vadd.f32 %v9720_v37, %v3630_v39  ;;  %v6652_v37 = vld [vmem:[%s10405_s1 + $0x2c8] sm:$0xf0]  ;;  %v6747_v39 = vld [vmem:[%s10405_s1 + $0x5c0] sm:$0xf0] }
 0x19d   :  { %3899 = vmatpush.bf16.msra.mxu1 %v4648_v25  ;;  %v4808_v63 = vor.u32 %v6652_v37, %v4807_v35  ;;  %v5347_v25 = vld [vmem:[%s10405_s1 + $0x6f0] sm:$0xf]  ;;  %v5647_v35 = vld [vmem:[%s10405_s1 + $0x948] sm:$0xf]  ;;  %v6862_v37 = vld [vmem:[%s10405_s1 + $0x958] sm:$0xf0] }
 0x19e   :  { %3908 = vmatpush.bf16.msra.mxu2 %v4888_v54  ;;  %v6797_v54 = vld [vmem:[%s10405_s1 + $0x750] sm:$0xf0]  ;;  %v5348_v31 = vor.u32 %v6787_v15, %v5347_v25  ;;  %v5127_v15 = vld [vmem:[%s10405_s1 + $0x538] sm:$0xf] }
 0x19f   :  { %3923 = vmatpush.bf16.msrb.mxu3 %v5008_v7  ;;  %v5388_v33 = vor.u32 %v6797_v54, %v5387_v16  ;;  %v5728_v7 = vor.u32 %v6882_v58, %v5727_v57  ;;  %v5167_v16 = vld [vmem:[%s10405_s1 + $0x588] sm:$0xf]  ;;  %v5528_v54 = vor.u32 %v6832_v40, %v5527_v46  ;;  %v5507_v57 = vld [vmem:[%s10405_s1 + $0x830] sm:$0xf]  ;;  %v6827_v58 = vld [vmem:[%s10405_s1 + $0x840] sm:$0xf0] }
 0x1a0   :  { %3885 = vmatpush.bf16.msrb.mxu0 %v4508_v19  ;;  %v5228_v19 = vor.u32 %v6757_v34, %v5227_v61  ;;  %v5587_v40 = vld [vmem:[%s10405_s1 + $0x8d0] sm:$0xf] }
 0x1a1   :  { %3900 = vmatpush.bf16.msra.mxu1 %v4628_v41  ;;  %v9927_v38 = vpop.f32.mrf.mxu1  ;;  %v5667_v41 = vld [vmem:[%s10405_s1 + $0x970] sm:$0xf] }
 0x1a2   :  { %3909 = vmatpush.bf16.msra.mxu2 %v4868_v8  ;;  %v4787_v8 = vld [vmem:[%s10405_s1 + $0x290] sm:$0xf] }
 0x1a3   :  { %3924 = vmatpush.bf16.msrb.mxu3 %v4988_v29  ;;  %v4788_v13 = vor.u32 %v6647_v43, %v4787_v8  ;;  %v5687_v29 = vld [vmem:[%s10405_s1 + $0x998] sm:$0xf]  ;;  %v5627_v8 = vld [vmem:[%s10405_s1 + $0x920] sm:$0xf]  ;;  %v6857_v43 = vld [vmem:[%s10405_s1 + $0x930] sm:$0xf0] }
 0x1a4   :  { %3886 = vmatpush.bf16.msrb.mxu0 %v4488_v42  ;;  %3901 = vmatmul.bf16.vlgmr.msra.gmra.mxu1 %v7477_v26  ;;  %v6842_v26 = vld [vmem:[%s10405_s1 + $0x8b8] sm:$0xf0]  ;;  %v6867_v42 = vld [vmem:[%s10405_s1 + $0x980] sm:$0xf0]  ;;  %v5628_v25 = vor.u32 %v6857_v43, %v5627_v8  ;;  %v5987_v43 = vld [vmem:[%s10405_s1 + $0xbf0] sm:$0xf] }
 0x1a5   :  { %3945 = vmatpush.bf16.msrb.mxu1 %v5408_v44  ;;  %v5568_v28 = vor.u32 %v6842_v26, %v5567_v12  ;;  %v5668_v45 = vor.u32 %v6867_v42, %v5667_v41  ;;  %v5267_v12 = vld [vmem:[%s10405_s1 + $0x650] sm:$0xf]  ;;  %v6767_v26 = vld [vmem:[%s10405_s1 + $0x660] sm:$0xf0]  ;;  %v6027_v41 = vld [vmem:[%s10405_s1 + $0xc40] sm:$0xf] }
 0x1a6   :  { %3910 = vmatpush.bf16.msra.mxu2 %v4848_v30  ;;  %v6872_v30 = vld [vmem:[%s10405_s1 + $0x9a8] sm:$0xf0]  ;;  %v6957_v42 = vld [vmem:[%s10405_s1 + $0xc50] sm:$0xf0]  ;;  %v7002_v8 = vld [vmem:[%s10405_s1 + $0xdb8] sm:$0xf0] }
 0x1a7   :  { %3925 = vmatpush.bf16.msrb.mxu3 %v4968_v52  ;;  %v5688_v18 = vor.u32 %v6872_v30, %v5687_v29  ;;  %v6777_v52 = vld [vmem:[%s10405_s1 + $0x6b0] sm:$0xf0]  ;;  %v6852_v29 = vld [vmem:[%s10405_s1 + $0x908] sm:$0xf0] }
 0x1a8   :  { %3887 = vmatpush.bf16.msrb.mxu0 %v4468_v59  ;;  %v3681_v56 = vpop.f32.mrf.mxu0  ;;  %v5308_v48 = vor.u32 %v6777_v52, %v5307_v50  ;;  %v5287_v59 = vld [vmem:[%s10405_s1 + $0x678] sm:$0xf]  ;;  %v6847_v50 = vld [vmem:[%s10405_s1 + $0x8e0] sm:$0xf0] }
 0x1a9   :  { %3946 = vmatpush.bf16.msrb.mxu1 %v5388_v33  ;;  %v3668_v55 = vpop.f32.mrf.mxu3  ;;  %v6772_v33 = vld [vmem:[%s10405_s1 + $0x688] sm:$0xf0]  ;;  %v3696_v4 = vpop.f32.mrf.mxu1  ;;  %v5447_v52 = vld [vmem:[%s10405_s1 + $0x7b8] sm:$0xf] }
 0x1aa   :  { %3911 = vmatpush.bf16.msra.mxu2 %v4828_v53  ;;  %v5188_v53 = vor.u32 %v6747_v39, %v5187_v14  ;;  %v5288_v34 = vor.u32 %v6772_v33, %v5287_v59  ;;  %v6727_v39 = vld [vmem:[%s10405_s1 + $0x520] sm:$0xf0]  ;;  %v5427_v59 = vld [vmem:[%s10405_s1 + $0x790] sm:$0xf]  ;;  %v6347_v4 = vld [vmem:[%s10405_s1 + $0xec0] sm:$0xf] }
 0x1ab   :  { %3926 = vmatpush.bf16.msrb.mxu3 %v4948_v62  ;;  %3888 = vmatmul.bf16.vlgmr.msrb.gmra.mxu0 %v7466_v21  ;;  %v6782_v21 = vld [vmem:[%s10405_s1 + $0x6d8] sm:$0xf0]  ;;  %v6807_v33 = vld [vmem:[%s10405_s1 + $0x7a0] sm:$0xf0] }
 0x1ac   :  { %3932 = vmatpush.bf16.msra.mxu0 %v5248_v5  ;;  %v5328_v44 = vor.u32 %v6782_v21, %v5327_v17  ;;  %v5508_v5 = vor.u32 %v6827_v58, %v5507_v57  ;;  %v6817_v17 = vld [vmem:[%s10405_s1 + $0x7f0] sm:$0xf0] }
 0x1ad   :  { %3947 = vmatpush.bf16.msrb.mxu1 %v5368_v11 }
 0x1ae   :  { %3912 = vmatpush.bf16.msra.mxu2 %v4808_v63  ;;  %3927 = vmatmul.bf16.vlgmr.msrb.gmra.mxu3 %v7468_v22  ;;  %v5548_v22 = vor.u32 %v6837_v6, %v5547_v32  ;;  %v5648_v63 = vor.u32 %v6862_v37, %v5647_v35  ;;  %v5268_v32 = vor.u32 %v6767_v26, %v5267_v12  ;;  %v5467_v6 = vld [vmem:[%s10405_s1 + $0x7e0] sm:$0xf]  ;;  %v7042_v35 = vld [vmem:[%s10405_s1 + $0xef8] sm:$0xf0]  ;;  %v5847_v12 = vld [vmem:[%s10405_s1 + $0xad8] sm:$0xf] }
 0x1af   :  { %3971 = vmatpush.bf16.msra.mxu3 %v5728_v7  ;;  %v6737_v7 = vld [vmem:[%s10405_s1 + $0x570] sm:$0xf0]  ;;  %v5468_v46 = vor.u32 %v6817_v17, %v5467_v6  ;;  %v6912_v26 = vld [vmem:[%s10405_s1 + $0xae8] sm:$0xf0]  ;;  %v7027_v17 = vld [vmem:[%s10405_s1 + $0xe80] sm:$0xf0] }
 0x1b0   :  { %3933 = vmatpush.bf16.msra.mxu0 %v5228_v19  ;;  %v3655_v61 = vpop.f32.mrf.mxu2  ;;  %v6962_v19 = vld [vmem:[%s10405_s1 + $0xc78] sm:$0xf0]  ;;  %v3683_v30 = vpop.f32.mrf.mxu0 }
 0x1b1   :  { %3948 = vmatpush.bf16.msrb.mxu1 %v5348_v31  ;;  %v3656_v11 = vadd.f32 %v3655_v61, %v9832_v51  ;;  %v6047_v51 = vld [vmem:[%s10405_s1 + $0xc68] sm:$0xf]  ;;  %v3670_v31 = vpop.f32.mrf.mxu3  ;;  %v6947_v61 = vld [vmem:[%s10405_s1 + $0xc00] sm:$0xf0]  ;;  %v5827_v30 = vld [vmem:[%s10405_s1 + $0xab0] sm:$0xf] }
 0x1b2   :  { %3913 = vmatpush.bf16.msra.mxu2 %v4788_v13  ;;  %v5148_v13 = vor.u32 %v6737_v7, %v5147_v3  ;;  %v6917_v3 = vld [vmem:[%s10405_s1 + $0xb10] sm:$0xf0]  ;;  %v6307_v31 = vld [vmem:[%s10405_s1 + $0xe70] sm:$0xf] }
 0x1b3   :  { %3972 = vmatpush.bf16.msra.mxu3 %v5708_v24  ;;  %v3669_v24 = vadd.f32 %v3668_v55, %v3656_v11  ;;  %v5588_v55 = vor.u32 %v6847_v50, %v5587_v40  ;;  %v7037_v7 = vld [vmem:[%s10405_s1 + $0xed0] sm:$0xf0]  ;;  %v7022_v50 = vld [vmem:[%s10405_s1 + $0xe58] sm:$0xf0] }
 0x1b4   :  { %3934 = vmatpush.bf16.msra.mxu0 %v5208_v36  ;;  %v6048_v36 = vor.u32 %v6962_v19, %v6047_v51  ;;  %v6348_v10 = vor.u32 %v7037_v7, %v6347_v4  ;;  %v7032_v51 = vld [vmem:[%s10405_s1 + $0xea8] sm:$0xf0]  ;;  %v6187_v19 = vld [vmem:[%s10405_s1 + $0xd80] sm:$0xf]  ;;  %v6927_v4 = vld [vmem:[%s10405_s1 + $0xb60] sm:$0xf0] }
 0x1b5   :  { %3914 = vmatmul.bf16.vlgmr.msra.gmra.mxu2 %v7464_v20  ;;  %v6742_v20 = vld [vmem:[%s10405_s1 + $0x598] sm:$0xf0]  ;;  %3949 = vmatpush.bf16.msrb.mxu1 %v5328_v44  ;;  %v3682_v21 = vadd.f32 %v3681_v56, %v3669_v24  ;;  %v6007_v56 = vld [vmem:[%s10405_s1 + $0xc18] sm:$0xf]  ;;  %v6997_v24 = vld [vmem:[%s10405_s1 + $0xd90] sm:$0xf0] }
 0x1b6   :  { %3958 = vmatpush.bf16.msrb.mxu2 %v5568_v28  ;;  %v5168_v62 = vor.u32 %v6742_v20, %v5167_v16  ;;  %v6732_v28 = vld [vmem:[%s10405_s1 + $0x548] sm:$0xf0]  ;;  %v6922_v16 = vld [vmem:[%s10405_s1 + $0xb38] sm:$0xf0]  ;;  %v6367_v20 = vld [vmem:[%s10405_s1 + $0xee8] sm:$0xf] }
 0x1b7   :  { %3973 = vmatpush.bf16.msra.mxu3 %v5688_v18  ;;  %v5107_v18 = vld [vmem:[%s10405_s1 + $0x510] sm:$0xf]  ;;  %v5128_v14 = vor.u32 %v6732_v28, %v5127_v15  ;;  %v10037_v44 = vadd.f32 %v9927_v38, %v3682_v21  ;;  %v6812_v38 = vld [vmem:[%s10405_s1 + $0x7c8] sm:$0xf0]  ;;  %v5988_v15 = vor.u32 %v6947_v61, %v5987_v43  ;;  %v5848_v28 = vor.u32 %v6912_v26, %v5847_v12  ;;  %v6167_v21 = vld [vmem:[%s10405_s1 + $0xd58] sm:$0xf] }
 0x1b8   :  { %3935 = vmatpush.bf16.msra.mxu0 %v5188_v53  ;;  %v3657_v53 = vpop.f32.mrf.mxu2  ;;  %v5108_v37 = vor.u32 %v6727_v39, %v5107_v18  ;;  %v5448_v57 = vor.u32 %v6812_v38, %v5447_v52  ;;  %v5947_v18 = vld [vmem:[%s10405_s1 + $0xba0] sm:$0xf]  ;;  %v6308_v39 = vor.u32 %v7027_v17, %v6307_v31  ;;  %v6147_v52 = vld [vmem:[%s10405_s1 + $0xd30] sm:$0xf]  ;;  %v6892_v43 = vld [vmem:[%s10405_s1 + $0xa48] sm:$0xf0] }
 0x1b9   :  { %3950 = vmatpush.bf16.msrb.mxu1 %v5308_v48  ;;  %v6952_v48 = vld [vmem:[%s10405_s1 + $0xc28] sm:$0xf0]  ;;  %v6987_v53 = vld [vmem:[%s10405_s1 + $0xd40] sm:$0xf0]  ;;  %v6247_v61 = vld [vmem:[%s10405_s1 + $0xdf8] sm:$0xf] }
 0x1ba   :  { %3959 = vmatpush.bf16.msrb.mxu2 %v5548_v22  ;;  %v5608_v22 = vor.u32 %v6852_v29, %v5607_v49  ;;  %v6188_v29 = vor.u32 %v6997_v24, %v6187_v19  ;;  %v7060_v26 = vld [vmem:[%s10407_s3 + $0x38] sm:$0xff]  ;;  %v5747_v24 = vld [vmem:[%s10405_s1 + $0xa10] sm:$0xf] }
 0x1bb   :  { %3974 = vmatpush.bf16.msra.mxu3 %v5668_v45  ;;  %v5887_v45 = vld [vmem:[%s10405_s1 + $0xb28] sm:$0xf]  ;;  %v6407_v31 = vld [vmem:[%s10405_s1 + $0xf38] sm:$0xf] }
 0x1bc   :  { %3936 = vmatpush.bf16.msra.mxu0 %v5168_v62  ;;  %v5888_v58 = vor.u32 %v6922_v16, %v5887_v45  ;;  %v6368_v62 = vor.u32 %v7042_v35, %v6367_v20  ;;  %v5927_v16 = vld [vmem:[%s10405_s1 + $0xb78] sm:$0xf] }
 0x1bd   :  { %3951 = vmatpush.bf16.msrb.mxu1 %v5288_v34  ;;  %v5428_v34 = vor.u32 %v6807_v33, %v5427_v59  ;;  %v7017_v33 = vld [vmem:[%s10405_s1 + $0xe30] sm:$0xf0] }
 0x1be   :  { %3960 = vmatpush.bf16.msrb.mxu2 %v5528_v54  ;;  %v6028_v54 = vor.u32 %v6957_v42, %v6027_v41  ;;  %v5807_v42 = vld [vmem:[%s10405_s1 + $0xa88] sm:$0xf] }
 0x1bf   :  { %3975 = vmatpush.bf16.msra.mxu3 %v5648_v63  ;;  %v5867_v63 = vld [vmem:[%s10405_s1 + $0xb00] sm:$0xf] }
 0x1c0   :  { %3937 = vmatpush.bf16.msra.mxu0 %v5148_v13  ;;  %v5868_v9 = vor.u32 %v6917_v3, %v5867_v63  ;;  %v6327_v13 = vld [vmem:[%s10405_s1 + $0xe98] sm:$0xf]  ;;  %v6982_v63 = vld [vmem:[%s10405_s1 + $0xd18] sm:$0xf0]  ;;  %v5907_v3 = vld [vmem:[%s10405_s1 + $0xb50] sm:$0xf] }
 0x1c1   :  { %3952 = vmatpush.bf16.msrb.mxu1 %v5268_v32  ;;  %v6328_v49 = vor.u32 %v7032_v51, %v6327_v13  ;;  %v10137_v32 = vpop.f32.mrf.mxu1 }
 0x1c2   :  { %3961 = vmatpush.bf16.msrb.mxu2 %v5508_v5  ;;  %v6008_v5 = vor.u32 %v6952_v48, %v6007_v56  ;;  %v5787_v56 = vld [vmem:[%s10405_s1 + $0xa60] sm:$0xf]  ;;  %v6897_v48 = vld [vmem:[%s10405_s1 + $0xa70] sm:$0xf0] }
 0x1c3   :  { %3976 = vmatpush.bf16.msra.mxu3 %v5628_v25  ;;  %v10109_v25 = vpop.f32.mrf.mxu2 }
 0x1c4   :  { %3938 = vmatpush.bf16.msra.mxu0 %v5128_v14  ;;  %3953 = vmatmul.bf16.vlgmr.msrb.gmra.mxu1 %v7563_v2  ;;  %v6207_v2 = vld [vmem:[%s10405_s1 + $0xda8] sm:$0xf]  ;;  %v6937_v14 = vld [vmem:[%s10405_s1 + $0xbb0] sm:$0xf0] }
 0x1c5   :  { %3997 = vmatpush.bf16.msra.mxu1 %v6048_v36  ;;  %v6208_v11 = vor.u32 %v7002_v8, %v6207_v2  ;;  %v6992_v36 = vld [vmem:[%s10405_s1 + $0xd68] sm:$0xf0]  ;;  %v5948_v40 = vor.u32 %v6937_v14, %v5947_v18  ;;  %v5767_v8 = vld [vmem:[%s10405_s1 + $0xa38] sm:$0xf] }
 0x1c6   :  { %3962 = vmatpush.bf16.msrb.mxu2 %v5488_v27  ;;  %v5967_v27 = vld [vmem:[%s10405_s1 + $0xbc8] sm:$0xf]  ;;  %v6168_v41 = vor.u32 %v6992_v36, %v6167_v21  ;;  %v7076_v18 = vld [vmem:[%s10407_s3 + $0xb8] sm:$0xff] }
 0x1c7   :  { %3977 = vmatpush.bf16.msra.mxu3 %v5608_v22 }
 0x1c8   :  { %3939 = vmatpush.bf16.msra.mxu0 %v5108_v37  ;;  %v10181_v20 = vpop.f32.mrf.mxu0 }
 0x1c9   :  { %3998 = vmatpush.bf16.msra.mxu1 %v6028_v54  ;;  %v10173_v45 = vpop.f32.mrf.mxu3  ;;  %v6932_v54 = vld [vmem:[%s10405_s1 + $0xb88] sm:$0xf0] }
 0x1ca   :  { %3963 = vmatpush.bf16.msrb.mxu2 %v5468_v46  ;;  %v6287_v46 = vld [vmem:[%s10405_s1 + $0xe48] sm:$0xf]  ;;  %v5928_v59 = vor.u32 %v6932_v54, %v5927_v16  ;;  %v7057_v16 = vld [vmem:[%s10407_s3 + $0x20] sm:$0xff] }
 0x1cb   :  { %3978 = vmatpush.bf16.msra.mxu3 %v5588_v55  ;;  %3940 = vmatmul.bf16.vlgmr.msra.gmra.mxu0 %v7559_v0  ;;  %v6942_v0 = vld [vmem:[%s10405_s1 + $0xbd8] sm:$0xf0]  ;;  %v3709_v38 = vpop.f32.mrf.mxu2  ;;  %v6288_v37 = vor.u32 %v7022_v50, %v6287_v46  ;;  %v6148_v55 = vor.u32 %v6987_v53, %v6147_v52  ;;  %v7047_v46 = vld [vmem:[%s10405_s1 + $0xf20] sm:$0xf0]  ;;  %v7075_v52 = vld [vmem:[%s10407_s3 + $0xb0] sm:$0xff] }
 0x1cc   :  { %3984 = vmatpush.bf16.msrb.mxu0 %v5888_v58  ;;  %v5968_v6 = vor.u32 %v6942_v0, %v5967_v27  ;;  %v3748_v58 = vpop.f32.mrf.mxu1  ;;  %v6887_v27 = vld [vmem:[%s10405_s1 + $0xa20] sm:$0xf0]  ;;  %v6227_v0 = vld [vmem:[%s10405_s1 + $0xdd0] sm:$0xf]  ;;  %v7068_v53 = vld [vmem:[%s10407_s3 + $0x78] sm:$0xff] }
 0x1cd   :  { %3999 = vmatpush.bf16.msra.mxu1 %v6008_v5  ;;  %v5788_v5 = vor.u32 %v6897_v48, %v5787_v56  ;;  %v5748_v17 = vor.u32 %v6887_v27, %v5747_v24  ;;  %v7099_v38 = vld [vmem:[#allocation1] sm:$0xff]  ;;  %v7067_v56 = vld [vmem:[%s10407_s3 + $0x70] sm:$0xff] }
 0x1ce   :  { %3964 = vmatpush.bf16.msrb.mxu2 %v5448_v57  ;;  %3979 = vmatmul.bf16.vlgmr.msra.gmra.mxu3 %v7561_v1  ;;  %v6907_v1 = vld [vmem:[%s10405_s1 + $0xac0] sm:$0xf0]  ;;  %v6267_v57 = vld [vmem:[%s10405_s1 + $0xe20] sm:$0xf]  ;;  %v7101_v58 = vld [vmem:[#allocation1 + $0x12] sm:$0xff] }
 0x1cf   :  { %4023 = vmatpush.bf16.msrb.mxu3 %v6368_v62  ;;  %v5828_v22 = vor.u32 %v6907_v1, %v5827_v30  ;;  %v6127_v62 = vld [vmem:[%s10405_s1 + $0xd08] sm:$0xf]  ;;  %v6268_v7 = vor.u32 %v7017_v33, %v6267_v57  ;;  %v6972_v30 = vld [vmem:[%s10405_s1 + $0xcc8] sm:$0xf0]  ;;  %v7059_v1 = vld [vmem:[%s10407_s3 + $0x30] sm:$0xff] }
 0x1d0   :  { %3985 = vmatpush.bf16.msrb.mxu0 %v5868_v9  ;;  %v6128_v2 = vor.u32 %v6982_v63, %v6127_v62  ;;  %v7012_v9 = vld [vmem:[%s10405_s1 + $0xe08] sm:$0xf0]  ;;  %v3735_v13 = vpop.f32.mrf.mxu0  ;;  %v7056_v57 = vld [vmem:[%s10407_s3 + $0x18] sm:$0xff]  ;;  %v7073_v33 = vld [vmem:[%s10407_s3 + $0xa0] sm:$0xff] }
 0x1d1   :  { %4000 = vmatpush.bf16.msra.mxu1 %v5988_v15  ;;  %v3722_v12 = vpop.f32.mrf.mxu3  ;;  %v5768_v15 = vor.u32 %v6892_v43, %v5767_v8  ;;  %v6248_v51 = vor.u32 %v7012_v9, %v6247_v61  ;;  %v7066_v62 = vld [vmem:[%s10407_s3 + $0x68] sm:$0xff]  ;;  %v10310_v63 = vld [vmem:[%s10406_s2] sm:$0x1f]  ;;  %v7072_v8 = vld [vmem:[%s10407_s3 + $0x98] sm:$0xff] }
 0x1d2   :  { %3965 = vmatpush.bf16.msrb.mxu2 %v5428_v34  ;;  %v5908_v34 = vor.u32 %v6927_v4, %v5907_v3  ;;  %v617_v3 = vperm.slane %v10310_v63, 3  ;;  %v7065_v43 = vld [vmem:[%s10407_s3 + $0x60] sm:$0xff]  ;;  %v7054_v9 = vld [vmem:[%s10407_s3 + $0x8] sm:$0xff]  ;;  %v7063_v27 = vld [vmem:[%s10407_s3 + $0x50] sm:$0xff] }
 0x1d3   :  { %4024 = vmatpush.bf16.msrb.mxu3 %v6348_v10  ;;  %v6107_v10 = vld [vmem:[%s10405_s1 + $0xce0] sm:$0xf] }
 0x1d4   :  { %3986 = vmatpush.bf16.msrb.mxu0 %v5848_v28  ;;  %v7053_v13 = vld [vmem:[%s10407_s3] sm:$0xff] }
 0x1d5   :  { %3966 = vmatmul.bf16.vlgmr.msrb.gmra.mxu2 %v7554_v60  ;;  %v6902_v60 = vld [vmem:[%s10405_s1 + $0xa98] sm:$0xf0]  ;;  %4001 = vmatpush.bf16.msra.mxu1 %v5968_v6  ;;  %v7052_v6 = vld [vmem:[%s10405_s1 + $0xf48] sm:$0xf0] }
 0x1d6   :  { %4010 = vmatpush.bf16.msra.mxu2 %v6208_v11  ;;  %v5808_v35 = vor.u32 %v6902_v60, %v5807_v42  ;;  %v6977_v11 = vld [vmem:[%s10405_s1 + $0xcf0] sm:$0xf0]  ;;  %v6408_v14 = vor.u32 %v7052_v6, %v6407_v31  ;;  %v7058_v42 = vld [vmem:[%s10407_s3 + $0x28] sm:$0xff]  ;;  %v6387_v60 = vld [vmem:[%s10405_s1 + $0xf10] sm:$0xf] }
 0x1d7   :  { %4025 = vmatpush.bf16.msrb.mxu3 %v6328_v49  ;;  %v6108_v19 = vor.u32 %v6977_v11, %v6107_v10  ;;  %v7007_v49 = vld [vmem:[%s10405_s1 + $0xde0] sm:$0xf0]  ;;  %v6388_v54 = vor.u32 %v7047_v46, %v6387_v60  ;;  %v7071_v11 = vld [vmem:[%s10407_s3 + $0x90] sm:$0xff] }
 0x1d8   :  { %3987 = vmatpush.bf16.msrb.mxu0 %v5828_v22  ;;  %v10237_v28 = vpop.f32.mrf.mxu2  ;;  %v6228_v21 = vor.u32 %v7007_v49, %v6227_v0  ;;  %v7098_v22 = vld [vmem:[#allocation1 + $0x9] sm:$0xff]  ;;  %v7081_v10 = vld [vmem:[%s10407_s3 + $0xe0] sm:$0xff] }
 0x1d9   :  { %4002 = vmatpush.bf16.msra.mxu1 %v5948_v40  ;;  %v7079_v49 = vld [vmem:[%s10407_s3 + $0xd0] sm:$0xff]  ;;  %v7061_v6 = vld [vmem:[%s10407_s3 + $0x40] sm:$0xff] }
 0x1da   :  { %4011 = vmatpush.bf16.msra.mxu2 %v6188_v29  ;;  %v6087_v29 = vld [vmem:[%s10405_s1 + $0xcb8] sm:$0xf] }
 0x1db   :  { %4026 = vmatpush.bf16.msrb.mxu3 %v6308_v39  ;;  %v6088_v36 = vor.u32 %v6972_v30, %v6087_v29  ;;  %v6067_v39 = vld [vmem:[%s10405_s1 + $0xc90] sm:$0xf]  ;;  %v4049_v29 = vpack.c.bf16 %v8791_v23, %v8791_v23  ;;  %v7069_v30 = vld [vmem:[%s10407_s3 + $0x80] sm:$0xff]  ;;  %v7078_v23 = vld [vmem:[%s10407_s3 + $0xc8] sm:$0xff] }
 0x1dc   :  { %3988 = vmatpush.bf16.msrb.mxu0 %v5808_v35  ;;  %v7100_v35 = vld [vmem:[#allocation1 + $0x1b] sm:$0xff] }
 0x1dd   :  { %4003 = vmatpush.bf16.msra.mxu1 %v5928_v59  ;;  %v7083_v59 = vld [vmem:[%s10407_s3 + $0xf0] sm:$0xff] }
 0x1de   :  { %4012 = vmatpush.bf16.msra.mxu2 %v6168_v41  ;;  %v6967_v41 = vld [vmem:[%s10405_s1 + $0xca0] sm:$0xf0] }
 0x1df   :  { %4027 = vmatpush.bf16.msrb.mxu3 %v6288_v37  ;;  %v6068_v40 = vor.u32 %v6967_v41, %v6067_v39  ;;  %v7084_v37 = vld [vmem:[%s10407_s3 + $0xf8] sm:$0xff] }
 0x1e0   :  { %3989 = vmatpush.bf16.msrb.mxu0 %v5788_v5  ;;  %v3761_v50 = vpop.f32.mrf.mxu2  ;;  %v7055_v5 = vld [vmem:[%s10407_s3 + $0x10] sm:$0xff] }
 0x1e1   :  { %4004 = vmatpush.bf16.msra.mxu1 %v5908_v34  ;;  %v10293_v48 = vpop.f32.mrf.mxu1  ;;  %v3721_v34 = vadd.f32 %v10173_v45, %v617_v3  ;;  %v7064_v45 = vld [vmem:[%s10407_s3 + $0x58] sm:$0xff] }
 0x1e2   :  { %4013 = vmatpush.bf16.msra.mxu2 %v6148_v55  ;;  %v7074_v55 = vld [vmem:[%s10407_s3 + $0xa8] sm:$0xff] }
 0x1e3   :  { %4028 = vmatpush.bf16.msrb.mxu3 %v6268_v7  ;;  %v3734_v12 = vadd.f32 %v10181_v20, %v3721_v34  ;;  %v7070_v20 = vld [vmem:[%s10407_s3 + $0x88] sm:$0xff]  ;;  %v7088_v34 = vld [vmem:[%s10407_s3 + $0x118] sm:$0xff] }
 0x1e4   :  { %3990 = vmatpush.bf16.msrb.mxu0 %v5768_v15  ;;  %4005 = vmatmul.bf16.vlgmr.msra.gmra.mxu1 %v7098_v22 }
 0x1e5   :  { %4366 = vmatpush.bf16.msrb.mxu1 %v7060_v26  ;;  %v7103_v26 = vld [vmem:[#allocation1 + $0x24] sm:$0xff]  ;;  %v3747_v0 = vadd.f32 %v10137_v32, %v3734_v12  ;;  %v3708_v32 = vadd.f32 %v10109_v25, %v10037_v44  ;;  %v4050_v25 = vpack.c.bf16 %v9451_v47, %v9451_v47 }
 0x1e6   :  { %4014 = vmatpush.bf16.msra.mxu2 %v6128_v2  ;;  %v7082_v2 = vld [vmem:[%s10407_s3 + $0xe8] sm:$0xff]  ;;  %v7077_v44 = vld [vmem:[%s10407_s3 + $0xc0] sm:$0xff] }
 0x1e7   :  { %4029 = vmatpush.bf16.msrb.mxu3 %v6248_v51  ;;  %v3760_v31 = vadd.f32 %v10237_v28, %v3747_v0 }
 0x1e8   :  { %3991 = vmatpush.bf16.msrb.mxu0 %v5748_v17  ;;  %v3785_v7 = vpop.f32.mrf.mxu0 }
 0x1e9   :  { %4367 = vmatpush.bf16.msrb.mxu1 %v7059_v1  ;;  %v3772_v4 = vpop.f32.mrf.mxu3  ;;  %v3800_v61 = vpop.f32.mrf.mxu1  ;;  %v7062_v1 = vld [vmem:[%s10407_s3 + $0x48] sm:$0xff] }
 0x1ea   :  { %4015 = vmatpush.bf16.msra.mxu2 %v6108_v19  ;;  %v7080_v19 = vld [vmem:[%s10407_s3 + $0xd8] sm:$0xff] }
 0x1eb   :  { %4030 = vmatpush.bf16.msrb.mxu3 %v6228_v21  ;;  %3992 = vmatmul.bf16.vlgmr.msrb.gmra.mxu0 %v7099_v38  ;;  %v4051_v21 = vpack.c.bf16 %v3708_v32, %v3708_v32 }
 0x1ec   :  { %4042 = vmatpush.bf16.msra.mxu0 %v6408_v14 }
 0x1ed   :  { %4368 = vmatpush.bf16.msrb.mxu1 %v7058_v42 }
 0x1ee   :  { %4016 = vmatpush.bf16.msra.mxu2 %v6088_v36  ;;  %4031 = vmatmul.bf16.vlgmr.msrb.gmra.mxu3 %v7100_v35  ;;  %v3773_v36 = vadd.f32 %v3772_v4, %v3760_v31 }
 0x1ef   :  { %4392 = vmatpush.bf16.msra.mxu3 %v7076_v18 }
 0x1f0   :  { %4043 = vmatpush.bf16.msra.mxu0 %v6388_v54  ;;  %v3787_v51 = vpop.f32.mrf.mxu0  ;;  %v3786_v28 = vadd.f32 %v3785_v7, %v3773_v36 }
 0x1f1   :  { %4369 = vmatpush.bf16.msrb.mxu1 %v7057_v16  ;;  %v3774_v15 = vpop.f32.mrf.mxu3 }
 0x1f2   :  { %4017 = vmatpush.bf16.msra.mxu2 %v6068_v40  ;;  %v3799_v14 = vadd.f32 %v10293_v48, %v3786_v28 }
 0x1f3   :  { %4393 = vmatpush.bf16.msra.mxu3 %v7075_v52 }
 0x1f4   :  { %4405 = vmatpush.bf16.msrb.mxu0 %v7084_v37 }
 0x1f5   :  { %4018 = vmatmul.bf16.vlgmr.msra.gmra.mxu2 %v7101_v58  ;;  %4370 = vmatpush.bf16.msrb.mxu1 %v7056_v57 }
 0x1f6   :  { %4379 = vmatpush.bf16.msrb.mxu2 %v7068_v53 }
 0x1f7   :  { %4394 = vmatpush.bf16.msra.mxu3 %v7074_v55 }
 0x1f8   :  { %4406 = vmatpush.bf16.msrb.mxu0 %v7083_v59  ;;  %v3811_v24 = vpop.f32.mrf.mxu2 }
 0x1f9   :  { %4371 = vmatpush.bf16.msrb.mxu1 %v7055_v5  ;;  %v3812_v41 = vadd.f32 %v3811_v24, %v3799_v14 }
 0x1fa   :  { %4380 = vmatpush.bf16.msrb.mxu2 %v7067_v56 }
 0x1fb   :  { %4395 = vmatpush.bf16.msra.mxu3 %v7073_v33  ;;  %6413 = vmatmul.msk.bf16.vlgmr.msra.gmra.mxu0 %vm3201_vm0, %v7103_v26  ;;  %v7086_v26 = vld [vmem:[%s10407_s3 + $0x108] sm:$0xff] }
 0x1fc   :  { %4407 = vmatpush.bf16.msrb.mxu0 %v7082_v2 }
 0x1fd   :  { %4372 = vmatpush.bf16.msrb.mxu1 %v7054_v9  ;;  %v618_v9 = vperm.slane %v10310_v63, 4  ;;  %v7085_v63 = vld [vmem:[%s10407_s3 + $0x100] sm:$0xff] }
 0x1fe   :  { %4381 = vmatpush.bf16.msrb.mxu2 %v7066_v62  ;;  %v4128_v62 = vld [vmem:[%s10407_s3 + $0x128] sm:$0xf] }
 0x1ff   :  { %4396 = vmatpush.bf16.msra.mxu3 %v7072_v8  ;;  %v4282_v3 = vunpack.c.l.b16 %v4128_v62  ;;  %v7089_v8 = vld [vmem:[%s10407_s3 + $0x120] sm:$0xff] }
 0x200   :  { %4408 = vmatpush.bf16.msrb.mxu0 %v7081_v10  ;;  %v3813_v17 = vpop.f32.mrf.mxu2  ;;  %v7087_v10 = vld [vmem:[%s10407_s3 + $0x110] sm:$0xff] }
 0x201   :  { %4373 = vmatpush.bf16.msrb.mxu1 %v7053_v13  ;;  %v3850_v18 = vpop.f32.mrf.mxu1  ;;  %v4320_v5 = vpack.c.b16 %v4282_v3, %v4282_v3 }
 0x202   :  { %4382 = vmatpush.bf16.msrb.mxu2 %v7065_v43 }
 0x203   :  { %4397 = vmatpush.bf16.msra.mxu3 %v7071_v11  ;;  %v4364_v7 = vsel %vm4362_vm1, %v4320_v5, 0 }
 0x204   :  { %4409 = vmatpush.bf16.msrb.mxu0 %v7080_v19  ;;  %4374 = vmatmul.bf16.vlgmr.msrb.gmra.mxu1 %v4049_v29 }
 0x205   :  { %4420 = vmatpush.bf16.msra.mxu1 %v4364_v7 }
 0x206   :  { %4383 = vmatpush.bf16.msrb.mxu2 %v7064_v45 }
 0x207   :  { %4398 = vmatpush.bf16.msra.mxu3 %v7070_v20 }
 0x208   :  { %4410 = vmatpush.bf16.msrb.mxu0 %v7079_v49  ;;  %v3837_v39 = vpop.f32.mrf.mxu0 }
 0x209   :  { %v3824_v22 = vpop.f32.mrf.mxu3  ;;  %v3852_v42 = vpop.f32.mrf.mxu1  ;;  %4421 = vmatpush.bf16.msra.mxu1 %v7089_v8 }
 0x20a   :  { %4384 = vmatpush.bf16.msrb.mxu2 %v7063_v27  ;;  %v3825_v60 = vadd.f32 %v3824_v22, %v3812_v41 }
 0x20b   :  { %4399 = vmatpush.bf16.msra.mxu3 %v7069_v30 }
 0x20c   :  { %4411 = vmatpush.bf16.msrb.mxu0 %v7078_v23  ;;  %v3838_v50 = vadd.f32 %v3837_v39, %v3825_v60  ;;  %v7091_v60 = vld [vmem:[%s10408_s4] ss:$0 sm:$0xff] }
 0x20d   :  { %4422 = vmatpush.bf16.msra.mxu1 %v7088_v34 }
 0x20e   :  { %4385 = vmatpush.bf16.msrb.mxu2 %v7062_v1  ;;  %4400 = vmatmul.bf16.vlgmr.msra.gmra.mxu3 %v4051_v21  ;;  %v3851_v53 = vadd.f32 %v3850_v18, %v3838_v50 }
 0x210   :  { %4412 = vmatpush.bf16.msrb.mxu0 %v7077_v44  ;;  %v3839_v40 = vpop.f32.mrf.mxu0 }
 0x211   :  { %v3826_v46 = vpop.f32.mrf.mxu3  ;;  %4423 = vmatpush.bf16.msra.mxu1 %v7087_v10 }
 0x212   :  { %4386 = vmatpush.bf16.msrb.mxu2 %v7061_v6 }
 0x215   :  { %4387 = vmatmul.bf16.vlgmr.msrb.gmra.mxu2 %v4050_v25  ;;  %4424 = vmatpush.bf16.msra.mxu1 %v7086_v26 }
 0x218   :  { %v3863_v52 = vpop.f32.mrf.mxu2 }
 0x219   :  { %v3864_v38 = vadd.f32 %v3863_v52, %v3851_v53  ;;  %v3876_v16 = vpop.f32.mrf.mxu3  ;;  %4425 = vmatpush.bf16.msra.mxu1 %v7085_v63 }
 0x21b   :  { %v3877_v54 = vadd.f32 %v3876_v16, %v3864_v38 }
 0x21d   :  { %v4052_v47 = vpack.c.bf16 %v3877_v54, %v3877_v54 }
 0x21f   :  { %4413 = vmatmul.bf16.vlgmr.msrb.gmra.mxu0 %v4052_v47 }
 0x220   :  { %v3865_v35 = vpop.f32.mrf.mxu2 }
 0x221   :  { %v3878_v37 = vpop.f32.mrf.mxu3  ;;  %v3902_v55 = vpop.f32.mrf.mxu1 }
 0x228   :  { %v3889_v56 = vpop.f32.mrf.mxu0 }
 0x229   :  { %v3904_v48 = vpop.f32.mrf.mxu1  ;;  %v3890_v11 = vadd.f32 %v3889_v56, %v618_v9 }
 0x22b   :  { %v3903_v13 = vadd.f32 %v3902_v55, %v3890_v11 }
 0x230   :  { %v3891_v58 = vpop.f32.mrf.mxu0 }
 0x231   :  { %v3928_v57 = vpop.f32.mrf.mxu3 }
 0x238   :  { %v3915_v59 = vpop.f32.mrf.mxu2 }
 0x239   :  { %v3930_v33 = vpop.f32.mrf.mxu3  ;;  %v3916_v51 = vadd.f32 %v3915_v59, %v3903_v13 }
 0x23b   :  { %v3929_v24 = vadd.f32 %v3928_v57, %v3916_v51 }
 0x240   :  { %v3917_v4 = vpop.f32.mrf.mxu2 }
 0x241   :  { %v3954_v2 = vpop.f32.mrf.mxu1 }
 0x248   :  { %v3941_v43 = vpop.f32.mrf.mxu0 }
 0x249   :  { %v3956_v61 = vpop.f32.mrf.mxu1  ;;  %v3942_v27 = vadd.f32 %v3941_v43, %v3929_v24 }
 0x24b   :  { %v3955_v49 = vadd.f32 %v3954_v2, %v3942_v27 }
 0x250   :  { %v3943_v12 = vpop.f32.mrf.mxu0 }
 0x251   :  { %v3980_v45 = vpop.f32.mrf.mxu3 }
 0x258   :  { %v3967_v15 = vpop.f32.mrf.mxu2 }
 0x259   :  { %v3982_v19 = vpop.f32.mrf.mxu3  ;;  %v3968_v29 = vadd.f32 %v3967_v15, %v3955_v49 }
 0x25b   :  { %v3981_v32 = vadd.f32 %v3980_v45, %v3968_v29 }
 0x260   :  { %v3969_v20 = vpop.f32.mrf.mxu2 }
 0x261   :  { %v4006_v0 = vpop.f32.mrf.mxu1 }
 0x268   :  { %v3993_v30 = vpop.f32.mrf.mxu0 }
 0x269   :  { %v4008_v1 = vpop.f32.mrf.mxu1  ;;  %v3994_v31 = vadd.f32 %v3993_v30, %v3981_v32 }
 0x26b   :  { %v4007_v17 = vadd.f32 %v4006_v0, %v3994_v31 }
 0x270   :  { %v3995_v6 = vpop.f32.mrf.mxu0 }
 0x271   :  { %v4032_v23 = vpop.f32.mrf.mxu3 }
 0x278   :  { %v4019_v21 = vpop.f32.mrf.mxu2  ;;  %v4045_v28 = vpop.f32.mrf.mxu0 }
 0x279   :  { %v4020_v36 = vadd.f32 %v4019_v21, %v4007_v17  ;;  %v4034_v25 = vpop.f32.mrf.mxu3 }
 0x27b   :  { %v4033_v44 = vadd.f32 %v4032_v23, %v4020_v36 }
 0x27d   :  { %v4046_v18 = vadd.f32 %v4045_v28, %v4033_v44 }
 0x27f   :  { %v4053_v14 = vpack.c.bf16 %v4046_v18, %v4046_v18 }
 0x280   :  { %v4021_v22 = vpop.f32.mrf.mxu2  ;;  %v4047_v39 = vpop.f32.mrf.mxu0 }
 0x281   :  { %6562 = vmatmul.msk.bf16.vlgmr.msra.gmra.mxu1 %vm4358_vm2, %v4053_v14  ;;  %v4375_v41 = vpop.f32.mrf.mxu1 }
 0x282   :  { %v4376_v40 = vadd.f32 %v7091_v60, %v4375_v41 }
 0x289   :  { %v4377_v42 = vpop.f32.mrf.mxu1 }
 0x291   :  { %v4401_v46 = vpop.f32.mrf.mxu3 }
 0x298   :  { %v4388_v50 = vpop.f32.mrf.mxu2 }
 0x299   :  { %v4389_v52 = vadd.f32 %v4388_v50, %v4376_v40  ;;  %v4403_v38 = vpop.f32.mrf.mxu3 }
 0x29b   :  { %v4402_v53 = vadd.f32 %v4401_v46, %v4389_v52 }
 0x29c   :  { %v4414_v54 = vpop.f32.mrf.mxu0 }
 0x29d   :  { %v4415_v47 = vadd.f32 %v4414_v54, %v4402_v53 }
 0x2a0   :  { %v4390_v16 = vpop.f32.mrf.mxu2 }
 0x2a4   :  { %v4416_v35 = vpop.f32.mrf.mxu0 }
 0x2fe   :  { %v4427_v37 = vpop.f32.mrf.mxu1 }
 0x2ff   :  { %v4428_v55 = vadd.f32 %v4427_v37, %v4415_v47 }
 0x301   :  { %4432 = vst.msk [vmem:[#allocation2] sm:$0x3] %vm4431_vm3, %v4428_v55 }
 0x302   :  { %4443 = dma.vmem_to_hbm [thread:$0]  %s4439_s17, 32, %s4441_s20, [#allocation3]  }
 0x306   :  { %v4429_v56 = vpop.f32.mrf.mxu1 }
 0x307   :  { %7128 = dma.done.wait [#allocation3], 32  }
 0x308   :  { %7129 = vsyncadd [#allocation3], 4294967264 }
 0x309   :  { %4448 = vsyncpa [#allocation3], 1 }

</bundles_post_ra>
